<compile_context>
chip_gen: v7x
topology: tpu7x:2x2x1
jax: 0.10.0
libtpu: 0.0.40
codegen_flags: <defaults>
</compile_context>

<pallas_src>
import jax
import jax.numpy as jnp
from jax.experimental import pallas as pl
from jax.experimental.pallas import tpu as pltpu

# ---------------- small synthetic dimensions (stand-ins for the 768-dim model) ----------------
B = 2             # batch
IMG_C = 1         # PSAT img_channels=1
IMG_HW = 16       # spatial
HP = IMG_HW + 2   # padded spatial for the 3x3 same conv
SEQ = 8           # text sequence length
EMBED = 32        # stand-in for embed_dim=768
HEADS = 4
HEAD_DIM = EMBED // HEADS
FFN = 4 * EMBED
CONV_C = 8        # conv stem channels of the synthetic image backbone
VOCAB = 64
OUT_PAD = 128     # lane-padded fc output width (column 0 is the real logit)
VEC_W = 128       # lane width of the packed bias/scale table (>= 3*EMBED, FFN, OUT_PAD)
NEG_INF = -1e9

# rows of the packed [N_VEC_ROWS, VEC_W] bias/scale table (lane 0 .. width-1 are real data)
ROW_IMG_HEAD_B = 0    # [:EMBED]
ROW_EMB_LN_G = 1      # [:EMBED]
ROW_EMB_LN_B = 2      # [:EMBED]
ROW_BQKV = 3          # [:3*EMBED]  (q part pre-scaled by 1/sqrt(HEAD_DIM))
ROW_BO = 4            # [:EMBED]
ROW_LN1_G = 5         # [:EMBED]
ROW_LN1_B = 6         # [:EMBED]
ROW_B1 = 7            # [:FFN]
ROW_B2 = 8            # [:EMBED]
ROW_LN2_G = 9         # [:EMBED]
ROW_LN2_B = 10        # [:EMBED]
ROW_POOL_B = 11       # [:EMBED]
ROW_FC_B = 12         # [:OUT_PAD]
N_VEC_ROWS = 16       # sublane-padded


# ===================================== fused Pallas kernel ====================================


def _layernorm(x, g, b, eps=1e-12):
    mu = jnp.mean(x, axis=-1, keepdims=True)
    var = jnp.mean(jnp.square(x - mu), axis=-1, keepdims=True)
    return (x - mu) * jax.lax.rsqrt(var + eps) * g + b


def _fused_forward_kernel(
    # image branch
    imgp_ref,         # [B, HP, HP]            f32  (VMEM)  zero-padded single-channel image
    conv_wb_ref,      # [10, CONV_C]           f32  (SMEM)  rows 0..8: 3x3 taps, row 9: bias
    img_head_w_ref,   # [CONV_C, EMBED]        bf16 (VMEM)
    # text branch
    x_emb_ref,        # [B*SEQ, EMBED]         f32  (VMEM)  word + position embeddings
    attn_bias_ref,    # [B*SEQ, B*SEQ]         f32  (VMEM)  padding + block-diag batch mask
    wqkv_ref,         # [EMBED, 3*EMBED]       bf16 (Wq pre-scaled by 1/sqrt(HEAD_DIM))
    wo_ref,           # [EMBED, EMBED]         bf16
    w1_ref,           # [EMBED, FFN]           bf16
    w2_ref,           # [FFN, EMBED]           bf16
    pool_w_ref,       # [EMBED, EMBED]         bf16
    # fusion head
    fc_w_img_ref,     # [EMBED, OUT_PAD]       bf16
    fc_w_txt_ref,     # [EMBED, OUT_PAD]       bf16
    # packed bias / LayerNorm-scale table
    vecs_ref,         # [N_VEC_ROWS, VEC_W]    f32  (VMEM)
    # output
    out_ref,          # [B, OUT_PAD]           f32
):
    f32 = jnp.float32
    bf16 = jnp.bfloat16

    vecs = vecs_ref[...]                                             # [16, 128] f32, loaded once
    row = lambda r, w: vecs[r:r + 1, :w]                             # static row/lane slice

    # ---------------- image encoder: 3x3 same-pad conv (C=1) + ReLU + GAP + linear head -------
    xp = imgp_ref[...]                                               # [B, HP, HP] f32
    taps = [xp[:, di:di + IMG_HW, dj:dj + IMG_HW]                    # 9 shifted views
            for di in range(3) for dj in range(3)]
    inv_hw = 1.0 / float(IMG_HW * IMG_HW)
    pooled_cols = []
    for c in range(CONV_C):
        acc = conv_wb_ref[0, c] * taps[0]                            # scalar (SMEM) * vector
        for t in range(1, 9):
            acc = acc + conv_wb_ref[t, c] * taps[t]                  # VPU FMAs
        acc = jnp.maximum(acc + conv_wb_ref[9, c], 0.0)              # ReLU
        pooled_cols.append(
            jnp.sum(jnp.sum(acc, axis=2), axis=1, keepdims=True) * inv_hw)  # [B, 1] GAP
    pooled = jnp.concatenate(pooled_cols, axis=1)                    # [B, CONV_C]
    img_feat = (jnp.dot(pooled.astype(bf16), img_head_w_ref[...],
                        preferred_element_type=f32)
                + row(ROW_IMG_HEAD_B, EMBED))                        # [B, EMBED]

    # ---------------- text encoder: 1-layer BERT stand-in, pooler_output ----------------------
    x = _layernorm(x_emb_ref[...], row(ROW_EMB_LN_G, EMBED), row(ROW_EMB_LN_B, EMBED))

    # fused QKV: one MXU push with N = 3*EMBED lanes (scale folded into Wq/bq at prep time)
    qkv = (jnp.dot(x.astype(bf16), wqkv_ref[...], preferred_element_type=f32)
           + row(ROW_BQKV, 3 * EMBED))                               # [B*S, 3*D] f32
    qkv_bf = qkv.astype(bf16)                                        # one cast for all heads
    bias = attn_bias_ref[...]                                        # [B*S, B*S]

    head_outs = []
    for h in range(HEADS):                                           # unrolled, all in-VMEM
        q = qkv_bf[:, h * HEAD_DIM:(h + 1) * HEAD_DIM]               # [B*S, Dh]
        k = qkv_bf[:, EMBED + h * HEAD_DIM:EMBED + (h + 1) * HEAD_DIM]
        v = qkv_bf[:, 2 * EMBED + h * HEAD_DIM:2 * EMBED + (h + 1) * HEAD_DIM]
        s = jnp.dot(q, k.T, preferred_element_type=f32) + bias       # [B*S, B*S]
        s = s - jnp.max(s, axis=-1, keepdims=True)                   # softmax in f32
        p = jnp.exp(s)
        p = p * pl.reciprocal(jnp.sum(p, axis=-1, keepdims=True), approx=True)
        head_outs.append(jnp.dot(p.astype(bf16), v, preferred_element_type=f32))
    attn = jnp.concatenate(head_outs, axis=1)                        # [B*S, D]
    attn = (jnp.dot(attn.astype(bf16), wo_ref[...], preferred_element_type=f32)
            + row(ROW_BO, EMBED))
    h1 = _layernorm(x + attn, row(ROW_LN1_G, EMBED), row(ROW_LN1_B, EMBED))

    ff = (jnp.dot(h1.astype(bf16), w1_ref[...], preferred_element_type=f32)
          + row(ROW_B1, FFN))
    ff = jax.nn.gelu(ff, approximate=True)                           # f32 epilogue (tanh approx)
    ff = (jnp.dot(ff.astype(bf16), w2_ref[...], preferred_element_type=f32)
          + row(ROW_B2, EMBED))
    h2 = _layernorm(h1 + ff, row(ROW_LN2_G, EMBED), row(ROW_LN2_B, EMBED))

    # pooler: tanh(W * h[CLS])
    cls_rows = [h2[b * SEQ:b * SEQ + 1, :] for b in range(B)]        # 8-aligned row slices
    cls = jnp.concatenate(cls_rows, axis=0) if B > 1 else cls_rows[0]
    text_feat = jnp.tanh(jnp.dot(cls.astype(bf16), pool_w_ref[...],
                                 preferred_element_type=f32) + row(ROW_POOL_B, EMBED))

    # ---------------- fusion head: Linear(cat(img, text)) -> lane-padded logits ---------------
    logits = (jnp.dot(img_feat.astype(bf16), fc_w_img_ref[...], preferred_element_type=f32)
              + jnp.dot(text_feat.astype(bf16), fc_w_txt_ref[...], preferred_element_type=f32)
              + row(ROW_FC_B, OUT_PAD))
    out_ref[...] = logits                                            # [B, OUT_PAD] unmasked vst


# ===================================== parameter handling =====================================


def init_params(key):
    ks = jax.random.split(key, 16)

    def dense(k, shape, scale=0.02):
        return scale * jax.random.normal(k, shape, jnp.float32)

    p = {}
    # image encoder (synthetic resnet18 stand-in)
    p["conv_w"] = dense(ks[0], (9 * IMG_C, CONV_C))
    p["conv_b"] = jnp.zeros((CONV_C,), jnp.float32)
    p["img_head_w"] = dense(ks[1], (CONV_C, EMBED))
    p["img_head_b"] = jnp.zeros((EMBED,), jnp.float32)
    # text encoder (synthetic BERT stand-in)
    p["word_emb"] = dense(ks[2], (VOCAB, EMBED))
    p["pos_emb"] = dense(ks[3], (SEQ, EMBED))
    p["emb_ln_g"] = jnp.ones((EMBED,), jnp.float32)
    p["emb_ln_b"] = jnp.zeros((EMBED,), jnp.float32)
    p["wq"] = dense(ks[4], (EMBED, EMBED)); p["bq"] = jnp.zeros((EMBED,), jnp.float32)
    p["wk"] = dense(ks[5], (EMBED, EMBED)); p["bk"] = jnp.zeros((EMBED,), jnp.float32)
    p["wv"] = dense(ks[6], (EMBED, EMBED)); p["bv"] = jnp.zeros((EMBED,), jnp.float32)
    p["wo"] = dense(ks[7], (EMBED, EMBED)); p["bo"] = jnp.zeros((EMBED,), jnp.float32)
    p["ln1_g"] = jnp.ones((EMBED,), jnp.float32)
    p["ln1_b"] = jnp.zeros((EMBED,), jnp.float32)
    p["w1"] = dense(ks[8], (EMBED, FFN)); p["b1"] = jnp.zeros((FFN,), jnp.float32)
    p["w2"] = dense(ks[9], (FFN, EMBED)); p["b2"] = jnp.zeros((EMBED,), jnp.float32)
    p["ln2_g"] = jnp.ones((EMBED,), jnp.float32)
    p["ln2_b"] = jnp.zeros((EMBED,), jnp.float32)
    p["pool_w"] = dense(ks[10], (EMBED, EMBED))
    p["pool_b"] = jnp.zeros((EMBED,), jnp.float32)
    # fusion head: nn.Linear(embed_dim * 2, 1)
    p["fc_w"] = dense(ks[11], (2 * EMBED, 1))
    p["fc_b"] = jnp.zeros((1,), jnp.float32)
    return p


def prepare_params(p):
    """One-time reshape / packing / bf16 cast of weights into kernel-ready layout."""
    f32, bf16 = jnp.float32, jnp.bfloat16
    D = EMBED
    scale = 1.0 / float(HEAD_DIM) ** 0.5

    # conv taps (rows 0..8) + conv bias (row 9) in one SMEM-bound array
    conv_wb = jnp.concatenate([p["conv_w"], p["conv_b"].reshape(1, CONV_C)], axis=0).astype(f32)

    # fused QKV with the attention scale folded into the Q columns / bias
    wqkv = jnp.concatenate([p["wq"] * scale, p["wk"], p["wv"]], axis=1).astype(bf16)
    bqkv = jnp.concatenate([p["bq"] * scale, p["bk"], p["bv"]])

    # packed bias / LayerNorm-scale table -> one VMEM DMA instead of 13
    vecs = jnp.zeros((N_VEC_ROWS, VEC_W), f32)

    def put(arr, r, vec):
        vec = jnp.asarray(vec, f32).reshape(-1)
        return arr.at[r, :vec.shape[0]].set(vec)

    vecs = put(vecs, ROW_IMG_HEAD_B, p["img_head_b"])
    vecs = put(vecs, ROW_EMB_LN_G, p["emb_ln_g"])
    vecs = put(vecs, ROW_EMB_LN_B, p["emb_ln_b"])
    vecs = put(vecs, ROW_BQKV, bqkv)
    vecs = put(vecs, ROW_BO, p["bo"])
    vecs = put(vecs, ROW_LN1_G, p["ln1_g"])
    vecs = put(vecs, ROW_LN1_B, p["ln1_b"])
    vecs = put(vecs, ROW_B1, p["b1"])
    vecs = put(vecs, ROW_B2, p["b2"])
    vecs = put(vecs, ROW_LN2_G, p["ln2_g"])
    vecs = put(vecs, ROW_LN2_B, p["ln2_b"])
    vecs = put(vecs, ROW_POOL_B, p["pool_b"])
    vecs = put(vecs, ROW_FC_B, jnp.zeros((OUT_PAD,), f32).at[0].set(p["fc_b"][0]))

    # fusion fc, lane-padded to 128 output lanes (only column 0 is a real logit)
    fc_w_pad = jnp.zeros((2 * D, OUT_PAD), f32).at[:, 0].set(p["fc_w"][:, 0])

    return {
        "conv_wb": conv_wb,
        "img_head_w": p["img_head_w"].astype(bf16),
        "word_emb": p["word_emb"].astype(f32),
        "pos_emb": p["pos_emb"].astype(f32),
        "wqkv": wqkv,
        "wo": p["wo"].astype(bf16),
        "w1": p["w1"].astype(bf16),
        "w2": p["w2"].astype(bf16),
        "pool_w": p["pool_w"].astype(bf16),
        "fc_w_img": fc_w_pad[:D].astype(bf16),
        "fc_w_txt": fc_w_pad[D:].astype(bf16),
        "vecs": vecs,
    }


# ======================================== forward pass ========================================


@jax.jit
def multimodal_forward(pp, img_nchw, input_ids, attention_mask):
    f32 = jnp.float32

    # --- image prep: NCHW [B,1,H,W] -> [B,H,W], zero same-pad for the 3x3 conv ---------------
    img = img_nchw[:, 0, :, :].astype(f32)
    imgp = jnp.pad(img, ((0, 0), (1, 1), (1, 1)))                   # [B, HP, HP]

    # --- text prep: embedding lookup + positional embeddings (XLA gather, stays out of kernel)
    ids = jnp.clip(input_ids, 0, VOCAB - 1)
    x_emb = (pp["word_emb"][ids] + pp["pos_emb"][None, :, :]).reshape(B * SEQ, EMBED).astype(f32)

    # --- additive attention bias: key-padding mask + block-diagonal batch mask ---------------
    # Flattened to [B*S, B*S] so the kernel runs all heads/batches as plain 2-D matmuls.
    key_bias = (1.0 - attention_mask.astype(f32)) * NEG_INF          # [B, S]
    same_batch = jnp.arange(B)[:, None, None, None] == jnp.arange(B)[None, None, :, None]
    bias = jnp.where(same_batch, key_bias[None, None, :, :], NEG_INF)        # [B,1,B,S]
    bias = jnp.broadcast_to(bias, (B, SEQ, B, SEQ)).reshape(B * SEQ, B * SEQ)

    vmem = pl.BlockSpec(memory_space=pltpu.MemorySpace.VMEM)
    smem = pl.BlockSpec(memory_space=pltpu.MemorySpace.SMEM)

    args = (
        imgp, pp["conv_wb"], pp["img_head_w"],
        x_emb, bias,
        pp["wqkv"], pp["wo"], pp["w1"], pp["w2"], pp["pool_w"],
        pp["fc_w_img"], pp["fc_w_txt"], pp["vecs"],
    )
    in_specs = [vmem, smem] + [vmem] * (len(args) - 2)

    out = pl.pallas_call(
        _fused_forward_kernel,
        out_shape=jax.ShapeDtypeStruct((B, OUT_PAD), f32),
        in_specs=in_specs,
        out_specs=vmem,
    )(*args)

    return out[:, :1]                                                # [B, 1] logits


# ============================================ main =============================================

if __name__ == "__main__":
    key = jax.random.PRNGKey(0)
    kp, ki, kt = jax.random.split(key, 3)

    params = init_params(kp)
    prepped = prepare_params(params)

    # PyTorch-style NCHW image input (PSAT has img_channels=1)
    img = jax.random.normal(ki, (B, IMG_C, IMG_HW, IMG_HW), jnp.float32)
    text_input_ids = jax.random.randint(kt, (B, SEQ), 0, VOCAB, jnp.int32)
    text_attention_mask = jnp.ones((B, SEQ), jnp.int32).at[:, SEQ - 2:].set(0)

    out = multimodal_forward(prepped, img, text_input_ids, text_attention_mask)
    out = jax.block_until_ready(out)
    assert out.shape == (B, 1) and out.dtype == jnp.float32
    assert bool(jnp.all(jnp.isfinite(out)))
    print("KERNEL_OK")
</pallas_src>

<mosaic_0001>
module attributes {stable_mosaic.version = 11 : i64} {
  func.func @_fused_forward_kernel(%arg0: memref<2x18x18xf32, #tpu.memory_space<vmem>>, %arg1: memref<10x8xf32, #tpu.memory_space<smem>>, %arg2: memref<8x32xbf16, #tpu.memory_space<vmem>>, %arg3: memref<16x32xf32, #tpu.memory_space<vmem>>, %arg4: memref<16x16xf32, #tpu.memory_space<vmem>>, %arg5: memref<32x96xbf16, #tpu.memory_space<vmem>>, %arg6: memref<32x32xbf16, #tpu.memory_space<vmem>>, %arg7: memref<32x128xbf16, #tpu.memory_space<vmem>>, %arg8: memref<128x32xbf16, #tpu.memory_space<vmem>>, %arg9: memref<32x32xbf16, #tpu.memory_space<vmem>>, %arg10: memref<32x128xbf16, #tpu.memory_space<vmem>>, %arg11: memref<32x128xbf16, #tpu.memory_space<vmem>>, %arg12: memref<16x128xf32, #tpu.memory_space<vmem>>, %arg13: memref<2x128xf32, #tpu.memory_space<vmem>>) attributes {dimension_semantics = [], scalar_prefetch = 0 : i64, scratch_operands = 0 : i64, tpu.core_type = #tpu.core_type<tc>} {
    %c0 = arith.constant 0 : index
    %c0_0 = arith.constant 0 : index
    %0 = vector.load %arg12[%c0, %c0_0] : memref<16x128xf32, #tpu.memory_space<vmem>>, vector<16x128xf32>
    %c0_1 = arith.constant 0 : index
    %c0_2 = arith.constant 0 : index
    %c0_3 = arith.constant 0 : index
    %1 = vector.load %arg0[%c0_1, %c0_2, %c0_3] : memref<2x18x18xf32, #tpu.memory_space<vmem>>, vector<2x18x18xf32>
    %2 = vector.extract_strided_slice %1 {offsets = [0, 0, 0], sizes = [2, 16, 16], strides = [1, 1, 1]} : vector<2x18x18xf32> to vector<2x16x16xf32>
    %3 = vector.extract_strided_slice %1 {offsets = [0, 0, 1], sizes = [2, 16, 16], strides = [1, 1, 1]} : vector<2x18x18xf32> to vector<2x16x16xf32>
    %4 = vector.extract_strided_slice %1 {offsets = [0, 0, 2], sizes = [2, 16, 16], strides = [1, 1, 1]} : vector<2x18x18xf32> to vector<2x16x16xf32>
    %5 = vector.extract_strided_slice %1 {offsets = [0, 1, 0], sizes = [2, 16, 16], strides = [1, 1, 1]} : vector<2x18x18xf32> to vector<2x16x16xf32>
    %6 = vector.extract_strided_slice %1 {offsets = [0, 1, 1], sizes = [2, 16, 16], strides = [1, 1, 1]} : vector<2x18x18xf32> to vector<2x16x16xf32>
    %7 = vector.extract_strided_slice %1 {offsets = [0, 1, 2], sizes = [2, 16, 16], strides = [1, 1, 1]} : vector<2x18x18xf32> to vector<2x16x16xf32>
    %8 = vector.extract_strided_slice %1 {offsets = [0, 2, 0], sizes = [2, 16, 16], strides = [1, 1, 1]} : vector<2x18x18xf32> to vector<2x16x16xf32>
    %9 = vector.extract_strided_slice %1 {offsets = [0, 2, 1], sizes = [2, 16, 16], strides = [1, 1, 1]} : vector<2x18x18xf32> to vector<2x16x16xf32>
    %10 = vector.extract_strided_slice %1 {offsets = [0, 2, 2], sizes = [2, 16, 16], strides = [1, 1, 1]} : vector<2x18x18xf32> to vector<2x16x16xf32>
    %c0_4 = arith.constant 0 : index
    %c0_5 = arith.constant 0 : index
    %11 = memref.load %arg1[%c0_4, %c0_5] : memref<10x8xf32, #tpu.memory_space<smem>>
    %12 = vector.broadcast %11 : f32 to vector<2x16x16xf32>
    %13 = arith.mulf %12, %2 : vector<2x16x16xf32>
    %c1 = arith.constant 1 : index
    %c0_6 = arith.constant 0 : index
    %14 = memref.load %arg1[%c1, %c0_6] : memref<10x8xf32, #tpu.memory_space<smem>>
    %15 = vector.broadcast %14 : f32 to vector<2x16x16xf32>
    %16 = arith.mulf %15, %3 : vector<2x16x16xf32>
    %17 = arith.addf %13, %16 : vector<2x16x16xf32>
    %c2 = arith.constant 2 : index
    %c0_7 = arith.constant 0 : index
    %18 = memref.load %arg1[%c2, %c0_7] : memref<10x8xf32, #tpu.memory_space<smem>>
    %19 = vector.broadcast %18 : f32 to vector<2x16x16xf32>
    %20 = arith.mulf %19, %4 : vector<2x16x16xf32>
    %21 = arith.addf %17, %20 : vector<2x16x16xf32>
    %c3 = arith.constant 3 : index
    %c0_8 = arith.constant 0 : index
    %22 = memref.load %arg1[%c3, %c0_8] : memref<10x8xf32, #tpu.memory_space<smem>>
    %23 = vector.broadcast %22 : f32 to vector<2x16x16xf32>
    %24 = arith.mulf %23, %5 : vector<2x16x16xf32>
    %25 = arith.addf %21, %24 : vector<2x16x16xf32>
    %c4 = arith.constant 4 : index
    %c0_9 = arith.constant 0 : index
    %26 = memref.load %arg1[%c4, %c0_9] : memref<10x8xf32, #tpu.memory_space<smem>>
    %27 = vector.broadcast %26 : f32 to vector<2x16x16xf32>
    %28 = arith.mulf %27, %6 : vector<2x16x16xf32>
    %29 = arith.addf %25, %28 : vector<2x16x16xf32>
    %c5 = arith.constant 5 : index
    %c0_10 = arith.constant 0 : index
    %30 = memref.load %arg1[%c5, %c0_10] : memref<10x8xf32, #tpu.memory_space<smem>>
    %31 = vector.broadcast %30 : f32 to vector<2x16x16xf32>
    %32 = arith.mulf %31, %7 : vector<2x16x16xf32>
    %33 = arith.addf %29, %32 : vector<2x16x16xf32>
    %c6 = arith.constant 6 : index
    %c0_11 = arith.constant 0 : index
    %34 = memref.load %arg1[%c6, %c0_11] : memref<10x8xf32, #tpu.memory_space<smem>>
    %35 = vector.broadcast %34 : f32 to vector<2x16x16xf32>
    %36 = arith.mulf %35, %8 : vector<2x16x16xf32>
    %37 = arith.addf %33, %36 : vector<2x16x16xf32>
    %c7 = arith.constant 7 : index
    %c0_12 = arith.constant 0 : index
    %38 = memref.load %arg1[%c7, %c0_12] : memref<10x8xf32, #tpu.memory_space<smem>>
    %39 = vector.broadcast %38 : f32 to vector<2x16x16xf32>
    %40 = arith.mulf %39, %9 : vector<2x16x16xf32>
    %41 = arith.addf %37, %40 : vector<2x16x16xf32>
    %c8 = arith.constant 8 : index
    %c0_13 = arith.constant 0 : index
    %42 = memref.load %arg1[%c8, %c0_13] : memref<10x8xf32, #tpu.memory_space<smem>>
    %43 = vector.broadcast %42 : f32 to vector<2x16x16xf32>
    %44 = arith.mulf %43, %10 : vector<2x16x16xf32>
    %45 = arith.addf %41, %44 : vector<2x16x16xf32>
    %c9 = arith.constant 9 : index
    %c0_14 = arith.constant 0 : index
    %46 = memref.load %arg1[%c9, %c0_14] : memref<10x8xf32, #tpu.memory_space<smem>>
    %47 = vector.broadcast %46 : f32 to vector<2x16x16xf32>
    %48 = arith.addf %45, %47 : vector<2x16x16xf32>
    %cst = arith.constant 0.000000e+00 : f32
    %49 = vector.broadcast %cst : f32 to vector<2x16x16xf32>
    %50 = arith.maximumf %48, %49 : vector<2x16x16xf32>
    %cst_15 = arith.constant dense<0.000000e+00> : vector<2x16xf32>
    %51 = vector.multi_reduction <add>, %50, %cst_15 [2] : vector<2x16x16xf32> to vector<2x16xf32>
    %cst_16 = arith.constant dense<0.000000e+00> : vector<2xf32>
    %52 = vector.multi_reduction <add>, %51, %cst_16 [1] : vector<2x16xf32> to vector<2xf32>
    %53 = vector.shape_cast %52 : vector<2xf32> to vector<2x1xf32>
    %cst_17 = arith.constant 3.906250e-03 : f32
    %54 = vector.broadcast %cst_17 : f32 to vector<2x1xf32>
    %55 = arith.mulf %53, %54 : vector<2x1xf32>
    %c0_18 = arith.constant 0 : index
    %c1_19 = arith.constant 1 : index
    %56 = memref.load %arg1[%c0_18, %c1_19] : memref<10x8xf32, #tpu.memory_space<smem>>
    %57 = vector.broadcast %56 : f32 to vector<2x16x16xf32>
    %58 = arith.mulf %57, %2 : vector<2x16x16xf32>
    %c1_20 = arith.constant 1 : index
    %c1_21 = arith.constant 1 : index
    %59 = memref.load %arg1[%c1_20, %c1_21] : memref<10x8xf32, #tpu.memory_space<smem>>
    %60 = vector.broadcast %59 : f32 to vector<2x16x16xf32>
    %61 = arith.mulf %60, %3 : vector<2x16x16xf32>
    %62 = arith.addf %58, %61 : vector<2x16x16xf32>
    %c2_22 = arith.constant 2 : index
    %c1_23 = arith.constant 1 : index
    %63 = memref.load %arg1[%c2_22, %c1_23] : memref<10x8xf32, #tpu.memory_space<smem>>
    %64 = vector.broadcast %63 : f32 to vector<2x16x16xf32>
    %65 = arith.mulf %64, %4 : vector<2x16x16xf32>
    %66 = arith.addf %62, %65 : vector<2x16x16xf32>
    %c3_24 = arith.constant 3 : index
    %c1_25 = arith.constant 1 : index
    %67 = memref.load %arg1[%c3_24, %c1_25] : memref<10x8xf32, #tpu.memory_space<smem>>
    %68 = vector.broadcast %67 : f32 to vector<2x16x16xf32>
    %69 = arith.mulf %68, %5 : vector<2x16x16xf32>
    %70 = arith.addf %66, %69 : vector<2x16x16xf32>
    %c4_26 = arith.constant 4 : index
    %c1_27 = arith.constant 1 : index
    %71 = memref.load %arg1[%c4_26, %c1_27] : memref<10x8xf32, #tpu.memory_space<smem>>
    %72 = vector.broadcast %71 : f32 to vector<2x16x16xf32>
    %73 = arith.mulf %72, %6 : vector<2x16x16xf32>
    %74 = arith.addf %70, %73 : vector<2x16x16xf32>
    %c5_28 = arith.constant 5 : index
    %c1_29 = arith.constant 1 : index
    %75 = memref.load %arg1[%c5_28, %c1_29] : memref<10x8xf32, #tpu.memory_space<smem>>
    %76 = vector.broadcast %75 : f32 to vector<2x16x16xf32>
    %77 = arith.mulf %76, %7 : vector<2x16x16xf32>
    %78 = arith.addf %74, %77 : vector<2x16x16xf32>
    %c6_30 = arith.constant 6 : index
    %c1_31 = arith.constant 1 : index
    %79 = memref.load %arg1[%c6_30, %c1_31] : memref<10x8xf32, #tpu.memory_space<smem>>
    %80 = vector.broadcast %79 : f32 to vector<2x16x16xf32>
    %81 = arith.mulf %80, %8 : vector<2x16x16xf32>
    %82 = arith.addf %78, %81 : vector<2x16x16xf32>
    %c7_32 = arith.constant 7 : index
    %c1_33 = arith.constant 1 : index
    %83 = memref.load %arg1[%c7_32, %c1_33] : memref<10x8xf32, #tpu.memory_space<smem>>
    %84 = vector.broadcast %83 : f32 to vector<2x16x16xf32>
    %85 = arith.mulf %84, %9 : vector<2x16x16xf32>
    %86 = arith.addf %82, %85 : vector<2x16x16xf32>
    %c8_34 = arith.constant 8 : index
    %c1_35 = arith.constant 1 : index
    %87 = memref.load %arg1[%c8_34, %c1_35] : memref<10x8xf32, #tpu.memory_space<smem>>
    %88 = vector.broadcast %87 : f32 to vector<2x16x16xf32>
    %89 = arith.mulf %88, %10 : vector<2x16x16xf32>
    %90 = arith.addf %86, %89 : vector<2x16x16xf32>
    %c9_36 = arith.constant 9 : index
    %c1_37 = arith.constant 1 : index
    %91 = memref.load %arg1[%c9_36, %c1_37] : memref<10x8xf32, #tpu.memory_space<smem>>
    %92 = vector.broadcast %91 : f32 to vector<2x16x16xf32>
    %93 = arith.addf %90, %92 : vector<2x16x16xf32>
    %cst_38 = arith.constant 0.000000e+00 : f32
    %94 = vector.broadcast %cst_38 : f32 to vector<2x16x16xf32>
    %95 = arith.maximumf %93, %94 : vector<2x16x16xf32>
    %cst_39 = arith.constant dense<0.000000e+00> : vector<2x16xf32>
    %96 = vector.multi_reduction <add>, %95, %cst_39 [2] : vector<2x16x16xf32> to vector<2x16xf32>
    %cst_40 = arith.constant dense<0.000000e+00> : vector<2xf32>
    %97 = vector.multi_reduction <add>, %96, %cst_40 [1] : vector<2x16xf32> to vector<2xf32>
    %98 = vector.shape_cast %97 : vector<2xf32> to vector<2x1xf32>
    %cst_41 = arith.constant 3.906250e-03 : f32
    %99 = vector.broadcast %cst_41 : f32 to vector<2x1xf32>
    %100 = arith.mulf %98, %99 : vector<2x1xf32>
    %c0_42 = arith.constant 0 : index
    %c2_43 = arith.constant 2 : index
    %101 = memref.load %arg1[%c0_42, %c2_43] : memref<10x8xf32, #tpu.memory_space<smem>>
    %102 = vector.broadcast %101 : f32 to vector<2x16x16xf32>
    %103 = arith.mulf %102, %2 : vector<2x16x16xf32>
    %c1_44 = arith.constant 1 : index
    %c2_45 = arith.constant 2 : index
    %104 = memref.load %arg1[%c1_44, %c2_45] : memref<10x8xf32, #tpu.memory_space<smem>>
    %105 = vector.broadcast %104 : f32 to vector<2x16x16xf32>
    %106 = arith.mulf %105, %3 : vector<2x16x16xf32>
    %107 = arith.addf %103, %106 : vector<2x16x16xf32>
    %c2_46 = arith.constant 2 : index
    %c2_47 = arith.constant 2 : index
    %108 = memref.load %arg1[%c2_46, %c2_47] : memref<10x8xf32, #tpu.memory_space<smem>>
    %109 = vector.broadcast %108 : f32 to vector<2x16x16xf32>
    %110 = arith.mulf %109, %4 : vector<2x16x16xf32>
    %111 = arith.addf %107, %110 : vector<2x16x16xf32>
    %c3_48 = arith.constant 3 : index
    %c2_49 = arith.constant 2 : index
    %112 = memref.load %arg1[%c3_48, %c2_49] : memref<10x8xf32, #tpu.memory_space<smem>>
    %113 = vector.broadcast %112 : f32 to vector<2x16x16xf32>
    %114 = arith.mulf %113, %5 : vector<2x16x16xf32>
    %115 = arith.addf %111, %114 : vector<2x16x16xf32>
    %c4_50 = arith.constant 4 : index
    %c2_51 = arith.constant 2 : index
    %116 = memref.load %arg1[%c4_50, %c2_51] : memref<10x8xf32, #tpu.memory_space<smem>>
    %117 = vector.broadcast %116 : f32 to vector<2x16x16xf32>
    %118 = arith.mulf %117, %6 : vector<2x16x16xf32>
    %119 = arith.addf %115, %118 : vector<2x16x16xf32>
    %c5_52 = arith.constant 5 : index
    %c2_53 = arith.constant 2 : index
    %120 = memref.load %arg1[%c5_52, %c2_53] : memref<10x8xf32, #tpu.memory_space<smem>>
    %121 = vector.broadcast %120 : f32 to vector<2x16x16xf32>
    %122 = arith.mulf %121, %7 : vector<2x16x16xf32>
    %123 = arith.addf %119, %122 : vector<2x16x16xf32>
    %c6_54 = arith.constant 6 : index
    %c2_55 = arith.constant 2 : index
    %124 = memref.load %arg1[%c6_54, %c2_55] : memref<10x8xf32, #tpu.memory_space<smem>>
    %125 = vector.broadcast %124 : f32 to vector<2x16x16xf32>
    %126 = arith.mulf %125, %8 : vector<2x16x16xf32>
    %127 = arith.addf %123, %126 : vector<2x16x16xf32>
    %c7_56 = arith.constant 7 : index
    %c2_57 = arith.constant 2 : index
    %128 = memref.load %arg1[%c7_56, %c2_57] : memref<10x8xf32, #tpu.memory_space<smem>>
    %129 = vector.broadcast %128 : f32 to vector<2x16x16xf32>
    %130 = arith.mulf %129, %9 : vector<2x16x16xf32>
    %131 = arith.addf %127, %130 : vector<2x16x16xf32>
    %c8_58 = arith.constant 8 : index
    %c2_59 = arith.constant 2 : index
    %132 = memref.load %arg1[%c8_58, %c2_59] : memref<10x8xf32, #tpu.memory_space<smem>>
    %133 = vector.broadcast %132 : f32 to vector<2x16x16xf32>
    %134 = arith.mulf %133, %10 : vector<2x16x16xf32>
    %135 = arith.addf %131, %134 : vector<2x16x16xf32>
    %c9_60 = arith.constant 9 : index
    %c2_61 = arith.constant 2 : index
    %136 = memref.load %arg1[%c9_60, %c2_61] : memref<10x8xf32, #tpu.memory_space<smem>>
    %137 = vector.broadcast %136 : f32 to vector<2x16x16xf32>
    %138 = arith.addf %135, %137 : vector<2x16x16xf32>
    %cst_62 = arith.constant 0.000000e+00 : f32
    %139 = vector.broadcast %cst_62 : f32 to vector<2x16x16xf32>
    %140 = arith.maximumf %138, %139 : vector<2x16x16xf32>
    %cst_63 = arith.constant dense<0.000000e+00> : vector<2x16xf32>
    %141 = vector.multi_reduction <add>, %140, %cst_63 [2] : vector<2x16x16xf32> to vector<2x16xf32>
    %cst_64 = arith.constant dense<0.000000e+00> : vector<2xf32>
    %142 = vector.multi_reduction <add>, %141, %cst_64 [1] : vector<2x16xf32> to vector<2xf32>
    %143 = vector.shape_cast %142 : vector<2xf32> to vector<2x1xf32>
    %cst_65 = arith.constant 3.906250e-03 : f32
    %144 = vector.broadcast %cst_65 : f32 to vector<2x1xf32>
    %145 = arith.mulf %143, %144 : vector<2x1xf32>
    %c0_66 = arith.constant 0 : index
    %c3_67 = arith.constant 3 : index
    %146 = memref.load %arg1[%c0_66, %c3_67] : memref<10x8xf32, #tpu.memory_space<smem>>
    %147 = vector.broadcast %146 : f32 to vector<2x16x16xf32>
    %148 = arith.mulf %147, %2 : vector<2x16x16xf32>
    %c1_68 = arith.constant 1 : index
    %c3_69 = arith.constant 3 : index
    %149 = memref.load %arg1[%c1_68, %c3_69] : memref<10x8xf32, #tpu.memory_space<smem>>
    %150 = vector.broadcast %149 : f32 to vector<2x16x16xf32>
    %151 = arith.mulf %150, %3 : vector<2x16x16xf32>
    %152 = arith.addf %148, %151 : vector<2x16x16xf32>
    %c2_70 = arith.constant 2 : index
    %c3_71 = arith.constant 3 : index
    %153 = memref.load %arg1[%c2_70, %c3_71] : memref<10x8xf32, #tpu.memory_space<smem>>
    %154 = vector.broadcast %153 : f32 to vector<2x16x16xf32>
    %155 = arith.mulf %154, %4 : vector<2x16x16xf32>
    %156 = arith.addf %152, %155 : vector<2x16x16xf32>
    %c3_72 = arith.constant 3 : index
    %c3_73 = arith.constant 3 : index
    %157 = memref.load %arg1[%c3_72, %c3_73] : memref<10x8xf32, #tpu.memory_space<smem>>
    %158 = vector.broadcast %157 : f32 to vector<2x16x16xf32>
    %159 = arith.mulf %158, %5 : vector<2x16x16xf32>
    %160 = arith.addf %156, %159 : vector<2x16x16xf32>
    %c4_74 = arith.constant 4 : index
    %c3_75 = arith.constant 3 : index
    %161 = memref.load %arg1[%c4_74, %c3_75] : memref<10x8xf32, #tpu.memory_space<smem>>
    %162 = vector.broadcast %161 : f32 to vector<2x16x16xf32>
    %163 = arith.mulf %162, %6 : vector<2x16x16xf32>
    %164 = arith.addf %160, %163 : vector<2x16x16xf32>
    %c5_76 = arith.constant 5 : index
    %c3_77 = arith.constant 3 : index
    %165 = memref.load %arg1[%c5_76, %c3_77] : memref<10x8xf32, #tpu.memory_space<smem>>
    %166 = vector.broadcast %165 : f32 to vector<2x16x16xf32>
    %167 = arith.mulf %166, %7 : vector<2x16x16xf32>
    %168 = arith.addf %164, %167 : vector<2x16x16xf32>
    %c6_78 = arith.constant 6 : index
    %c3_79 = arith.constant 3 : index
    %169 = memref.load %arg1[%c6_78, %c3_79] : memref<10x8xf32, #tpu.memory_space<smem>>
    %170 = vector.broadcast %169 : f32 to vector<2x16x16xf32>
    %171 = arith.mulf %170, %8 : vector<2x16x16xf32>
    %172 = arith.addf %168, %171 : vector<2x16x16xf32>
    %c7_80 = arith.constant 7 : index
    %c3_81 = arith.constant 3 : index
    %173 = memref.load %arg1[%c7_80, %c3_81] : memref<10x8xf32, #tpu.memory_space<smem>>
    %174 = vector.broadcast %173 : f32 to vector<2x16x16xf32>
    %175 = arith.mulf %174, %9 : vector<2x16x16xf32>
    %176 = arith.addf %172, %175 : vector<2x16x16xf32>
    %c8_82 = arith.constant 8 : index
    %c3_83 = arith.constant 3 : index
    %177 = memref.load %arg1[%c8_82, %c3_83] : memref<10x8xf32, #tpu.memory_space<smem>>
    %178 = vector.broadcast %177 : f32 to vector<2x16x16xf32>
    %179 = arith.mulf %178, %10 : vector<2x16x16xf32>
    %180 = arith.addf %176, %179 : vector<2x16x16xf32>
    %c9_84 = arith.constant 9 : index
    %c3_85 = arith.constant 3 : index
    %181 = memref.load %arg1[%c9_84, %c3_85] : memref<10x8xf32, #tpu.memory_space<smem>>
    %182 = vector.broadcast %181 : f32 to vector<2x16x16xf32>
    %183 = arith.addf %180, %182 : vector<2x16x16xf32>
    %cst_86 = arith.constant 0.000000e+00 : f32
    %184 = vector.broadcast %cst_86 : f32 to vector<2x16x16xf32>
    %185 = arith.maximumf %183, %184 : vector<2x16x16xf32>
    %cst_87 = arith.constant dense<0.000000e+00> : vector<2x16xf32>
    %186 = vector.multi_reduction <add>, %185, %cst_87 [2] : vector<2x16x16xf32> to vector<2x16xf32>
    %cst_88 = arith.constant dense<0.000000e+00> : vector<2xf32>
    %187 = vector.multi_reduction <add>, %186, %cst_88 [1] : vector<2x16xf32> to vector<2xf32>
    %188 = vector.shape_cast %187 : vector<2xf32> to vector<2x1xf32>
    %cst_89 = arith.constant 3.906250e-03 : f32
    %189 = vector.broadcast %cst_89 : f32 to vector<2x1xf32>
    %190 = arith.mulf %188, %189 : vector<2x1xf32>
    %c0_90 = arith.constant 0 : index
    %c4_91 = arith.constant 4 : index
    %191 = memref.load %arg1[%c0_90, %c4_91] : memref<10x8xf32, #tpu.memory_space<smem>>
    %192 = vector.broadcast %191 : f32 to vector<2x16x16xf32>
    %193 = arith.mulf %192, %2 : vector<2x16x16xf32>
    %c1_92 = arith.constant 1 : index
    %c4_93 = arith.constant 4 : index
    %194 = memref.load %arg1[%c1_92, %c4_93] : memref<10x8xf32, #tpu.memory_space<smem>>
    %195 = vector.broadcast %194 : f32 to vector<2x16x16xf32>
    %196 = arith.mulf %195, %3 : vector<2x16x16xf32>
    %197 = arith.addf %193, %196 : vector<2x16x16xf32>
    %c2_94 = arith.constant 2 : index
    %c4_95 = arith.constant 4 : index
    %198 = memref.load %arg1[%c2_94, %c4_95] : memref<10x8xf32, #tpu.memory_space<smem>>
    %199 = vector.broadcast %198 : f32 to vector<2x16x16xf32>
    %200 = arith.mulf %199, %4 : vector<2x16x16xf32>
    %201 = arith.addf %197, %200 : vector<2x16x16xf32>
    %c3_96 = arith.constant 3 : index
    %c4_97 = arith.constant 4 : index
    %202 = memref.load %arg1[%c3_96, %c4_97] : memref<10x8xf32, #tpu.memory_space<smem>>
    %203 = vector.broadcast %202 : f32 to vector<2x16x16xf32>
    %204 = arith.mulf %203, %5 : vector<2x16x16xf32>
    %205 = arith.addf %201, %204 : vector<2x16x16xf32>
    %c4_98 = arith.constant 4 : index
    %c4_99 = arith.constant 4 : index
    %206 = memref.load %arg1[%c4_98, %c4_99] : memref<10x8xf32, #tpu.memory_space<smem>>
    %207 = vector.broadcast %206 : f32 to vector<2x16x16xf32>
    %208 = arith.mulf %207, %6 : vector<2x16x16xf32>
    %209 = arith.addf %205, %208 : vector<2x16x16xf32>
    %c5_100 = arith.constant 5 : index
    %c4_101 = arith.constant 4 : index
    %210 = memref.load %arg1[%c5_100, %c4_101] : memref<10x8xf32, #tpu.memory_space<smem>>
    %211 = vector.broadcast %210 : f32 to vector<2x16x16xf32>
    %212 = arith.mulf %211, %7 : vector<2x16x16xf32>
    %213 = arith.addf %209, %212 : vector<2x16x16xf32>
    %c6_102 = arith.constant 6 : index
    %c4_103 = arith.constant 4 : index
    %214 = memref.load %arg1[%c6_102, %c4_103] : memref<10x8xf32, #tpu.memory_space<smem>>
    %215 = vector.broadcast %214 : f32 to vector<2x16x16xf32>
    %216 = arith.mulf %215, %8 : vector<2x16x16xf32>
    %217 = arith.addf %213, %216 : vector<2x16x16xf32>
    %c7_104 = arith.constant 7 : index
    %c4_105 = arith.constant 4 : index
    %218 = memref.load %arg1[%c7_104, %c4_105] : memref<10x8xf32, #tpu.memory_space<smem>>
    %219 = vector.broadcast %218 : f32 to vector<2x16x16xf32>
    %220 = arith.mulf %219, %9 : vector<2x16x16xf32>
    %221 = arith.addf %217, %220 : vector<2x16x16xf32>
    %c8_106 = arith.constant 8 : index
    %c4_107 = arith.constant 4 : index
    %222 = memref.load %arg1[%c8_106, %c4_107] : memref<10x8xf32, #tpu.memory_space<smem>>
    %223 = vector.broadcast %222 : f32 to vector<2x16x16xf32>
    %224 = arith.mulf %223, %10 : vector<2x16x16xf32>
    %225 = arith.addf %221, %224 : vector<2x16x16xf32>
    %c9_108 = arith.constant 9 : index
    %c4_109 = arith.constant 4 : index
    %226 = memref.load %arg1[%c9_108, %c4_109] : memref<10x8xf32, #tpu.memory_space<smem>>
    %227 = vector.broadcast %226 : f32 to vector<2x16x16xf32>
    %228 = arith.addf %225, %227 : vector<2x16x16xf32>
    %cst_110 = arith.constant 0.000000e+00 : f32
    %229 = vector.broadcast %cst_110 : f32 to vector<2x16x16xf32>
    %230 = arith.maximumf %228, %229 : vector<2x16x16xf32>
    %cst_111 = arith.constant dense<0.000000e+00> : vector<2x16xf32>
    %231 = vector.multi_reduction <add>, %230, %cst_111 [2] : vector<2x16x16xf32> to vector<2x16xf32>
    %cst_112 = arith.constant dense<0.000000e+00> : vector<2xf32>
    %232 = vector.multi_reduction <add>, %231, %cst_112 [1] : vector<2x16xf32> to vector<2xf32>
    %233 = vector.shape_cast %232 : vector<2xf32> to vector<2x1xf32>
    %cst_113 = arith.constant 3.906250e-03 : f32
    %234 = vector.broadcast %cst_113 : f32 to vector<2x1xf32>
    %235 = arith.mulf %233, %234 : vector<2x1xf32>
    %c0_114 = arith.constant 0 : index
    %c5_115 = arith.constant 5 : index
    %236 = memref.load %arg1[%c0_114, %c5_115] : memref<10x8xf32, #tpu.memory_space<smem>>
    %237 = vector.broadcast %236 : f32 to vector<2x16x16xf32>
    %238 = arith.mulf %237, %2 : vector<2x16x16xf32>
    %c1_116 = arith.constant 1 : index
    %c5_117 = arith.constant 5 : index
    %239 = memref.load %arg1[%c1_116, %c5_117] : memref<10x8xf32, #tpu.memory_space<smem>>
    %240 = vector.broadcast %239 : f32 to vector<2x16x16xf32>
    %241 = arith.mulf %240, %3 : vector<2x16x16xf32>
    %242 = arith.addf %238, %241 : vector<2x16x16xf32>
    %c2_118 = arith.constant 2 : index
    %c5_119 = arith.constant 5 : index
    %243 = memref.load %arg1[%c2_118, %c5_119] : memref<10x8xf32, #tpu.memory_space<smem>>
    %244 = vector.broadcast %243 : f32 to vector<2x16x16xf32>
    %245 = arith.mulf %244, %4 : vector<2x16x16xf32>
    %246 = arith.addf %242, %245 : vector<2x16x16xf32>
    %c3_120 = arith.constant 3 : index
    %c5_121 = arith.constant 5 : index
    %247 = memref.load %arg1[%c3_120, %c5_121] : memref<10x8xf32, #tpu.memory_space<smem>>
    %248 = vector.broadcast %247 : f32 to vector<2x16x16xf32>
    %249 = arith.mulf %248, %5 : vector<2x16x16xf32>
    %250 = arith.addf %246, %249 : vector<2x16x16xf32>
    %c4_122 = arith.constant 4 : index
    %c5_123 = arith.constant 5 : index
    %251 = memref.load %arg1[%c4_122, %c5_123] : memref<10x8xf32, #tpu.memory_space<smem>>
    %252 = vector.broadcast %251 : f32 to vector<2x16x16xf32>
    %253 = arith.mulf %252, %6 : vector<2x16x16xf32>
    %254 = arith.addf %250, %253 : vector<2x16x16xf32>
    %c5_124 = arith.constant 5 : index
    %c5_125 = arith.constant 5 : index
    %255 = memref.load %arg1[%c5_124, %c5_125] : memref<10x8xf32, #tpu.memory_space<smem>>
    %256 = vector.broadcast %255 : f32 to vector<2x16x16xf32>
    %257 = arith.mulf %256, %7 : vector<2x16x16xf32>
    %258 = arith.addf %254, %257 : vector<2x16x16xf32>
    %c6_126 = arith.constant 6 : index
    %c5_127 = arith.constant 5 : index
    %259 = memref.load %arg1[%c6_126, %c5_127] : memref<10x8xf32, #tpu.memory_space<smem>>
    %260 = vector.broadcast %259 : f32 to vector<2x16x16xf32>
    %261 = arith.mulf %260, %8 : vector<2x16x16xf32>
    %262 = arith.addf %258, %261 : vector<2x16x16xf32>
    %c7_128 = arith.constant 7 : index
    %c5_129 = arith.constant 5 : index
    %263 = memref.load %arg1[%c7_128, %c5_129] : memref<10x8xf32, #tpu.memory_space<smem>>
    %264 = vector.broadcast %263 : f32 to vector<2x16x16xf32>
    %265 = arith.mulf %264, %9 : vector<2x16x16xf32>
    %266 = arith.addf %262, %265 : vector<2x16x16xf32>
    %c8_130 = arith.constant 8 : index
    %c5_131 = arith.constant 5 : index
    %267 = memref.load %arg1[%c8_130, %c5_131] : memref<10x8xf32, #tpu.memory_space<smem>>
    %268 = vector.broadcast %267 : f32 to vector<2x16x16xf32>
    %269 = arith.mulf %268, %10 : vector<2x16x16xf32>
    %270 = arith.addf %266, %269 : vector<2x16x16xf32>
    %c9_132 = arith.constant 9 : index
    %c5_133 = arith.constant 5 : index
    %271 = memref.load %arg1[%c9_132, %c5_133] : memref<10x8xf32, #tpu.memory_space<smem>>
    %272 = vector.broadcast %271 : f32 to vector<2x16x16xf32>
    %273 = arith.addf %270, %272 : vector<2x16x16xf32>
    %cst_134 = arith.constant 0.000000e+00 : f32
    %274 = vector.broadcast %cst_134 : f32 to vector<2x16x16xf32>
    %275 = arith.maximumf %273, %274 : vector<2x16x16xf32>
    %cst_135 = arith.constant dense<0.000000e+00> : vector<2x16xf32>
    %276 = vector.multi_reduction <add>, %275, %cst_135 [2] : vector<2x16x16xf32> to vector<2x16xf32>
    %cst_136 = arith.constant dense<0.000000e+00> : vector<2xf32>
    %277 = vector.multi_reduction <add>, %276, %cst_136 [1] : vector<2x16xf32> to vector<2xf32>
    %278 = vector.shape_cast %277 : vector<2xf32> to vector<2x1xf32>
    %cst_137 = arith.constant 3.906250e-03 : f32
    %279 = vector.broadcast %cst_137 : f32 to vector<2x1xf32>
    %280 = arith.mulf %278, %279 : vector<2x1xf32>
    %c0_138 = arith.constant 0 : index
    %c6_139 = arith.constant 6 : index
    %281 = memref.load %arg1[%c0_138, %c6_139] : memref<10x8xf32, #tpu.memory_space<smem>>
    %282 = vector.broadcast %281 : f32 to vector<2x16x16xf32>
    %283 = arith.mulf %282, %2 : vector<2x16x16xf32>
    %c1_140 = arith.constant 1 : index
    %c6_141 = arith.constant 6 : index
    %284 = memref.load %arg1[%c1_140, %c6_141] : memref<10x8xf32, #tpu.memory_space<smem>>
    %285 = vector.broadcast %284 : f32 to vector<2x16x16xf32>
    %286 = arith.mulf %285, %3 : vector<2x16x16xf32>
    %287 = arith.addf %283, %286 : vector<2x16x16xf32>
    %c2_142 = arith.constant 2 : index
    %c6_143 = arith.constant 6 : index
    %288 = memref.load %arg1[%c2_142, %c6_143] : memref<10x8xf32, #tpu.memory_space<smem>>
    %289 = vector.broadcast %288 : f32 to vector<2x16x16xf32>
    %290 = arith.mulf %289, %4 : vector<2x16x16xf32>
    %291 = arith.addf %287, %290 : vector<2x16x16xf32>
    %c3_144 = arith.constant 3 : index
    %c6_145 = arith.constant 6 : index
    %292 = memref.load %arg1[%c3_144, %c6_145] : memref<10x8xf32, #tpu.memory_space<smem>>
    %293 = vector.broadcast %292 : f32 to vector<2x16x16xf32>
    %294 = arith.mulf %293, %5 : vector<2x16x16xf32>
    %295 = arith.addf %291, %294 : vector<2x16x16xf32>
    %c4_146 = arith.constant 4 : index
    %c6_147 = arith.constant 6 : index
    %296 = memref.load %arg1[%c4_146, %c6_147] : memref<10x8xf32, #tpu.memory_space<smem>>
    %297 = vector.broadcast %296 : f32 to vector<2x16x16xf32>
    %298 = arith.mulf %297, %6 : vector<2x16x16xf32>
    %299 = arith.addf %295, %298 : vector<2x16x16xf32>
    %c5_148 = arith.constant 5 : index
    %c6_149 = arith.constant 6 : index
    %300 = memref.load %arg1[%c5_148, %c6_149] : memref<10x8xf32, #tpu.memory_space<smem>>
    %301 = vector.broadcast %300 : f32 to vector<2x16x16xf32>
    %302 = arith.mulf %301, %7 : vector<2x16x16xf32>
    %303 = arith.addf %299, %302 : vector<2x16x16xf32>
    %c6_150 = arith.constant 6 : index
    %c6_151 = arith.constant 6 : index
    %304 = memref.load %arg1[%c6_150, %c6_151] : memref<10x8xf32, #tpu.memory_space<smem>>
    %305 = vector.broadcast %304 : f32 to vector<2x16x16xf32>
    %306 = arith.mulf %305, %8 : vector<2x16x16xf32>
    %307 = arith.addf %303, %306 : vector<2x16x16xf32>
    %c7_152 = arith.constant 7 : index
    %c6_153 = arith.constant 6 : index
    %308 = memref.load %arg1[%c7_152, %c6_153] : memref<10x8xf32, #tpu.memory_space<smem>>
    %309 = vector.broadcast %308 : f32 to vector<2x16x16xf32>
    %310 = arith.mulf %309, %9 : vector<2x16x16xf32>
    %311 = arith.addf %307, %310 : vector<2x16x16xf32>
    %c8_154 = arith.constant 8 : index
    %c6_155 = arith.constant 6 : index
    %312 = memref.load %arg1[%c8_154, %c6_155] : memref<10x8xf32, #tpu.memory_space<smem>>
    %313 = vector.broadcast %312 : f32 to vector<2x16x16xf32>
    %314 = arith.mulf %313, %10 : vector<2x16x16xf32>
    %315 = arith.addf %311, %314 : vector<2x16x16xf32>
    %c9_156 = arith.constant 9 : index
    %c6_157 = arith.constant 6 : index
    %316 = memref.load %arg1[%c9_156, %c6_157] : memref<10x8xf32, #tpu.memory_space<smem>>
    %317 = vector.broadcast %316 : f32 to vector<2x16x16xf32>
    %318 = arith.addf %315, %317 : vector<2x16x16xf32>
    %cst_158 = arith.constant 0.000000e+00 : f32
    %319 = vector.broadcast %cst_158 : f32 to vector<2x16x16xf32>
    %320 = arith.maximumf %318, %319 : vector<2x16x16xf32>
    %cst_159 = arith.constant dense<0.000000e+00> : vector<2x16xf32>
    %321 = vector.multi_reduction <add>, %320, %cst_159 [2] : vector<2x16x16xf32> to vector<2x16xf32>
    %cst_160 = arith.constant dense<0.000000e+00> : vector<2xf32>
    %322 = vector.multi_reduction <add>, %321, %cst_160 [1] : vector<2x16xf32> to vector<2xf32>
    %323 = vector.shape_cast %322 : vector<2xf32> to vector<2x1xf32>
    %cst_161 = arith.constant 3.906250e-03 : f32
    %324 = vector.broadcast %cst_161 : f32 to vector<2x1xf32>
    %325 = arith.mulf %323, %324 : vector<2x1xf32>
    %c0_162 = arith.constant 0 : index
    %c7_163 = arith.constant 7 : index
    %326 = memref.load %arg1[%c0_162, %c7_163] : memref<10x8xf32, #tpu.memory_space<smem>>
    %327 = vector.broadcast %326 : f32 to vector<2x16x16xf32>
    %328 = arith.mulf %327, %2 : vector<2x16x16xf32>
    %c1_164 = arith.constant 1 : index
    %c7_165 = arith.constant 7 : index
    %329 = memref.load %arg1[%c1_164, %c7_165] : memref<10x8xf32, #tpu.memory_space<smem>>
    %330 = vector.broadcast %329 : f32 to vector<2x16x16xf32>
    %331 = arith.mulf %330, %3 : vector<2x16x16xf32>
    %332 = arith.addf %328, %331 : vector<2x16x16xf32>
    %c2_166 = arith.constant 2 : index
    %c7_167 = arith.constant 7 : index
    %333 = memref.load %arg1[%c2_166, %c7_167] : memref<10x8xf32, #tpu.memory_space<smem>>
    %334 = vector.broadcast %333 : f32 to vector<2x16x16xf32>
    %335 = arith.mulf %334, %4 : vector<2x16x16xf32>
    %336 = arith.addf %332, %335 : vector<2x16x16xf32>
    %c3_168 = arith.constant 3 : index
    %c7_169 = arith.constant 7 : index
    %337 = memref.load %arg1[%c3_168, %c7_169] : memref<10x8xf32, #tpu.memory_space<smem>>
    %338 = vector.broadcast %337 : f32 to vector<2x16x16xf32>
    %339 = arith.mulf %338, %5 : vector<2x16x16xf32>
    %340 = arith.addf %336, %339 : vector<2x16x16xf32>
    %c4_170 = arith.constant 4 : index
    %c7_171 = arith.constant 7 : index
    %341 = memref.load %arg1[%c4_170, %c7_171] : memref<10x8xf32, #tpu.memory_space<smem>>
    %342 = vector.broadcast %341 : f32 to vector<2x16x16xf32>
    %343 = arith.mulf %342, %6 : vector<2x16x16xf32>
    %344 = arith.addf %340, %343 : vector<2x16x16xf32>
    %c5_172 = arith.constant 5 : index
    %c7_173 = arith.constant 7 : index
    %345 = memref.load %arg1[%c5_172, %c7_173] : memref<10x8xf32, #tpu.memory_space<smem>>
    %346 = vector.broadcast %345 : f32 to vector<2x16x16xf32>
    %347 = arith.mulf %346, %7 : vector<2x16x16xf32>
    %348 = arith.addf %344, %347 : vector<2x16x16xf32>
    %c6_174 = arith.constant 6 : index
    %c7_175 = arith.constant 7 : index
    %349 = memref.load %arg1[%c6_174, %c7_175] : memref<10x8xf32, #tpu.memory_space<smem>>
    %350 = vector.broadcast %349 : f32 to vector<2x16x16xf32>
    %351 = arith.mulf %350, %8 : vector<2x16x16xf32>
    %352 = arith.addf %348, %351 : vector<2x16x16xf32>
    %c7_176 = arith.constant 7 : index
    %c7_177 = arith.constant 7 : index
    %353 = memref.load %arg1[%c7_176, %c7_177] : memref<10x8xf32, #tpu.memory_space<smem>>
    %354 = vector.broadcast %353 : f32 to vector<2x16x16xf32>
    %355 = arith.mulf %354, %9 : vector<2x16x16xf32>
    %356 = arith.addf %352, %355 : vector<2x16x16xf32>
    %c8_178 = arith.constant 8 : index
    %c7_179 = arith.constant 7 : index
    %357 = memref.load %arg1[%c8_178, %c7_179] : memref<10x8xf32, #tpu.memory_space<smem>>
    %358 = vector.broadcast %357 : f32 to vector<2x16x16xf32>
    %359 = arith.mulf %358, %10 : vector<2x16x16xf32>
    %360 = arith.addf %356, %359 : vector<2x16x16xf32>
    %c9_180 = arith.constant 9 : index
    %c7_181 = arith.constant 7 : index
    %361 = memref.load %arg1[%c9_180, %c7_181] : memref<10x8xf32, #tpu.memory_space<smem>>
    %362 = vector.broadcast %361 : f32 to vector<2x16x16xf32>
    %363 = arith.addf %360, %362 : vector<2x16x16xf32>
    %cst_182 = arith.constant 0.000000e+00 : f32
    %364 = vector.broadcast %cst_182 : f32 to vector<2x16x16xf32>
    %365 = arith.maximumf %363, %364 : vector<2x16x16xf32>
    %cst_183 = arith.constant dense<0.000000e+00> : vector<2x16xf32>
    %366 = vector.multi_reduction <add>, %365, %cst_183 [2] : vector<2x16x16xf32> to vector<2x16xf32>
    %cst_184 = arith.constant dense<0.000000e+00> : vector<2xf32>
    %367 = vector.multi_reduction <add>, %366, %cst_184 [1] : vector<2x16xf32> to vector<2xf32>
    %368 = vector.shape_cast %367 : vector<2xf32> to vector<2x1xf32>
    %cst_185 = arith.constant 3.906250e-03 : f32
    %369 = vector.broadcast %cst_185 : f32 to vector<2x1xf32>
    %370 = arith.mulf %368, %369 : vector<2x1xf32>
    %371 = tpu.concatenate %55, %100, %145, %190, %235, %280, %325, %370 in 1 : vector<2x1xf32>, vector<2x1xf32>, vector<2x1xf32>, vector<2x1xf32>, vector<2x1xf32>, vector<2x1xf32>, vector<2x1xf32>, vector<2x1xf32> -> vector<2x8xf32>
    %372 = arith.truncf %371 : vector<2x8xf32> to vector<2x8xbf16>
    %c0_186 = arith.constant 0 : index
    %c0_187 = arith.constant 0 : index
    %373 = vector.load %arg2[%c0_186, %c0_187] : memref<8x32xbf16, #tpu.memory_space<vmem>>, vector<8x32xbf16>
    %cst_188 = arith.constant dense<0.000000e+00> : vector<2x32xf32>
    %374 = tpu.matmul %372, %373, %cst_188 {dimension_numbers = #tpu.dot_dimension_numbers<[1], [0], [0], [1], [0, 0, 1, 1], [], []>} : vector<2x8xbf16>, vector<8x32xbf16>, vector<2x32xf32> -> vector<2x32xf32>
    %375 = vector.extract_strided_slice %0 {offsets = [0, 0], sizes = [1, 32], strides = [1, 1]} : vector<16x128xf32> to vector<1x32xf32>
    %376 = vector.broadcast %375 : vector<1x32xf32> to vector<2x32xf32>
    %377 = arith.addf %374, %376 : vector<2x32xf32>
    %c0_189 = arith.constant 0 : index
    %c0_190 = arith.constant 0 : index
    %378 = vector.load %arg3[%c0_189, %c0_190] : memref<16x32xf32, #tpu.memory_space<vmem>>, vector<16x32xf32>
    %379 = vector.extract_strided_slice %0 {offsets = [1, 0], sizes = [1, 32], strides = [1, 1]} : vector<16x128xf32> to vector<1x32xf32>
    %380 = vector.extract_strided_slice %0 {offsets = [2, 0], sizes = [1, 32], strides = [1, 1]} : vector<16x128xf32> to vector<1x32xf32>
    %cst_191 = arith.constant dense<0.000000e+00> : vector<16xf32>
    %381 = vector.multi_reduction <add>, %378, %cst_191 [1] : vector<16x32xf32> to vector<16xf32>
    %382 = vector.shape_cast %381 : vector<16xf32> to vector<16x1xf32>
    %cst_192 = arith.constant 3.200000e+01 : f32
    %383 = vector.broadcast %cst_192 : f32 to vector<16x1xf32>
    %384 = arith.divf %382, %383 : vector<16x1xf32>
    %385 = vector.broadcast %384 : vector<16x1xf32> to vector<16x32xf32>
    %386 = arith.subf %378, %385 : vector<16x32xf32>
    %387 = arith.mulf %386, %386 : vector<16x32xf32>
    %cst_193 = arith.constant dense<0.000000e+00> : vector<16xf32>
    %388 = vector.multi_reduction <add>, %387, %cst_193 [1] : vector<16x32xf32> to vector<16xf32>
    %389 = vector.shape_cast %388 : vector<16xf32> to vector<16x1xf32>
    %cst_194 = arith.constant 3.200000e+01 : f32
    %390 = vector.broadcast %cst_194 : f32 to vector<16x1xf32>
    %391 = arith.divf %389, %390 : vector<16x1xf32>
    %392 = vector.broadcast %384 : vector<16x1xf32> to vector<16x32xf32>
    %393 = arith.subf %378, %392 : vector<16x32xf32>
    %cst_195 = arith.constant 9.99999996E-13 : f32
    %394 = vector.broadcast %cst_195 : f32 to vector<16x1xf32>
    %395 = arith.addf %391, %394 : vector<16x1xf32>
    %396 = math.rsqrt %395 : vector<16x1xf32>
    %397 = vector.broadcast %396 : vector<16x1xf32> to vector<16x32xf32>
    %398 = arith.mulf %393, %397 : vector<16x32xf32>
    %399 = vector.broadcast %379 : vector<1x32xf32> to vector<16x32xf32>
    %400 = arith.mulf %398, %399 : vector<16x32xf32>
    %401 = vector.broadcast %380 : vector<1x32xf32> to vector<16x32xf32>
    %402 = arith.addf %400, %401 : vector<16x32xf32>
    %403 = arith.truncf %402 : vector<16x32xf32> to vector<16x32xbf16>
    %c0_196 = arith.constant 0 : index
    %c0_197 = arith.constant 0 : index
    %404 = vector.load %arg5[%c0_196, %c0_197] : memref<32x96xbf16, #tpu.memory_space<vmem>>, vector<32x96xbf16>
    %cst_198 = arith.constant dense<0.000000e+00> : vector<16x96xf32>
    %405 = tpu.matmul %403, %404, %cst_198 {dimension_numbers = #tpu.dot_dimension_numbers<[1], [0], [0], [1], [0, 0, 1, 1], [], []>} : vector<16x32xbf16>, vector<32x96xbf16>, vector<16x96xf32> -> vector<16x96xf32>
    %406 = vector.extract_strided_slice %0 {offsets = [3, 0], sizes = [1, 96], strides = [1, 1]} : vector<16x128xf32> to vector<1x96xf32>
    %407 = vector.broadcast %406 : vector<1x96xf32> to vector<16x96xf32>
    %408 = arith.addf %405, %407 : vector<16x96xf32>
    %409 = arith.truncf %408 : vector<16x96xf32> to vector<16x96xbf16>
    %c0_199 = arith.constant 0 : index
    %c0_200 = arith.constant 0 : index
    %410 = vector.load %arg4[%c0_199, %c0_200] : memref<16x16xf32, #tpu.memory_space<vmem>>, vector<16x16xf32>
    %411 = vector.extract_strided_slice %409 {offsets = [0, 0], sizes = [16, 8], strides = [1, 1]} : vector<16x96xbf16> to vector<16x8xbf16>
    %412 = vector.extract_strided_slice %409 {offsets = [0, 32], sizes = [16, 8], strides = [1, 1]} : vector<16x96xbf16> to vector<16x8xbf16>
    %413 = vector.extract_strided_slice %409 {offsets = [0, 64], sizes = [16, 8], strides = [1, 1]} : vector<16x96xbf16> to vector<16x8xbf16>
    %414 = tpu.transpose %412, [1, 0] : vector<16x8xbf16> -> vector<8x16xbf16>
    %cst_201 = arith.constant dense<0.000000e+00> : vector<16x16xf32>
    %415 = tpu.matmul %411, %414, %cst_201 {dimension_numbers = #tpu.dot_dimension_numbers<[1], [0], [0], [1], [0, 0, 1, 1], [], []>} : vector<16x8xbf16>, vector<8x16xbf16>, vector<16x16xf32> -> vector<16x16xf32>
    %416 = arith.addf %415, %410 : vector<16x16xf32>
    %cst_202 = arith.constant dense<0xFF800000> : vector<16xf32>
    %417 = vector.multi_reduction <maximumf>, %416, %cst_202 [1] : vector<16x16xf32> to vector<16xf32>
    %418 = vector.shape_cast %417 : vector<16xf32> to vector<16x1xf32>
    %419 = vector.broadcast %418 : vector<16x1xf32> to vector<16x16xf32>
    %420 = arith.subf %416, %419 : vector<16x16xf32>
    %421 = math.exp %420 : vector<16x16xf32>
    %cst_203 = arith.constant dense<0.000000e+00> : vector<16xf32>
    %422 = vector.multi_reduction <add>, %421, %cst_203 [1] : vector<16x16xf32> to vector<16xf32>
    %423 = vector.shape_cast %422 : vector<16xf32> to vector<16x1xf32>
    %424 = tpu.reciprocal %423 {approx = true} : vector<16x1xf32> -> vector<16x1xf32>
    %425 = vector.broadcast %424 : vector<16x1xf32> to vector<16x16xf32>
    %426 = arith.mulf %421, %425 : vector<16x16xf32>
    %427 = arith.truncf %426 : vector<16x16xf32> to vector<16x16xbf16>
    %cst_204 = arith.constant dense<0.000000e+00> : vector<16x8xf32>
    %428 = tpu.matmul %427, %413, %cst_204 {dimension_numbers = #tpu.dot_dimension_numbers<[1], [0], [0], [1], [0, 0, 1, 1], [], []>} : vector<16x16xbf16>, vector<16x8xbf16>, vector<16x8xf32> -> vector<16x8xf32>
    %429 = vector.extract_strided_slice %409 {offsets = [0, 8], sizes = [16, 8], strides = [1, 1]} : vector<16x96xbf16> to vector<16x8xbf16>
    %430 = vector.extract_strided_slice %409 {offsets = [0, 40], sizes = [16, 8], strides = [1, 1]} : vector<16x96xbf16> to vector<16x8xbf16>
    %431 = vector.extract_strided_slice %409 {offsets = [0, 72], sizes = [16, 8], strides = [1, 1]} : vector<16x96xbf16> to vector<16x8xbf16>
    %432 = tpu.transpose %430, [1, 0] : vector<16x8xbf16> -> vector<8x16xbf16>
    %cst_205 = arith.constant dense<0.000000e+00> : vector<16x16xf32>
    %433 = tpu.matmul %429, %432, %cst_205 {dimension_numbers = #tpu.dot_dimension_numbers<[1], [0], [0], [1], [0, 0, 1, 1], [], []>} : vector<16x8xbf16>, vector<8x16xbf16>, vector<16x16xf32> -> vector<16x16xf32>
    %434 = arith.addf %433, %410 : vector<16x16xf32>
    %cst_206 = arith.constant dense<0xFF800000> : vector<16xf32>
    %435 = vector.multi_reduction <maximumf>, %434, %cst_206 [1] : vector<16x16xf32> to vector<16xf32>
    %436 = vector.shape_cast %435 : vector<16xf32> to vector<16x1xf32>
    %437 = vector.broadcast %436 : vector<16x1xf32> to vector<16x16xf32>
    %438 = arith.subf %434, %437 : vector<16x16xf32>
    %439 = math.exp %438 : vector<16x16xf32>
    %cst_207 = arith.constant dense<0.000000e+00> : vector<16xf32>
    %440 = vector.multi_reduction <add>, %439, %cst_207 [1] : vector<16x16xf32> to vector<16xf32>
    %441 = vector.shape_cast %440 : vector<16xf32> to vector<16x1xf32>
    %442 = tpu.reciprocal %441 {approx = true} : vector<16x1xf32> -> vector<16x1xf32>
    %443 = vector.broadcast %442 : vector<16x1xf32> to vector<16x16xf32>
    %444 = arith.mulf %439, %443 : vector<16x16xf32>
    %445 = arith.truncf %444 : vector<16x16xf32> to vector<16x16xbf16>
    %cst_208 = arith.constant dense<0.000000e+00> : vector<16x8xf32>
    %446 = tpu.matmul %445, %431, %cst_208 {dimension_numbers = #tpu.dot_dimension_numbers<[1], [0], [0], [1], [0, 0, 1, 1], [], []>} : vector<16x16xbf16>, vector<16x8xbf16>, vector<16x8xf32> -> vector<16x8xf32>
    %447 = vector.extract_strided_slice %409 {offsets = [0, 16], sizes = [16, 8], strides = [1, 1]} : vector<16x96xbf16> to vector<16x8xbf16>
    %448 = vector.extract_strided_slice %409 {offsets = [0, 48], sizes = [16, 8], strides = [1, 1]} : vector<16x96xbf16> to vector<16x8xbf16>
    %449 = vector.extract_strided_slice %409 {offsets = [0, 80], sizes = [16, 8], strides = [1, 1]} : vector<16x96xbf16> to vector<16x8xbf16>
    %450 = tpu.transpose %448, [1, 0] : vector<16x8xbf16> -> vector<8x16xbf16>
    %cst_209 = arith.constant dense<0.000000e+00> : vector<16x16xf32>
    %451 = tpu.matmul %447, %450, %cst_209 {dimension_numbers = #tpu.dot_dimension_numbers<[1], [0], [0], [1], [0, 0, 1, 1], [], []>} : vector<16x8xbf16>, vector<8x16xbf16>, vector<16x16xf32> -> vector<16x16xf32>
    %452 = arith.addf %451, %410 : vector<16x16xf32>
    %cst_210 = arith.constant dense<0xFF800000> : vector<16xf32>
    %453 = vector.multi_reduction <maximumf>, %452, %cst_210 [1] : vector<16x16xf32> to vector<16xf32>
    %454 = vector.shape_cast %453 : vector<16xf32> to vector<16x1xf32>
    %455 = vector.broadcast %454 : vector<16x1xf32> to vector<16x16xf32>
    %456 = arith.subf %452, %455 : vector<16x16xf32>
    %457 = math.exp %456 : vector<16x16xf32>
    %cst_211 = arith.constant dense<0.000000e+00> : vector<16xf32>
    %458 = vector.multi_reduction <add>, %457, %cst_211 [1] : vector<16x16xf32> to vector<16xf32>
    %459 = vector.shape_cast %458 : vector<16xf32> to vector<16x1xf32>
    %460 = tpu.reciprocal %459 {approx = true} : vector<16x1xf32> -> vector<16x1xf32>
    %461 = vector.broadcast %460 : vector<16x1xf32> to vector<16x16xf32>
    %462 = arith.mulf %457, %461 : vector<16x16xf32>
    %463 = arith.truncf %462 : vector<16x16xf32> to vector<16x16xbf16>
    %cst_212 = arith.constant dense<0.000000e+00> : vector<16x8xf32>
    %464 = tpu.matmul %463, %449, %cst_212 {dimension_numbers = #tpu.dot_dimension_numbers<[1], [0], [0], [1], [0, 0, 1, 1], [], []>} : vector<16x16xbf16>, vector<16x8xbf16>, vector<16x8xf32> -> vector<16x8xf32>
    %465 = vector.extract_strided_slice %409 {offsets = [0, 24], sizes = [16, 8], strides = [1, 1]} : vector<16x96xbf16> to vector<16x8xbf16>
    %466 = vector.extract_strided_slice %409 {offsets = [0, 56], sizes = [16, 8], strides = [1, 1]} : vector<16x96xbf16> to vector<16x8xbf16>
    %467 = vector.extract_strided_slice %409 {offsets = [0, 88], sizes = [16, 8], strides = [1, 1]} : vector<16x96xbf16> to vector<16x8xbf16>
    %468 = tpu.transpose %466, [1, 0] : vector<16x8xbf16> -> vector<8x16xbf16>
    %cst_213 = arith.constant dense<0.000000e+00> : vector<16x16xf32>
    %469 = tpu.matmul %465, %468, %cst_213 {dimension_numbers = #tpu.dot_dimension_numbers<[1], [0], [0], [1], [0, 0, 1, 1], [], []>} : vector<16x8xbf16>, vector<8x16xbf16>, vector<16x16xf32> -> vector<16x16xf32>
    %470 = arith.addf %469, %410 : vector<16x16xf32>
    %cst_214 = arith.constant dense<0xFF800000> : vector<16xf32>
    %471 = vector.multi_reduction <maximumf>, %470, %cst_214 [1] : vector<16x16xf32> to vector<16xf32>
    %472 = vector.shape_cast %471 : vector<16xf32> to vector<16x1xf32>
    %473 = vector.broadcast %472 : vector<16x1xf32> to vector<16x16xf32>
    %474 = arith.subf %470, %473 : vector<16x16xf32>
    %475 = math.exp %474 : vector<16x16xf32>
    %cst_215 = arith.constant dense<0.000000e+00> : vector<16xf32>
    %476 = vector.multi_reduction <add>, %475, %cst_215 [1] : vector<16x16xf32> to vector<16xf32>
    %477 = vector.shape_cast %476 : vector<16xf32> to vector<16x1xf32>
    %478 = tpu.reciprocal %477 {approx = true} : vector<16x1xf32> -> vector<16x1xf32>
    %479 = vector.broadcast %478 : vector<16x1xf32> to vector<16x16xf32>
    %480 = arith.mulf %475, %479 : vector<16x16xf32>
    %481 = arith.truncf %480 : vector<16x16xf32> to vector<16x16xbf16>
    %cst_216 = arith.constant dense<0.000000e+00> : vector<16x8xf32>
    %482 = tpu.matmul %481, %467, %cst_216 {dimension_numbers = #tpu.dot_dimension_numbers<[1], [0], [0], [1], [0, 0, 1, 1], [], []>} : vector<16x16xbf16>, vector<16x8xbf16>, vector<16x8xf32> -> vector<16x8xf32>
    %483 = tpu.concatenate %428, %446, %464, %482 in 1 : vector<16x8xf32>, vector<16x8xf32>, vector<16x8xf32>, vector<16x8xf32> -> vector<16x32xf32>
    %484 = arith.truncf %483 : vector<16x32xf32> to vector<16x32xbf16>
    %c0_217 = arith.constant 0 : index
    %c0_218 = arith.constant 0 : index
    %485 = vector.load %arg6[%c0_217, %c0_218] : memref<32x32xbf16, #tpu.memory_space<vmem>>, vector<32x32xbf16>
    %cst_219 = arith.constant dense<0.000000e+00> : vector<16x32xf32>
    %486 = tpu.matmul %484, %485, %cst_219 {dimension_numbers = #tpu.dot_dimension_numbers<[1], [0], [0], [1], [0, 0, 1, 1], [], []>} : vector<16x32xbf16>, vector<32x32xbf16>, vector<16x32xf32> -> vector<16x32xf32>
    %487 = vector.extract_strided_slice %0 {offsets = [4, 0], sizes = [1, 32], strides = [1, 1]} : vector<16x128xf32> to vector<1x32xf32>
    %488 = vector.broadcast %487 : vector<1x32xf32> to vector<16x32xf32>
    %489 = arith.addf %486, %488 : vector<16x32xf32>
    %490 = arith.addf %402, %489 : vector<16x32xf32>
    %491 = vector.extract_strided_slice %0 {offsets = [5, 0], sizes = [1, 32], strides = [1, 1]} : vector<16x128xf32> to vector<1x32xf32>
    %492 = vector.extract_strided_slice %0 {offsets = [6, 0], sizes = [1, 32], strides = [1, 1]} : vector<16x128xf32> to vector<1x32xf32>
    %cst_220 = arith.constant dense<0.000000e+00> : vector<16xf32>
    %493 = vector.multi_reduction <add>, %490, %cst_220 [1] : vector<16x32xf32> to vector<16xf32>
    %494 = vector.shape_cast %493 : vector<16xf32> to vector<16x1xf32>
    %cst_221 = arith.constant 3.200000e+01 : f32
    %495 = vector.broadcast %cst_221 : f32 to vector<16x1xf32>
    %496 = arith.divf %494, %495 : vector<16x1xf32>
    %497 = vector.broadcast %496 : vector<16x1xf32> to vector<16x32xf32>
    %498 = arith.subf %490, %497 : vector<16x32xf32>
    %499 = arith.mulf %498, %498 : vector<16x32xf32>
    %cst_222 = arith.constant dense<0.000000e+00> : vector<16xf32>
    %500 = vector.multi_reduction <add>, %499, %cst_222 [1] : vector<16x32xf32> to vector<16xf32>
    %501 = vector.shape_cast %500 : vector<16xf32> to vector<16x1xf32>
    %cst_223 = arith.constant 3.200000e+01 : f32
    %502 = vector.broadcast %cst_223 : f32 to vector<16x1xf32>
    %503 = arith.divf %501, %502 : vector<16x1xf32>
    %504 = vector.broadcast %496 : vector<16x1xf32> to vector<16x32xf32>
    %505 = arith.subf %490, %504 : vector<16x32xf32>
    %cst_224 = arith.constant 9.99999996E-13 : f32
    %506 = vector.broadcast %cst_224 : f32 to vector<16x1xf32>
    %507 = arith.addf %503, %506 : vector<16x1xf32>
    %508 = math.rsqrt %507 : vector<16x1xf32>
    %509 = vector.broadcast %508 : vector<16x1xf32> to vector<16x32xf32>
    %510 = arith.mulf %505, %509 : vector<16x32xf32>
    %511 = vector.broadcast %491 : vector<1x32xf32> to vector<16x32xf32>
    %512 = arith.mulf %510, %511 : vector<16x32xf32>
    %513 = vector.broadcast %492 : vector<1x32xf32> to vector<16x32xf32>
    %514 = arith.addf %512, %513 : vector<16x32xf32>
    %515 = arith.truncf %514 : vector<16x32xf32> to vector<16x32xbf16>
    %c0_225 = arith.constant 0 : index
    %c0_226 = arith.constant 0 : index
    %516 = vector.load %arg7[%c0_225, %c0_226] : memref<32x128xbf16, #tpu.memory_space<vmem>>, vector<32x128xbf16>
    %cst_227 = arith.constant dense<0.000000e+00> : vector<16x128xf32>
    %517 = tpu.matmul %515, %516, %cst_227 {dimension_numbers = #tpu.dot_dimension_numbers<[1], [0], [0], [1], [0, 0, 1, 1], [], []>} : vector<16x32xbf16>, vector<32x128xbf16>, vector<16x128xf32> -> vector<16x128xf32>
    %518 = vector.extract_strided_slice %0 {offsets = [7, 0], sizes = [1, 128], strides = [1, 1]} : vector<16x128xf32> to vector<1x128xf32>
    %519 = vector.broadcast %518 : vector<1x128xf32> to vector<16x128xf32>
    %520 = arith.addf %517, %519 : vector<16x128xf32>
    %521 = arith.mulf %520, %520 : vector<16x128xf32>
    %522 = arith.mulf %520, %521 : vector<16x128xf32>
    %cst_228 = arith.constant 4.471500e-02 : f32
    %523 = vector.broadcast %cst_228 : f32 to vector<16x128xf32>
    %524 = arith.mulf %523, %522 : vector<16x128xf32>
    %525 = arith.addf %520, %524 : vector<16x128xf32>
    %cst_229 = arith.constant 0.797884583 : f32
    %526 = vector.broadcast %cst_229 : f32 to vector<16x128xf32>
    %527 = arith.mulf %526, %525 : vector<16x128xf32>
    %528 = math.tanh %527 : vector<16x128xf32>
    %cst_230 = arith.constant 1.000000e+00 : f32
    %529 = vector.broadcast %cst_230 : f32 to vector<16x128xf32>
    %530 = arith.addf %529, %528 : vector<16x128xf32>
    %cst_231 = arith.constant 5.000000e-01 : f32
    %531 = vector.broadcast %cst_231 : f32 to vector<16x128xf32>
    %532 = arith.mulf %531, %530 : vector<16x128xf32>
    %533 = arith.mulf %520, %532 : vector<16x128xf32>
    %534 = arith.truncf %533 : vector<16x128xf32> to vector<16x128xbf16>
    %c0_232 = arith.constant 0 : index
    %c0_233 = arith.constant 0 : index
    %535 = vector.load %arg8[%c0_232, %c0_233] : memref<128x32xbf16, #tpu.memory_space<vmem>>, vector<128x32xbf16>
    %cst_234 = arith.constant dense<0.000000e+00> : vector<16x32xf32>
    %536 = tpu.matmul %534, %535, %cst_234 {dimension_numbers = #tpu.dot_dimension_numbers<[1], [0], [0], [1], [0, 0, 1, 1], [], []>} : vector<16x128xbf16>, vector<128x32xbf16>, vector<16x32xf32> -> vector<16x32xf32>
    %537 = vector.extract_strided_slice %0 {offsets = [8, 0], sizes = [1, 32], strides = [1, 1]} : vector<16x128xf32> to vector<1x32xf32>
    %538 = vector.broadcast %537 : vector<1x32xf32> to vector<16x32xf32>
    %539 = arith.addf %536, %538 : vector<16x32xf32>
    %540 = arith.addf %514, %539 : vector<16x32xf32>
    %541 = vector.extract_strided_slice %0 {offsets = [9, 0], sizes = [1, 32], strides = [1, 1]} : vector<16x128xf32> to vector<1x32xf32>
    %542 = vector.extract_strided_slice %0 {offsets = [10, 0], sizes = [1, 32], strides = [1, 1]} : vector<16x128xf32> to vector<1x32xf32>
    %cst_235 = arith.constant dense<0.000000e+00> : vector<16xf32>
    %543 = vector.multi_reduction <add>, %540, %cst_235 [1] : vector<16x32xf32> to vector<16xf32>
    %544 = vector.shape_cast %543 : vector<16xf32> to vector<16x1xf32>
    %cst_236 = arith.constant 3.200000e+01 : f32
    %545 = vector.broadcast %cst_236 : f32 to vector<16x1xf32>
    %546 = arith.divf %544, %545 : vector<16x1xf32>
    %547 = vector.broadcast %546 : vector<16x1xf32> to vector<16x32xf32>
    %548 = arith.subf %540, %547 : vector<16x32xf32>
    %549 = arith.mulf %548, %548 : vector<16x32xf32>
    %cst_237 = arith.constant dense<0.000000e+00> : vector<16xf32>
    %550 = vector.multi_reduction <add>, %549, %cst_237 [1] : vector<16x32xf32> to vector<16xf32>
    %551 = vector.shape_cast %550 : vector<16xf32> to vector<16x1xf32>
    %cst_238 = arith.constant 3.200000e+01 : f32
    %552 = vector.broadcast %cst_238 : f32 to vector<16x1xf32>
    %553 = arith.divf %551, %552 : vector<16x1xf32>
    %554 = vector.broadcast %546 : vector<16x1xf32> to vector<16x32xf32>
    %555 = arith.subf %540, %554 : vector<16x32xf32>
    %cst_239 = arith.constant 9.99999996E-13 : f32
    %556 = vector.broadcast %cst_239 : f32 to vector<16x1xf32>
    %557 = arith.addf %553, %556 : vector<16x1xf32>
    %558 = math.rsqrt %557 : vector<16x1xf32>
    %559 = vector.broadcast %558 : vector<16x1xf32> to vector<16x32xf32>
    %560 = arith.mulf %555, %559 : vector<16x32xf32>
    %561 = vector.broadcast %541 : vector<1x32xf32> to vector<16x32xf32>
    %562 = arith.mulf %560, %561 : vector<16x32xf32>
    %563 = vector.broadcast %542 : vector<1x32xf32> to vector<16x32xf32>
    %564 = arith.addf %562, %563 : vector<16x32xf32>
    %565 = vector.extract_strided_slice %564 {offsets = [0, 0], sizes = [1, 32], strides = [1, 1]} : vector<16x32xf32> to vector<1x32xf32>
    %566 = vector.extract_strided_slice %564 {offsets = [8, 0], sizes = [1, 32], strides = [1, 1]} : vector<16x32xf32> to vector<1x32xf32>
    %567 = tpu.concatenate %565, %566 in 0 : vector<1x32xf32>, vector<1x32xf32> -> vector<2x32xf32>
    %568 = arith.truncf %567 : vector<2x32xf32> to vector<2x32xbf16>
    %c0_240 = arith.constant 0 : index
    %c0_241 = arith.constant 0 : index
    %569 = vector.load %arg9[%c0_240, %c0_241] : memref<32x32xbf16, #tpu.memory_space<vmem>>, vector<32x32xbf16>
    %cst_242 = arith.constant dense<0.000000e+00> : vector<2x32xf32>
    %570 = tpu.matmul %568, %569, %cst_242 {dimension_numbers = #tpu.dot_dimension_numbers<[1], [0], [0], [1], [0, 0, 1, 1], [], []>} : vector<2x32xbf16>, vector<32x32xbf16>, vector<2x32xf32> -> vector<2x32xf32>
    %571 = vector.extract_strided_slice %0 {offsets = [11, 0], sizes = [1, 32], strides = [1, 1]} : vector<16x128xf32> to vector<1x32xf32>
    %572 = vector.broadcast %571 : vector<1x32xf32> to vector<2x32xf32>
    %573 = arith.addf %570, %572 : vector<2x32xf32>
    %574 = math.tanh %573 : vector<2x32xf32>
    %575 = arith.truncf %377 : vector<2x32xf32> to vector<2x32xbf16>
    %c0_243 = arith.constant 0 : index
    %c0_244 = arith.constant 0 : index
    %576 = vector.load %arg10[%c0_243, %c0_244] : memref<32x128xbf16, #tpu.memory_space<vmem>>, vector<32x128xbf16>
    %cst_245 = arith.constant dense<0.000000e+00> : vector<2x128xf32>
    %577 = tpu.matmul %575, %576, %cst_245 {dimension_numbers = #tpu.dot_dimension_numbers<[1], [0], [0], [1], [0, 0, 1, 1], [], []>} : vector<2x32xbf16>, vector<32x128xbf16>, vector<2x128xf32> -> vector<2x128xf32>
    %578 = arith.truncf %574 : vector<2x32xf32> to vector<2x32xbf16>
    %c0_246 = arith.constant 0 : index
    %c0_247 = arith.constant 0 : index
    %579 = vector.load %arg11[%c0_246, %c0_247] : memref<32x128xbf16, #tpu.memory_space<vmem>>, vector<32x128xbf16>
    %cst_248 = arith.constant dense<0.000000e+00> : vector<2x128xf32>
    %580 = tpu.matmul %578, %579, %cst_248 {dimension_numbers = #tpu.dot_dimension_numbers<[1], [0], [0], [1], [0, 0, 1, 1], [], []>} : vector<2x32xbf16>, vector<32x128xbf16>, vector<2x128xf32> -> vector<2x128xf32>
    %581 = arith.addf %577, %580 : vector<2x128xf32>
    %582 = vector.extract_strided_slice %0 {offsets = [12, 0], sizes = [1, 128], strides = [1, 1]} : vector<16x128xf32> to vector<1x128xf32>
    %583 = vector.broadcast %582 : vector<1x128xf32> to vector<2x128xf32>
    %584 = arith.addf %581, %583 : vector<2x128xf32>
    %c0_249 = arith.constant 0 : index
    %c0_250 = arith.constant 0 : index
    %585 = vector.load %arg13[%c0_249, %c0_250] : memref<2x128xf32, #tpu.memory_space<vmem>>, vector<2x128xf32>
    tpu.vector_store %arg13[%c0_249, %c0_250], %584 {strides = array<i32>} : memref<2x128xf32, #tpu.memory_space<vmem>>, vector<2x128xf32>,
    return
  }
}

</mosaic_0001>

<bundles_post_ra>
// kernel: multimodal_forward.1
= control target key start
LH: loop header
LB: loop body
LE: loop exit
PB: predicated region body
PF: predicated region fallthrough
CT: control target
= control target key end

     0   :  { %18 = vsyncpa [#allocation3], 0  ;;  %s7735_s0 = inlined_call_operand.vmem [shape: f32[2,18,18], index: 0, kind: input, shape index: {}]   ;;  %s7736_s1 = inlined_call_operand.vmem [shape: f32[10,8], index: 1, kind: input, shape index: {}]   ;;  %s7737_s2 = inlined_call_operand.vmem [shape: bf16[8,32], index: 2, kind: input, shape index: {}]   ;;  %s7738_s3 = inlined_call_operand.vmem [shape: f32[16,32], index: 3, kind: input, shape index: {}]   ;;  %s7739_s4 = inlined_call_operand.vmem [shape: f32[16,16], index: 4, kind: input, shape index: {}]   ;;  %s7740_s5 = inlined_call_operand.vmem [shape: bf16[32,96], index: 5, kind: input, shape index: {}]   ;;  %s7741_s6 = inlined_call_operand.vmem [shape: bf16[32,32], index: 6, kind: input, shape index: {}]   ;;  %s7742_s7 = inlined_call_operand.vmem [shape: bf16[32,128], index: 7, kind: input, shape index: {}]   ;;  %s7743_s8 = inlined_call_operand.vmem [shape: bf16[128,32], index: 8, kind: input, shape index: {}]   ;;  %s7744_s9 = inlined_call_operand.vmem [shape: bf16[32,32], index: 9, kind: input, shape index: {}]   ;;  %s7745_s10 = inlined_call_operand.vmem [shape: bf16[32,128], index: 10, kind: input, shape index: {}]   ;;  %s7746_s11 = inlined_call_operand.vmem [shape: bf16[32,128], index: 11, kind: input, shape index: {}]   ;;  %s7747_s12 = inlined_call_operand.vmem [shape: f32[16,128], index: 12, kind: input, shape index: {}]   ;;  %s7748_s13 = inlined_call_operand.vmem [shape: f32[2,128], index: 13, kind: output, shape index: {}]  }
   0x1   :  { %s26_s27 = sshll.u32 %s7736_s1, 4  ;;  %s27_s27 = int_to_ptr.vmem [resolvable:$true] %s26_s27 }
   0x2   :  { %s4370_s28 = scalar_lea.vmem %s27_s27, 256  ;;  %p4375_p1 = scmp.lt.s32.totalorder %s27_s27, %s27_s27 }
   0x3   :  { %p4371_p0 = scmp.ne.s32.totalorder %s27_s27, %s4370_s28  ;;  %p4376_p2 = scmp.lt.s32.totalorder %s4370_s28, %s4370_s28 }
   0x5   :  { %p4377_p3 = por %p4376_p2, %p4375_p1 }
   0x7   :  { %p4378_p4 = pnand %p4377_p3, %p4371_p0 }
   0x9   :  { %4381 = shalt.err (!%p4378_p4)
}
   0xa   :  { %s4384_s29 = smov [#allocation2]   ;;  %s4385_s30 = smov 128  }
   0xb   :  { %s4386_s14 = smov 8  }
   0xc   :  { %32 = dma.vmem_to_smem %s27_s27, 256, %s4384_s29, [#allocation3], %s4385_s30, %s4385_s30, %s4386_s14  }
   0xd   :  { %4382 = dma.done.wait [#allocation3], 256  }
   0xe   :  { %4383 = vsyncadd [#allocation3], 4294967040 }
   0xf   :  { %58 = sfence }
  0x10   :  { %v4481_v0 = vld [vmem:[%s7738_s3] sm:$0xff]  ;;  %vm2803_vm0 = vcmask 261120   ;;  %v4486_v1 = vld [vmem:[%s7738_s3 + $0x8] sm:$0xff]  ;;  %s3964_s18 = sld [smem:[#allocation2 + $0x80]]  ;;  %v4500_v6 = vld [vmem:[%s7735_s0 + $0x18] sm:$0xff]  ;;  %s3974_s3 = sld [smem:[#allocation2 + $0x81]] }
  0x11   :  { %v2804_v2 = vsel %vm2803_vm0, %v4481_v0, 0.0  ;;  %v2807_v3 = vsel %vm2803_vm0, %v4486_v1, 0.0  ;;  %v4495_v4 = vld [vmem:[%s7735_s0 + $0x8] sm:$0xff]  ;;  %s4387_s23 = smov 127   ;;  %v4508_v9 = vld [vmem:[%s7735_s0 + $0x20] sm:$0xff]  ;;  %s3984_s26 = sld [smem:[#allocation2 + $0x82]] }
  0x12   :  { %2805 = vadd.xlane.f32.xlu0 %v2804_v2  ;;  %v4519_v14 = vld [vmem:[%s7735_s0] sm:$0xff]  ;;  %s3965_s29 = sld [smem:[#allocation2 + $0x100]]  ;;  %s3975_s30 = sld [smem:[#allocation2 + $0x101]]  ;;  %v4595_v61 = vld [vmem:[%s7735_s0 + $0x10] sm:$0x3]  ;;  %vm140_vm1 = vcmask 1046528  }
  0x13   :  { %s4388_s15 = smov 126   ;;  %s3994_s16 = sld [smem:[#allocation2 + $0x83]]  ;;  %vm4390_vm2 = vmmov 0   ;;  %vm253_vm3 = vcmask 1045504   ;;  %vm362_vm4 = vcmask 130048   ;;  %vm390_vm5 = vcmask 130112  }
  0x14   :  { %s3985_s1 = sld [smem:[#allocation2 + $0x102]]  ;;  %s4004_s17 = sld [smem:[#allocation2 + $0x84]]  ;;  %vm401_vm6 = vcmask 1041409   ;;  %vm404_vm7 = vcmask 123904   ;;  %vm2757_vm8 = vcmask 1043456   ;;  %vm2733_vm9 = vcmask 7168  }
  0x15   :  { %s4014_s19 = sld [smem:[#allocation2 + $0x85]]  ;;  %s4005_s20 = sld [smem:[#allocation2 + $0x104]]  ;;  %vm2735_vm10 = vcmask 15360   ;;  %vm2737_vm11 = vcmask 23552   ;;  %vm2739_vm12 = vcmask 31744   ;;  %vm2741_vm13 = vcmask 39936  }
  0x16   :  { %2808 = vadd.xlane.f32.xlu0 %v2807_v3  ;;  %v75_v5 = vstv %s3964_s18  ;;  %v416_v11 = vstv %s3974_s3  ;;  %s3995_s18 = sld [smem:[#allocation2 + $0x103]]  ;;  %s4024_s21 = sld [smem:[#allocation2 + $0x86]]  ;;  %vm2743_vm14 = vcmask 48128   ;;  %vm2745_vm15 = vcmask 56320  }
  0x17   :  { %v77_v7 = vmul.f32 %v75_v5, %v4495_v4  ;;  %v78_v8 = vmul.f32 %v75_v5, %v4500_v6  ;;  %v79_v10 = vmul.f32 %v75_v5, %v4508_v9  ;;  %v418_v12 = vmul.f32 %v416_v11, %v4495_v4  ;;  %s3967_s22 = sld [smem:[#allocation2 + $0x200]]  ;;  %s3977_s25 = sld [smem:[#allocation2 + $0x201]] }
  0x18   :  { %v420_v13 = vmul.f32 %v416_v11, %v4508_v9  ;;  %v748_v15 = vstv %s3984_s26  ;;  %v76_v16 = vmul.f32 %v75_v5, %v4519_v14  ;;  %v417_v18 = vmul.f32 %v416_v11, %v4519_v14  ;;  %s4015_s28 = sld [smem:[#allocation2 + $0x105]]  ;;  %s4945_s26 = sld [smem:[#allocation2 + $0x284]] }
  0x19   :  { %86 = vrot.lane.b32.xlu1 %v77_v7, %s4387_s23  ;;  %v750_v17 = vmul.f32 %v748_v15, %v4495_v4  ;;  %v752_v19 = vmul.f32 %v748_v15, %v4508_v9  ;;  %v101_v20 = vstv %s3965_s29  ;;  %v419_v21 = vmul.f32 %v416_v11, %v4500_v6  ;;  %v4606_v7 = vld [vmem:[%s7735_s0 + $0x28] sm:$0x3]  ;;  %s4034_s29 = sld [smem:[#allocation2 + $0x87]]  ;;  %s4901_s3 = sld [smem:[#allocation2 + $0x205]] }
  0x1a   :  { %v103_v22 = vmul.f32 %v101_v20, %v4495_v4  ;;  %v749_v23 = vmul.f32 %v748_v15, %v4519_v14  ;;  %v105_v24 = vmul.f32 %v101_v20, %v4508_v9  ;;  %v442_v25 = vstv %s3975_s30  ;;  %s3987_s30 = sld [smem:[#allocation2 + $0x202]]  ;;  %s3971_s27 = sld [smem:[#allocation2 + $0x400]] }
  0x1b   :  { %v751_v26 = vmul.f32 %v748_v15, %v4500_v6  ;;  %v444_v27 = vmul.f32 %v442_v25, %v4495_v4  ;;  %v102_v28 = vmul.f32 %v101_v20, %v4519_v14  ;;  %v446_v29 = vmul.f32 %v442_v25, %v4508_v9  ;;  %s4011_s24 = sld [smem:[#allocation2 + $0x404]] }
  0x1c   :  { %v1080_v30 = vstv %s3994_s16  ;;  %v104_v31 = vmul.f32 %v101_v20, %v4500_v6  ;;  %v443_v33 = vmul.f32 %v442_v25, %v4519_v14  ;;  %v774_v35 = vstv %s3985_s1  ;;  %s4025_s16 = sld [smem:[#allocation2 + $0x106]]  ;;  %s3968_s1 = sld [smem:[#allocation2 + $0x280]] }
  0x1d   :  { %88 = vrot.lane.b32.xlu1 %v78_v8, %s4387_s23  ;;  %v1082_v32 = vmul.f32 %v1080_v30, %v4495_v4  ;;  %v1084_v34 = vmul.f32 %v1080_v30, %v4508_v9  ;;  %v445_v36 = vmul.f32 %v442_v25, %v4500_v6  ;;  %v776_v37 = vmul.f32 %v774_v35, %v4495_v4 }
  0x1e   :  { %v1081_v38 = vmul.f32 %v1080_v30, %v4519_v14  ;;  %v778_v39 = vmul.f32 %v774_v35, %v4508_v9  ;;  %v1412_v40 = vstv %s4004_s17  ;;  %v1083_v41 = vmul.f32 %v1080_v30, %v4500_v6  ;;  %s3978_s17 = sld [smem:[#allocation2 + $0x281]] }
  0x1f   :  { %v1414_v42 = vmul.f32 %v1412_v40, %v4495_v4  ;;  %v775_v43 = vmul.f32 %v774_v35, %v4519_v14  ;;  %v1416_v44 = vmul.f32 %v1412_v40, %v4508_v9  ;;  %v1106_v45 = vstv %s3995_s18  ;;  %s3997_s18 = sld [smem:[#allocation2 + $0x203]] }
  0x20   :  { %v777_v46 = vmul.f32 %v774_v35, %v4500_v6  ;;  %v1108_v47 = vmul.f32 %v1106_v45, %v4495_v4  ;;  %v1413_v48 = vmul.f32 %v1412_v40, %v4519_v14  ;;  %v1110_v49 = vmul.f32 %v1106_v45, %v4508_v9 }
  0x21   :  { %90 = vrot.lane.b32.xlu1 %v79_v10, %s4387_s23  ;;  %v1744_v50 = vstv %s4014_s19  ;;  %v1415_v51 = vmul.f32 %v1412_v40, %v4500_v6  ;;  %v1107_v53 = vmul.f32 %v1106_v45, %v4519_v14  ;;  %v1438_v55 = vstv %s4005_s20  ;;  %s4035_s19 = sld [smem:[#allocation2 + $0x107]]  ;;  %s3988_s20 = sld [smem:[#allocation2 + $0x282]] }
  0x22   :  { %v1746_v52 = vmul.f32 %v1744_v50, %v4495_v4  ;;  %v1748_v54 = vmul.f32 %v1744_v50, %v4508_v9  ;;  %v1109_v56 = vmul.f32 %v1106_v45, %v4500_v6  ;;  %v1440_v57 = vmul.f32 %v1438_v55, %v4495_v4 }
  0x23   :  { %v1745_v58 = vmul.f32 %v1744_v50, %v4519_v14  ;;  %v1442_v59 = vmul.f32 %v1438_v55, %v4508_v9  ;;  %v2076_v60 = vstv %s4024_s21  ;;  %v160_v62 = vstv %s3967_s22  ;;  %s4007_s21 = sld [smem:[#allocation2 + $0x204]]  ;;  %s3998_s22 = sld [smem:[#allocation2 + $0x283]] }
  0x24   :  { %v1747_v63 = vmul.f32 %v1744_v50, %v4500_v6  ;;  %v2078_v2 = vmul.f32 %v2076_v60, %v4495_v4  ;;  %v162_v3 = vmul.f32 %v160_v62, %v4495_v4  ;;  %v163_v5 = vmul.f32 %v160_v62, %v4595_v61 }
  0x25   :  { %427 = vrot.lane.b32.xlu1 %v418_v12, %s4387_s23  ;;  %v1439_v8 = vmul.f32 %v1438_v55, %v4519_v14  ;;  %v2080_v10 = vmul.f32 %v2076_v60, %v4508_v9  ;;  %v165_v11 = vmul.f32 %v160_v62, %v4508_v9  ;;  %v166_v15 = vmul.f32 %v160_v62, %v4606_v7 }
  0x26   :  { %v174_v12 = vrot.slane %v162_v3, 1  ;;  %v2079_v30 = vmul.f32 %v2076_v60, %v4500_v6  ;;  %v1770_v40 = vstv %s4015_s28  ;;  %s3981_s28 = sld [smem:[#allocation2 + $0x401]] }
  0x27   :  { %v181_v20 = vrot.slane %v166_v15, 1 }
  0x29   :  { %431 = vrot.lane.b32.xlu1 %v420_v13, %s4387_s23  ;;  %v176_v13 = vrot.slane %v163_v5, 1 }
  0x2c   :  { %84 = vrot.lane.b32.xlu0 %v76_v16, %s4387_s23  ;;  %v500_v16 = vstv %s3977_s25  ;;  %s4030_s25 = sld [smem:[#allocation2 + $0x386]] }
  0x2d   :  { %759 = vrot.lane.b32.xlu1 %v750_v17, %s4387_s23  ;;  %v1441_v17 = vmul.f32 %v1438_v55, %v4500_v6  ;;  %v505_v25 = vmul.f32 %v500_v16, %v4508_v9 }
  0x30   :  { %425 = vrot.lane.b32.xlu0 %v417_v18, %s4387_s23  ;;  %v179_v18 = vrot.slane %v165_v11, 1 }
  0x31   :  { %763 = vrot.lane.b32.xlu1 %v752_v19, %s4387_s23  ;;  %v177_v19 = vsel %vm140_vm1, %v174_v12, %v176_v13 }
  0x34   :  { %429 = vrot.lane.b32.xlu0 %v419_v21, %s4387_s23  ;;  %v502_v21 = vmul.f32 %v500_v16, %v4495_v4 }
  0x35   :  { %112 = vrot.lane.b32.xlu1 %v103_v22, %s4388_s15  ;;  %v503_v22 = vmul.f32 %v500_v16, %v4595_v61 }
  0x38   :  { %757 = vrot.lane.b32.xlu0 %v749_v23, %s4387_s23  ;;  %v2077_v23 = vmul.f32 %v2076_v60, %v4519_v14 }
  0x39   :  { %116 = vrot.lane.b32.xlu1 %v105_v24, %s4388_s15  ;;  %v161_v24 = vmul.f32 %v160_v62, %v4519_v14 }
  0x3c   :  { %761 = vrot.lane.b32.xlu0 %v751_v26, %s4387_s23  ;;  %v182_v26 = vsel %vm140_vm1, %v179_v18, %v181_v20  ;;  %v4699_v20 = vstv %s4025_s16  ;;  %s4018_s16 = sld [smem:[#allocation2 + $0x285]] }
  0x3d   :  { %453 = vrot.lane.b32.xlu1 %v444_v27, %s4388_s15  ;;  %v514_v27 = vrot.slane %v502_v21, 1 }
  0x40   :  { %110 = vrot.lane.b32.xlu0 %v102_v28, %s4388_s15  ;;  %v516_v28 = vrot.slane %v503_v22, 1  ;;  %v4703_v22 = vstv %s3968_s1  ;;  %s5864_s1 = sld [smem:[#allocation2 + $0x181]] }
  0x41   :  { %457 = vrot.lane.b32.xlu1 %v446_v29, %s4388_s15  ;;  %v506_v29 = vmul.f32 %v500_v16, %v4606_v7 }
  0x43   :  { %v521_v35 = vrot.slane %v506_v29, 1 }
  0x44   :  { %114 = vrot.lane.b32.xlu0 %v104_v31, %s4388_s15  ;;  %v173_v31 = vrot.slane %v161_v24, 1  ;;  %v2103_v24 = vmul.f32 %v4699_v20, %v4519_v14 }
  0x45   :  { %1091 = vrot.lane.b32.xlu1 %v1082_v32, %s4387_s23  ;;  %v164_v32 = vmul.f32 %v160_v62, %v4500_v6 }
  0x48   :  { %451 = vrot.lane.b32.xlu0 %v443_v33, %s4388_s15  ;;  %v517_v33 = vsel %vm140_vm1, %v514_v27, %v516_v28 }
  0x49   :  { %1095 = vrot.lane.b32.xlu1 %v1084_v34, %s4387_s23  ;;  %v519_v34 = vrot.slane %v505_v25, 1  ;;  %v201_v25 = vmul.f32 %v4703_v22, %v4519_v14 }
  0x4c   :  { %455 = vrot.lane.b32.xlu0 %v445_v36, %s4388_s15  ;;  %v175_v36 = vsel %vm140_vm1, %v173_v31, %v174_v12  ;;  %v204_v31 = vmul.f32 %v4703_v22, %v4500_v6 }
  0x4d   :  { %785 = vrot.lane.b32.xlu1 %v776_v37, %s4388_s15  ;;  %v178_v37 = vrot.slane %v164_v32, 1  ;;  %v213_v32 = vrot.slane %v201_v25, 1 }
  0x50   :  { %1089 = vrot.lane.b32.xlu0 %v1081_v38, %s4387_s23  ;;  %v501_v38 = vmul.f32 %v500_v16, %v4519_v14 }
  0x51   :  { %789 = vrot.lane.b32.xlu1 %v778_v39, %s4388_s15  ;;  %v522_v39 = vsel %vm140_vm1, %v519_v34, %v521_v35  ;;  %v4730_v35 = vstv %s3978_s17  ;;  %s5934_s17 = sld [smem:[#allocation2 + $0x406]] }
  0x54   :  { %1093 = vrot.lane.b32.xlu0 %v1083_v41, %s4387_s23  ;;  %v180_v41 = vsel %vm140_vm1, %v178_v37, %v179_v18 }
  0x55   :  { %1423 = vrot.lane.b32.xlu1 %v1414_v42, %s4387_s23  ;;  %v1772_v42 = vmul.f32 %v1770_v40, %v4495_v4 }
  0x58   :  { %783 = vrot.lane.b32.xlu0 %v775_v43, %s4388_s15  ;;  %v513_v43 = vrot.slane %v501_v38, 1 }
  0x59   :  { %1427 = vrot.lane.b32.xlu1 %v1416_v44, %s4387_s23  ;;  %v504_v44 = vmul.f32 %v500_v16, %v4500_v6 }
  0x5c   :  { %787 = vrot.lane.b32.xlu0 %v777_v46, %s4388_s15  ;;  %v515_v46 = vsel %vm140_vm1, %v513_v43, %v514_v27 }
  0x5d   :  { %1117 = vrot.lane.b32.xlu1 %v1108_v47, %s4388_s15  ;;  %v1774_v47 = vmul.f32 %v1770_v40, %v4508_v9 }
  0x60   :  { %1421 = vrot.lane.b32.xlu0 %v1413_v48, %s4387_s23  ;;  %v518_v48 = vrot.slane %v504_v44, 1 }
  0x61   :  { %1121 = vrot.lane.b32.xlu1 %v1110_v49, %s4388_s15  ;;  %v2408_v49 = vstv %s4034_s29  ;;  %s3970_s29 = sld [smem:[#allocation2 + $0x380]] }
  0x62   :  { %v2412_v55 = vmul.f32 %v2408_v49, %v4508_v9  ;;  %v2411_v3 = vmul.f32 %v2408_v49, %v4500_v6 }
  0x64   :  { %1425 = vrot.lane.b32.xlu0 %v1415_v51, %s4387_s23  ;;  %v520_v51 = vsel %vm140_vm1, %v518_v48, %v519_v34  ;;  %v4728_v34 = vmul.f32 %v4703_v22, %v4508_v9  ;;  %v544_v48 = vmul.f32 %v4730_v35, %v4500_v6 }
  0x65   :  { %1755 = vrot.lane.b32.xlu1 %v1746_v52, %s4387_s23  ;;  %v2410_v52 = vmul.f32 %v2408_v49, %v4495_v4 }
  0x68   :  { %1115 = vrot.lane.b32.xlu0 %v1107_v53, %s4388_s15 }
  0x69   :  { %1759 = vrot.lane.b32.xlu1 %v1748_v54, %s4387_s23  ;;  %v1771_v54 = vmul.f32 %v1770_v40, %v4519_v14 }
  0x6c   :  { %1119 = vrot.lane.b32.xlu0 %v1109_v56, %s4388_s15 }
  0x6d   :  { %1449 = vrot.lane.b32.xlu1 %v1440_v57, %s4388_s15  ;;  %v1773_v57 = vmul.f32 %v1770_v40, %v4500_v6 }
  0x70   :  { %1753 = vrot.lane.b32.xlu0 %v1745_v58, %s4387_s23  ;;  %v4665_v58 = vstv %s3987_s30  ;;  %s3980_s30 = sld [smem:[#allocation2 + $0x381]] }
  0x71   :  { %1453 = vrot.lane.b32.xlu1 %v1442_v59, %s4388_s15  ;;  %v2409_v59 = vmul.f32 %v2408_v49, %v4519_v14  ;;  %v833_v60 = vmul.f32 %v4665_v58, %v4519_v14  ;;  %v4673_v62 = vmul.f32 %v4665_v58, %v4495_v4  ;;  %v4684_v11 = vmul.f32 %v4665_v58, %v4508_v9 }
  0x72   :  { %v4762_v49 = vmul.f32 %v4730_v35, %v4508_v9 }
  0x73   :  { %v845_v5 = vrot.slane %v833_v60, 1 }
  0x74   :  { %1757 = vrot.lane.b32.xlu0 %v1747_v63, %s4387_s23 }
  0x75   :  { %2087 = vrot.lane.b32.xlu1 %v2078_v2, %s4387_s23 }
  0x78   :  { %1447 = vrot.lane.b32.xlu0 %v1439_v8, %s4388_s15  ;;  %v846_v8 = vrot.slane %v4673_v62, 1 }
  0x79   :  { %2091 = vrot.lane.b32.xlu1 %v2080_v10, %s4387_s23  ;;  %v836_v10 = vmul.f32 %v4665_v58, %v4500_v6 }
  0x7a   :  { %v847_v15 = vsel %vm140_vm1, %v845_v5, %v846_v8 }
  0x7b   :  { %v850_v16 = vrot.slane %v836_v10, 1 }
  0x7c   :  { %1451 = vrot.lane.b32.xlu0 %v1441_v17, %s4388_s15  ;;  %v851_v17 = vrot.slane %v4684_v11, 1  ;;  %v2104_v11 = vmul.f32 %v4699_v20, %v4495_v4 }
  0x7d   :  { %185 = vrot.lane.b32.xlu1 %v177_v19, %s4387_s23 }
  0x7e   :  { %v852_v19 = vsel %vm140_vm1, %v850_v16, %v851_v17 }
  0x80   :  { %2085 = vrot.lane.b32.xlu0 %v2077_v23, %s4387_s23 }
  0x81   :  { %189 = vrot.lane.b32.xlu1 %v182_v26, %s4387_s23  ;;  %v4714_v26 = vmul.f32 %v4703_v22, %v4495_v4 }
  0x84   :  { %2089 = vrot.lane.b32.xlu0 %v2079_v30, %s4387_s23  ;;  %v2105_v30 = vmul.f32 %v4699_v20, %v4500_v6 }
  0x85   :  { %525 = vrot.lane.b32.xlu1 %v517_v33, %s4387_s23  ;;  %v7755_v33 = vrot.slane %v4714_v26, 1 }
  0x87   :  { %v215_v40 = vsel %vm140_vm1, %v213_v32, %v7755_v33 }
  0x88   :  { %183 = vrot.lane.b32.xlu0 %v175_v36, %s4387_s23 }
  0x89   :  { %529 = vrot.lane.b32.xlu1 %v522_v39, %s4387_s23  ;;  %v541_v39 = vmul.f32 %v4730_v35, %v4519_v14 }
  0x8b   :  { %v4642_v45 = vpop.permute.xlu1 %86 }
  0x8c   :  { %7825 = vst [vmem:[#allocation5_spill] sm:$0xff] %v4642_v45  ;;  %187 = vrot.lane.b32.xlu0 %v180_v41, %s4387_s23  ;;  %v218_v41 = vrot.slane %v204_v31, 1 }
  0x8d   :  { %1781 = vrot.lane.b32.xlu1 %v1772_v42, %s4388_s15  ;;  %v7754_v42 = vrot.slane %v4728_v34, 1 }
  0x8f   :  { %v4648_v50 = vpop.permute.xlu1 %88 }
  0x90   :  { %523 = vrot.lane.b32.xlu0 %v515_v46, %s4387_s23 }
  0x91   :  { %1785 = vrot.lane.b32.xlu1 %v1774_v47, %s4388_s15 }
  0x93   :  { %v4654_v53 = vpop.permute.xlu1 %90 }
  0x94   :  { %7826 = vst [vmem:[#allocation6_spill] sm:$0xff] %v4654_v53  ;;  %527 = vrot.lane.b32.xlu0 %v520_v51, %s4387_s23  ;;  %v553_v51 = vrot.slane %v541_v39, 1 }
  0x95   :  { %2419 = vrot.lane.b32.xlu1 %v2410_v52, %s4387_s23 }
  0x97   :  { %v4660_v56 = vpop.permute.xlu1 %427 }
  0x98   :  { %7827 = vst [vmem:[#allocation7_spill] sm:$0xff] %v4660_v56  ;;  %1779 = vrot.lane.b32.xlu0 %v1771_v54, %s4388_s15 }
  0x99   :  { %2423 = vrot.lane.b32.xlu1 %v2412_v55, %s4387_s23 }
  0x9b   :  { %v4675_v63 = vpop.permute.xlu1 %431 }
  0x9c   :  { %1783 = vrot.lane.b32.xlu0 %v1773_v57, %s4388_s15  ;;  %7828 = vst [vmem:[#allocation8_spill] sm:$0xff] %v4675_v63  ;;  %v4771_v57 = vstv %s3997_s18  ;;  %s3991_s18 = sld [smem:[#allocation2 + $0x402]] }
  0x9d   :  { %v1165_v10 = vmul.f32 %v4771_v57, %v4519_v14 }
  0x9f   :  { %v2806_v2 = vpop.xlane.xlu0 %2805  ;;  %v4686_v13 = vpop.permute.xlu1 %759 }
  0xa0   :  { %2417 = vrot.lane.b32.xlu0 %v2409_v59, %s4387_s23  ;;  %7829 = vst [vmem:[#allocation9_spill] sm:$0xff] %v4686_v13  ;;  %v2811_v27 = vmul.f32 0.03125, %v2806_v2  ;;  %v558_v2 = vrot.slane %v544_v48, 1 }
  0xa2   :  { %v4733_v36 = vsub.f32 %v4481_v0, %v2811_v27  ;;  %v4746_v0 = vmul.f32 %v4730_v35, %v4495_v4  ;;  %v1168_v27 = vmul.f32 %v4771_v57, %v4500_v6 }
  0xa3   :  { %v2809_v12 = vpop.xlane.xlu0 %2808  ;;  %v4701_v21 = vpop.permute.xlu1 %763 }
  0xa4   :  { %2421 = vrot.lane.b32.xlu0 %v2411_v3, %s4387_s23  ;;  %7830 = vst [vmem:[#allocation10_spill] sm:$0xff] %v4701_v21  ;;  %v2812_v37 = vmul.f32 0.03125, %v2809_v12  ;;  %v2815_v46 = vmul.f32 %v4733_v36, %v4733_v36  ;;  %v7752_v52 = vrot.slane %v4746_v0, 1  ;;  %v7751_v3 = vrot.slane %v4762_v49, 1 }
  0xa5   :  { %v4786_v12 = vmul.f32 %v4771_v57, %v4495_v4  ;;  %v1182_v39 = vrot.slane %v1168_v27, 1 }
  0xa6   :  { %v4749_v43 = vsub.f32 %v4486_v1, %v2812_v37  ;;  %v220_v1 = vsel %vm140_vm1, %v218_v41, %v7754_v42  ;;  %v2817_v54 = vsel %vm2803_vm0, %v2815_v46, 0.0  ;;  %v555_v5 = vsel %vm140_vm1, %v553_v51, %v7752_v52 }
  0xa7   :  { %v4693_v18 = vpop.permute.xlu0 %84  ;;  %v4718_v29 = vpop.permute.xlu1 %112  ;;  %v7750_v25 = vrot.slane %v4786_v12, 1  ;;  %v835_v46 = vmul.f32 %v4665_v58, %v4595_v61  ;;  %v4821_v51 = vstv %s4035_s19  ;;  %v4894_v42 = vstv %s3998_s22  ;;  %s4037_s22 = sld [smem:[#allocation2 + $0x207]]  ;;  %s5537_s19 = sld [smem:[#allocation2 + $0x384]] }
  0xa8   :  { %855 = vrot.lane.b32.xlu0 %v847_v15, %s4387_s23  ;;  %7833 = vst [vmem:[#allocation13_spill] sm:$0xff] %v4718_v29  ;;  %v2816_v55 = vmul.f32 %v4749_v43, %v4749_v43 }
  0xaa   :  { %v2820_v15 = vsel %vm2803_vm0, %v2816_v55, 0.0 }
  0xab   :  { %v4705_v23 = vpop.permute.xlu0 %425  ;;  %v4751_v44 = vpop.permute.xlu1 %116 }
  0xac   :  { %7831 = vst [vmem:[#allocation11_spill] sm:$0xff] %v4705_v23  ;;  %859 = vrot.lane.b32.xlu0 %v852_v19, %s4387_s23  ;;  %7835 = vst [vmem:[#allocation15_spill] sm:$0xff] %v4751_v44  ;;  %v560_v19 = vsel %vm140_vm1, %v558_v2, %v7751_v3  ;;  %v848_v2 = vrot.slane %v835_v46, 1  ;;  %v4855_v3 = vstv %s4007_s21  ;;  %s6041_s21 = sld [smem:[#allocation2 + $0x183]] }
  0xad   :  { %v4874_v52 = vmul.f32 %v4855_v3, %v4495_v4 }
  0xaf   :  { %v4716_v28 = vpop.permute.xlu0 %429  ;;  %v4775_v60 = vpop.permute.xlu1 %453 }
  0xb0   :  { %7832 = vst [vmem:[#allocation12_spill] sm:$0xff] %v4716_v28  ;;  %2111 = vrot.lane.b32.xlu0 %v2103_v24, %s4388_s15  ;;  %7837 = vst [vmem:[#allocation17_spill] sm:$0xff] %v4775_v60  ;;  %v1177_v24 = vrot.slane %v1165_v10, 1  ;;  %v2435_v10 = vmul.f32 %v4821_v51, %v4519_v14 }
  0xb2   :  { %v1179_v37 = vsel %vm140_vm1, %v1177_v24, %v7750_v25 }
  0xb3   :  { %v4735_v38 = vpop.permute.xlu0 %757  ;;  %v4802_v31 = vpop.permute.xlu1 %457 }
  0xb4   :  { %7834 = vst [vmem:[#allocation14_spill] sm:$0xff] %v4735_v38  ;;  %2115 = vrot.lane.b32.xlu0 %v2105_v30, %s4388_s15  ;;  %v4800_v30 = vmul.f32 %v4771_v57, %v4508_v9  ;;  %7838 = vst [vmem:[#allocation18_spill] sm:$0xff] %v4802_v31 }
  0xb7   :  { %v4755_v47 = vpop.permute.xlu0 %761  ;;  %v4815_v48 = vpop.permute.xlu1 %1091 }
  0xb8   :  { %7836 = vst [vmem:[#allocation16_spill] sm:$0xff] %v4755_v47  ;;  %223 = vrot.lane.b32.xlu0 %v215_v40, %s4388_s15  ;;  %v7749_v40 = vrot.slane %v4800_v30, 1  ;;  %7841 = vst [vmem:[#allocation21_spill] sm:$0xff] %v4815_v48  ;;  %v1170_v47 = vmul.f32 %v4771_v57, %v4606_v7 }
  0xbb   :  { %v4773_v59 = vpop.permute.xlu0 %110  ;;  %v4838_v24 = vpop.permute.xlu1 %1095 }
  0xbc   :  { %227 = vrot.lane.b32.xlu0 %v220_v1, %s4388_s15  ;;  %v1184_v1 = vsel %vm140_vm1, %v1182_v39, %v7749_v40  ;;  %7843 = vst [vmem:[#allocation23_spill] sm:$0xff] %v4838_v24  ;;  %v2437_v39 = vmul.f32 %v4821_v51, %v4500_v6 }
  0xbd   :  { %2818 = vadd.xlane.f32.xlu1 %v2817_v54  ;;  %v4823_v54 = vstv %s3988_s20  ;;  %s5586_s20 = sld [smem:[#allocation2 + $0x403]] }
  0xbe   :  { %v876_v46 = vmul.f32 %v4823_v54, %v4500_v6 }
  0xbf   :  { %v4789_v16 = vpop.permute.xlu0 %114 }
  0xc0   :  { %563 = vrot.lane.b32.xlu0 %v555_v5, %s4388_s15  ;;  %v838_v5 = vmul.f32 %v4665_v58, %v4606_v7  ;;  %v849_v58 = vsel %vm140_vm1, %v846_v8, %v848_v2  ;;  %v4863_v2 = vpop.permute.xlu1 %785 }
  0xc1   :  { %2821 = vadd.xlane.f32.xlu1 %v2820_v15  ;;  %v873_v15 = vmul.f32 %v4823_v54, %v4519_v14  ;;  %7846 = vst [vmem:[#allocation26_spill] sm:$0xff] %v4863_v2 }
  0xc3   :  { %v4804_v32 = vpop.permute.xlu0 %451  ;;  %v885_v40 = vrot.slane %v873_v15, 1  ;;  %v1497_v15 = vmul.f32 %v4855_v3, %v4519_v14 }
  0xc4   :  { %7839 = vst [vmem:[#allocation19_spill] sm:$0xff] %v4804_v32  ;;  %567 = vrot.lane.b32.xlu0 %v560_v19, %s4388_s15  ;;  %v4836_v19 = vmul.f32 %v4823_v54, %v4495_v4  ;;  %v4896_v33 = vpop.permute.xlu1 %789 }
  0xc5   :  { %7848 = vst [vmem:[#allocation28_spill] sm:$0xff] %v4896_v33 }
  0xc6   :  { %v7753_v25 = vrot.slane %v4836_v19, 1 }
  0xc7   :  { %v4811_v41 = vpop.permute.xlu0 %455 }
  0xc8   :  { %7840 = vst [vmem:[#allocation20_spill] sm:$0xff] %v4811_v41  ;;  %1187 = vrot.lane.b32.xlu0 %v1179_v37, %s4387_s23  ;;  %v853_v37 = vrot.slane %v838_v5, 1  ;;  %v890_v5 = vrot.slane %v876_v46, 1  ;;  %v1205_v46 = vmul.f32 %v4894_v42, %v4519_v14 }
  0xca   :  { %v854_v8 = vsel %vm140_vm1, %v851_v17, %v853_v37  ;;  %v203_v37 = vmul.f32 %v4703_v22, %v4595_v61 }
  0xcb   :  { %v4825_v55 = vpop.permute.xlu0 %1089 }
  0xcc   :  { %7842 = vst [vmem:[#allocation22_spill] sm:$0xff] %v4825_v55  ;;  %1191 = vrot.lane.b32.xlu0 %v1184_v1, %s4387_s23  ;;  %v4852_v1 = vmul.f32 %v4823_v54, %v4508_v9  ;;  %v1217_v55 = vrot.slane %v1205_v46, 1  ;;  %v4281_v46 = vld [vmem:[%s7740_s5 + $0x8] sm:$0xff]  }
  0xcf   :  { %v4840_v27 = vpop.permute.xlu0 %1093 }
  0xd0   :  { %7844 = vst [vmem:[#allocation24_spill] sm:$0xff] %v4840_v27  ;;  %2443 = vrot.lane.b32.xlu0 %v2435_v10, %s4388_s15  ;;  %v7756_v10 = vrot.slane %v4852_v1, 1  ;;  %v7852_v27 = vrot.slane %v4714_v26, 1 }
  0xd2   :  { %857 = vrot.lane.b32.xlu1 %v849_v58, %s4387_s23  ;;  %v887_v58 = vsel %vm140_vm1, %v885_v40, %v7753_v25  ;;  %v892_v40 = vsel %vm140_vm1, %v890_v5, %v7756_v10  ;;  %v4892_v25 = vmul.f32 %v4855_v3, %v4508_v9  ;;  %v206_v10 = vmul.f32 %v4703_v22, %v4606_v7  ;;  %v4280_v22 = vld [vmem:[%s7740_s5] sm:$0xff]   ;;  %s4027_s5 = sld [smem:[#allocation2 + $0x206]] }
  0xd3   :  { %v4858_v62 = vpop.permute.xlu0 %783 }
  0xd4   :  { %7845 = vst [vmem:[#allocation25_spill] sm:$0xff] %v4858_v62  ;;  %2447 = vrot.lane.b32.xlu0 %v2437_v39, %s4388_s15  ;;  %v1509_v39 = vrot.slane %v1497_v15, 1  ;;  %v216_v15 = vrot.slane %v203_v37, 1  ;;  %v7757_v37 = vmov 0.0  }
  0xd5   :  { %4129 = vmatprep.subr.bf16.mxu1 %v7757_v37  ;;  %4123 = vmatprep.subr.bf16.mxu0 %v7757_v37  ;;  %v546_v37 = vmul.f32 %v4730_v35, %v4606_v7 }
  0xd6   :  { %861 = vrot.lane.b32.xlu1 %v854_v8, %s4387_s23  ;;  %v1500_v8 = vmul.f32 %v4855_v3, %v4500_v6  ;;  %4130 = vmatpush3.bf16.msra.mxu1 %v4280_v22 }
  0xd7   :  { %v4879_v17 = vpop.permute.xlu0 %787 }
  0xd8   :  { %7847 = vst [vmem:[#allocation27_spill] sm:$0xff] %v4879_v17  ;;  %895 = vrot.lane.b32.xlu0 %v887_v58, %s4388_s15  ;;  %v2106_v58 = vmul.f32 %v4699_v20, %v4508_v9  ;;  %v4912_v17 = vmul.f32 %v4894_v42, %v4495_v4  ;;  %v1514_v62 = vrot.slane %v1500_v8, 1  ;;  %v221_v8 = vrot.slane %v206_v10, 1 }
  0xd9   :  { %v4943_v10 = vmul.f32 %v4894_v42, %v4508_v9 }
  0xda   :  { %2113 = vrot.lane.b32.xlu1 %v2104_v11, %s4388_s15  ;;  %v7850_v11 = vrot.slane %v4874_v52, 1 }
  0xdb   :  { %v4903_v5 = vpop.permute.xlu0 %1421 }
  0xdc   :  { %7849 = vst [vmem:[#allocation29_spill] sm:$0xff] %v4903_v5  ;;  %899 = vrot.lane.b32.xlu0 %v892_v40, %s4388_s15  ;;  %v1511_v20 = vsel %vm140_vm1, %v1509_v39, %v7850_v11  ;;  %v217_v39 = vsel %vm140_vm1, %v7852_v27, %v216_v15  ;;  %v543_v11 = vmul.f32 %v4730_v35, %v4595_v61  ;;  %v4931_v5 = vpop.permute.xlu1 %1423  ;;  %v4952_v15 = vstv %s4901_s3  ;;  %s3990_s3 = sld [smem:[#allocation2 + $0x382]] }
  0xdd   :  { %7853 = vst [vmem:[#allocation31_spill] sm:$0xff] %v4931_v5  ;;  %v1208_v27 = vmul.f32 %v4894_v42, %v4500_v6  ;;  %v7858_v5 = vrot.slane %v4912_v17, 1 }
  0xde   :  { %2117 = vrot.lane.b32.xlu1 %v2106_v58, %s4388_s15  ;;  %v7854_v58 = vmov 0.0  }
  0xdf   :  { %v4924_v40 = vpop.permute.xlu0 %1425  ;;  %4131 = vmatprep.subr.bf16.mxu1 %v7854_v58  ;;  %v1219_v24 = vsel %vm140_vm1, %v1217_v55, %v7858_v5  ;;  %4133 = vmatprep.mubr.msk.bf16.mxu1 %vm4390_vm2, %v7854_v58  ;;  %v7861_v5 = vrot.slane %v4746_v0, 1 }
  0xe0   :  { %7851 = vst [vmem:[#allocation30_spill] sm:$0xff] %v4924_v40  ;;  %1519 = vrot.lane.b32.xlu0 %v1511_v20, %s4387_s23  ;;  %v7855_v40 = vrot.slane %v4892_v25, 1  ;;  %4132 = vmatpush3.bf16.msra.mxu1 %v4281_v46  ;;  %v4977_v35 = vpop.permute.xlu1 %1427  ;;  %v1832_v46 = vmul.f32 %v4952_v15, %v4500_v6 }
  0xe1   :  { %4143 = vmatprep.subr.bf16.mxu1 %v7854_v58  ;;  %4125 = vmatprep.mubr.msk.bf16.mxu0 %vm4390_vm2, %v7854_v58  ;;  %7859 = vst [vmem:[#allocation33_spill] sm:$0xff] %v4977_v35 }
  0xe2   :  { %v1516_v26 = vsel %vm140_vm1, %v1514_v62, %v7855_v40  ;;  %225 = vrot.lane.b32.xlu1 %v217_v39, %s4388_s15  ;;  %v7857_v62 = vrot.slane %v4728_v34, 1  ;;  %v556_v40 = vrot.slane %v543_v11, 1  ;;  %v1222_v39 = vrot.slane %v1208_v27, 1 }
  0xe3   :  { %v4954_v20 = vpop.permute.xlu0 %1115  ;;  %v1829_v34 = vmul.f32 %v4952_v15, %v4519_v14  ;;  %v1167_v27 = vmul.f32 %v4771_v57, %v4595_v61 }
  0xe4   :  { %7856 = vst [vmem:[#allocation32_spill] sm:$0xff] %v4954_v20  ;;  %v222_v22 = vsel %vm140_vm1, %v7857_v62, %v221_v8  ;;  %1523 = vrot.lane.b32.xlu0 %v1516_v26, %s4387_s23  ;;  %v7760_v20 = vrot.slane %v4943_v10, 1  ;;  %v4971_v8 = vmul.f32 %v4952_v15, %v4495_v4  ;;  %v557_v11 = vsel %vm140_vm1, %v7861_v5, %v556_v40  ;;  %v5009_v41 = vpop.permute.xlu1 %1117 }
  0xe5   :  { %v561_v26 = vrot.slane %v546_v37, 1  ;;  %v4992_v62 = vmul.f32 %v4952_v15, %v4508_v9  ;;  %v1841_v0 = vrot.slane %v1829_v34, 1  ;;  %v4999_v37 = vstv %s4945_s26  ;;  %7864 = vst [vmem:[#allocation36_spill] sm:$0xff] %v5009_v41  ;;  %s4028_s26 = sld [smem:[#allocation2 + $0x286]] }
  0xe6   :  { %229 = vrot.lane.b32.xlu1 %v222_v22, %s4388_s15  ;;  %v1224_v22 = vsel %vm140_vm1, %v1222_v39, %v7760_v20  ;;  %v7759_v40 = vrot.slane %v4971_v8, 1  ;;  %v7863_v5 = vrot.slane %v4762_v49, 1  ;;  %v1180_v35 = vrot.slane %v1167_v27, 1 }
  0xe7   :  { %v4980_v55 = vpop.permute.xlu0 %1119  ;;  %v1846_v39 = vrot.slane %v1832_v46, 1  ;;  %v7761_v34 = vrot.slane %v4992_v62, 1  ;;  %v7866_v27 = vrot.slane %v4786_v12, 1  ;;  %v1540_v20 = vmul.f32 %v4999_v37, %v4500_v6 }
  0xe8   :  { %7860 = vst [vmem:[#allocation34_spill] sm:$0xff] %v4980_v55  ;;  %1227 = vrot.lane.b32.xlu0 %v1219_v24, %s4388_s15  ;;  %v562_v55 = vsel %vm140_vm1, %v7863_v5, %v561_v26  ;;  %v1843_v49 = vsel %vm140_vm1, %v1841_v0, %v7759_v40  ;;  %v5020_v26 = vmul.f32 %v4999_v37, %v4495_v4  ;;  %v5039_v12 = vstv %s4027_s5  ;;  %s4000_s5 = sld [smem:[#allocation2 + $0x383]] }
  0xe9   :  { %v1181_v46 = vsel %vm140_vm1, %v7866_v27, %v1180_v35  ;;  %v1848_v5 = vsel %vm140_vm1, %v1846_v39, %v7761_v34  ;;  %v5041_v35 = vpop.permute.xlu1 %1121  ;;  %v7869_v39 = vrot.slane %v4800_v30, 1  ;;  %v5054_v27 = vmul.f32 %v5039_v12, %v4495_v4 }
  0xea   :  { %565 = vrot.lane.b32.xlu1 %v557_v11, %s4388_s15  ;;  %v1537_v11 = vmul.f32 %v4999_v37, %v4519_v14  ;;  %v7762_v40 = vrot.slane %v5020_v26, 1  ;;  %7867 = vst [vmem:[#allocation38_spill] sm:$0xff] %v5041_v35  ;;  %v1554_v34 = vrot.slane %v1540_v20, 1  ;;  %v2436_v30 = vmul.f32 %v4821_v51, %v4495_v4 }
  0xeb   :  { %v5002_v24 = vpop.permute.xlu0 %1753  ;;  %v1210_v41 = vmul.f32 %v4894_v42, %v4606_v7  ;;  %v1542_v33 = vmul.f32 %v4999_v37, %v4606_v7 }
  0xec   :  { %7862 = vst [vmem:[#allocation35_spill] sm:$0xff] %v5002_v24  ;;  %1231 = vrot.lane.b32.xlu0 %v1224_v22, %s4388_s15  ;;  %v1185_v22 = vrot.slane %v1170_v47, 1  ;;  %v1549_v0 = vrot.slane %v1537_v11, 1 }
  0xee   :  { %569 = vrot.lane.b32.xlu1 %v562_v55, %s4388_s15  ;;  %v5037_v55 = vmul.f32 %v4999_v37, %v4508_v9  ;;  %v1186_v11 = vsel %vm140_vm1, %v7869_v39, %v1185_v22  ;;  %v5067_v39 = vpop.permute.xlu1 %1755 }
  0xef   :  { %v5023_v57 = vpop.permute.xlu0 %1757  ;;  %7871 = vst [vmem:[#allocation41_spill] sm:$0xff] %v5067_v39 }
  0xf0   :  { %7865 = vst [vmem:[#allocation37_spill] sm:$0xff] %v5023_v57  ;;  %1851 = vrot.lane.b32.xlu0 %v1843_v49, %s4387_s23  ;;  %v2161_v49 = vmul.f32 %v5039_v12, %v4519_v14 }
  0xf2   :  { %1189 = vrot.lane.b32.xlu1 %v1181_v46, %s4387_s23  ;;  %v1551_v46 = vsel %vm140_vm1, %v1549_v0, %v7762_v40  ;;  %v2173_v57 = vrot.slane %v2161_v49, 1  ;;  %v5078_v40 = vmul.f32 %v5039_v12, %v4508_v9  ;;  %v5083_v49 = vstv %s3970_s29  ;;  %s5815_s29 = sld [smem:[#allocation2 + $0x180]] }
  0xf3   :  { %v5044_v47 = vpop.permute.xlu0 %1447  ;;  %v5098_v35 = vmul.f32 %v5083_v49, %v4495_v4  ;;  %v277_v4 = vmul.f32 %v5083_v49, %v4500_v6 }
  0xf4   :  { %7868 = vst [vmem:[#allocation39_spill] sm:$0xff] %v5044_v47  ;;  %1855 = vrot.lane.b32.xlu0 %v1848_v5, %s4387_s23  ;;  %v7763_v47 = vrot.slane %v5037_v55, 1  ;;  %v875_v5 = vmul.f32 %v4823_v54, %v4595_v61 }
  0xf6   :  { %1193 = vrot.lane.b32.xlu1 %v1186_v11, %s4387_s23  ;;  %v1556_v20 = vsel %vm140_vm1, %v1554_v34, %v7763_v47  ;;  %v2164_v11 = vmul.f32 %v5039_v12, %v4500_v6  ;;  %v888_v39 = vrot.slane %v875_v5, 1  ;;  %v878_v34 = vmul.f32 %v4823_v54, %v4606_v7  ;;  %v5100_v5 = vpop.permute.xlu1 %1759 }
  0xf7   :  { %v5063_v22 = vpop.permute.xlu0 %1451  ;;  %v7873_v47 = vrot.slane %v5054_v27, 1  ;;  %7874 = vst [vmem:[#allocation43_spill] sm:$0xff] %v5100_v5  ;;  %v7878_v6 = vrot.slane %v4852_v1, 1 }
  0xf8   :  { %7870 = vst [vmem:[#allocation40_spill] sm:$0xff] %v5063_v22  ;;  %1559 = vrot.lane.b32.xlu0 %v1551_v46, %s4388_s15  ;;  %v2438_v46 = vmul.f32 %v4821_v51, %v4508_v9  ;;  %v2178_v24 = vrot.slane %v2164_v11, 1  ;;  %v274_v51 = vmul.f32 %v5083_v49, %v4519_v14  ;;  %v1499_v11 = vmul.f32 %v4855_v3, %v4595_v61 }
  0xf9   :  { %v2175_v22 = vsel %vm140_vm1, %v2173_v57, %v7873_v47  ;;  %v893_v47 = vrot.slane %v878_v34, 1  ;;  %v5121_v34 = vstv %s3980_s30  ;;  %s5837_s30 = sld [smem:[#allocation2 + $0x387]] }
  0xfa   :  { %2445 = vrot.lane.b32.xlu1 %v2436_v30, %s4388_s15  ;;  %v5115_v30 = vmul.f32 %v5083_v49, %v4508_v9 }
  0xfb   :  { %v5085_v0 = vpop.permute.xlu0 %2085  ;;  %v894_v9 = vsel %vm140_vm1, %v7878_v6, %v893_v47  ;;  %v5143_v47 = vld [vmem:[%s7735_s0 + $0x8] sm:$0xff] }
  0xfc   :  { %7872 = vst [vmem:[#allocation42_spill] sm:$0xff] %v5085_v0  ;;  %1563 = vrot.lane.b32.xlu0 %v1556_v20, %s4388_s15  ;;  %v7876_v20 = vrot.slane %v4836_v19, 1  ;;  %v286_v19 = vrot.slane %v274_v51, 2  ;;  %v291_v51 = vrot.slane %v277_v4, 2 }
  0xfe   :  { %2449 = vrot.lane.b32.xlu1 %v2438_v46, %s4388_s15  ;;  %v889_v57 = vsel %vm140_vm1, %v7876_v20, %v888_v39  ;;  %v7877_v46 = vrot.slane %v5078_v40, 1  ;;  %v7764_v39 = vrot.slane %v5098_v35, 2  ;;  %v1512_v20 = vrot.slane %v1499_v11, 1 }
  0xff   :  { %v5103_v54 = vpop.permute.xlu0 %2089  ;;  %v7880_v11 = vrot.slane %v4874_v52, 1 }
 0x100   :  { %7875 = vst [vmem:[#allocation44_spill] sm:$0xff] %v5103_v54  ;;  %2183 = vrot.lane.b32.xlu0 %v2175_v22, %s4387_s23  ;;  %v2180_v5 = vsel %vm140_vm1, %v2178_v24, %v7877_v46  ;;  %v1502_v54 = vmul.f32 %v4855_v3, %v4606_v7  ;;  %v5131_v24 = vpop.permute.xlu1 %1449  ;;  %v7765_v46 = vrot.slane %v5115_v30, 2  ;;  %v288_v1 = vsel %vm253_vm3, %v286_v19, %v7764_v39 }
 0x101   :  { %7879 = vst [vmem:[#allocation45_spill] sm:$0xff] %v5131_v24  ;;  %v5147_v3 = vmul.f32 %v5143_v47, %v5121_v34  ;;  %v1513_v4 = vsel %vm140_vm1, %v7880_v11, %v1512_v20  ;;  %v1207_v19 = vmul.f32 %v4894_v42, %v4595_v61  ;;  %v7883_v11 = vrot.slane %v4892_v25, 1 }
 0x102   :  { %897 = vrot.lane.b32.xlu1 %v889_v57, %s4388_s15  ;;  %v613_v57 = vmul.f32 %v5121_v34, %v4519_v14  ;;  %v1517_v6 = vrot.slane %v1502_v54, 1  ;;  %v293_v39 = vsel %vm253_vm3, %v291_v51, %v7765_v46  ;;  %v5172_v54 = vld [vmem:[%s7735_s0 + $0x20] sm:$0xff]  ;;  %v5178_v51 = vstv %s4018_s16  ;;  %s4038_s16 = sld [smem:[#allocation2 + $0x287]] }
 0x103   :  { %v5124_v22 = vpop.permute.xlu0 %183  ;;  %v5176_v20 = vmul.f32 %v5172_v54, %v5121_v34  ;;  %v1220_v24 = vrot.slane %v1207_v19, 1  ;;  %v1869_v48 = vmul.f32 %v5178_v51, %v4519_v14  ;;  %v7886_v42 = vrot.slane %v4912_v17, 1 }
 0x104   :  { %2187 = vrot.lane.b32.xlu0 %v2180_v5, %s4387_s23  ;;  %v625_v0 = vrot.slane %v613_v57, 2  ;;  %v5180_v57 = vpop.permute.xlu1 %1453  ;;  %v1518_v46 = vsel %vm140_vm1, %v7883_v11, %v1517_v6  ;;  %v1225_v14 = vrot.slane %v1210_v41, 1  ;;  %v1831_v11 = vmul.f32 %v4952_v15, %v4595_v61 }
 0x105   :  { %7881 = vst [vmem:[#allocation46_spill] sm:$0xff] %v5180_v57  ;;  %v5195_v57 = vmul.f32 %v5143_v47, %v5178_v51  ;;  %v7766_v6 = vrot.slane %v5176_v20, 2  ;;  %v5220_v41 = vmul.f32 %v5172_v54, %v5178_v51 }
 0x106   :  { %901 = vrot.lane.b32.xlu1 %v894_v9, %s4388_s15  ;;  %v5165_v9 = vld [vmem:[%s7735_s0 + $0x18] sm:$0xff] }
 0x107   :  { %v5150_v5 = vpop.permute.xlu0 %187  ;;  %v616_v52 = vmul.f32 %v5165_v9, %v5121_v34  ;;  %v1872_v17 = vmul.f32 %v5165_v9, %v5178_v51 }
 0x108   :  { %296 = vrot.lane.b32.xlu0 %v288_v1, %s4387_s23  ;;  %v5209_v32 = vpop.permute.xlu1 %2087 }
 0x109   :  { %v630_v25 = vrot.slane %v616_v52, 2  ;;  %7887 = vst [vmem:[#allocation49_spill] sm:$0xff] %v5209_v32  ;;  %v7767_v52 = vrot.slane %v5195_v57, 1  ;;  %v1886_v32 = vrot.slane %v1872_v17, 1 }
 0x10a   :  { %1521 = vrot.lane.b32.xlu1 %v1513_v4, %s4387_s23  ;;  %v7884_v4 = vrot.slane %v5147_v3, 2 }
 0x10b   :  { %v5183_v1 = vpop.permute.xlu0 %523 }
 0x10c   :  { %7882 = vst [vmem:[#allocation47_spill] sm:$0xff] %v5183_v1  ;;  %300 = vrot.lane.b32.xlu0 %v293_v39, %s4387_s23  ;;  %v627_v1 = vsel %vm253_vm3, %v625_v0, %v7884_v4  ;;  %v1221_v39 = vsel %vm140_vm1, %v7886_v42, %v1220_v24  ;;  %v1881_v0 = vrot.slane %v1869_v48, 1  ;;  %v5223_v24 = vstv %s4037_s22  ;;  %s4397_s22 = smov 72  }
 0x10d   :  { %v7889_v48 = vrot.slane %v4943_v10, 1  ;;  %v1844_v42 = vrot.slane %v1831_v11, 1 }
 0x10e   :  { %1525 = vrot.lane.b32.xlu1 %v1518_v46, %s4387_s23  ;;  %v632_v46 = vsel %vm253_vm3, %v630_v25, %v7766_v6  ;;  %v1834_v25 = vmul.f32 %v4952_v15, %v4606_v7  ;;  %v1883_v6 = vsel %vm140_vm1, %v1881_v0, %v7767_v52  ;;  %v5246_v15 = vmul.f32 %v5143_v47, %v5223_v24 }
 0x10f   :  { %v5202_v19 = vpop.permute.xlu0 %527  ;;  %v1226_v4 = vsel %vm140_vm1, %v7889_v48, %v1225_v14  ;;  %v5248_v14 = vpop.permute.xlu1 %2091  ;;  %v7892_v0 = vrot.slane %v4971_v8, 1  ;;  %v1539_v48 = vmul.f32 %v4999_v37, %v4595_v61  ;;  %v2496_v52 = vmul.f32 %v5165_v9, %v5223_v24 }
 0x110   :  { %7885 = vst [vmem:[#allocation48_spill] sm:$0xff] %v5202_v19  ;;  %635 = vrot.lane.b32.xlu0 %v627_v1, %s4387_s23  ;;  %7890 = vst [vmem:[#allocation51_spill] sm:$0xff] %v5248_v14  ;;  %v1849_v17 = vrot.slane %v1834_v25, 1  ;;  %v5269_v25 = vstv %s3990_s3  ;;  %s5631_s3 = sld [smem:[#allocation2 + $0x385]] }
 0x111   :  { %v1552_v19 = vrot.slane %v1539_v48, 1  ;;  %v1557_v48 = vrot.slane %v1542_v33, 1  ;;  %v5311_v33 = vstv %s4028_s26  ;;  %s4021_s26 = sld [smem:[#allocation2 + $0x405]] }
 0x112   :  { %1229 = vrot.lane.b32.xlu1 %v1221_v39, %s4388_s15  ;;  %v5263_v39 = vmul.f32 %v5172_v54, %v5223_v24 }
 0x113   :  { %v5225_v1 = vpop.permute.xlu0 %1779  ;;  %v5279_v2 = vpop.permute.xlu1 %185 }
 0x114   :  { %7888 = vst [vmem:[#allocation50_spill] sm:$0xff] %v5225_v1  ;;  %639 = vrot.lane.b32.xlu0 %v632_v46, %s4387_s23  ;;  %v5240_v1 = vld [vmem:[%s7735_s0] sm:$0xff]  ;;  %v1845_v46 = vsel %vm140_vm1, %v7892_v0, %v1844_v42  ;;  %v7768_v42 = vrot.slane %v5246_v15, 1  ;;  %v7895_v0 = vrot.slane %v4992_v62, 1  ;;  %7896 = vst [vmem:[#allocation54_spill] sm:$0xff] %v5279_v2 }
 0x115   :  { %v2493_v10 = vmul.f32 %v5240_v1, %v5223_v24 }
 0x116   :  { %1233 = vrot.lane.b32.xlu1 %v1226_v4, %s4388_s15  ;;  %v7893_v4 = vrot.slane %v5220_v41, 1 }
 0x117   :  { %v5251_v11 = vpop.permute.xlu0 %1783  ;;  %v2505_v8 = vrot.slane %v2493_v10, 1  ;;  %v7769_v10 = vrot.slane %v5263_v39, 1 }
 0x118   :  { %7891 = vst [vmem:[#allocation52_spill] sm:$0xff] %v5251_v11  ;;  %1891 = vrot.lane.b32.xlu0 %v1883_v6, %s4388_s15  ;;  %v1888_v14 = vsel %vm140_vm1, %v1886_v32, %v7893_v4  ;;  %v1850_v11 = vsel %vm140_vm1, %v7895_v0, %v1849_v17  ;;  %v2510_v32 = vrot.slane %v2496_v52, 1  ;;  %v5290_v17 = vmul.f32 %v5143_v47, %v5269_v25 }
 0x119   :  { %v2507_v62 = vsel %vm140_vm1, %v2505_v8, %v7768_v42  ;;  %v2163_v4 = vmul.f32 %v5039_v12, %v4595_v61  ;;  %v2201_v42 = vmul.f32 %v5240_v1, %v5311_v33 }
 0x11a   :  { %1853 = vrot.lane.b32.xlu1 %v1845_v46, %s4387_s23  ;;  %v945_v46 = vmul.f32 %v5240_v1, %v5269_v25  ;;  %v2512_v8 = vsel %vm140_vm1, %v2510_v32, %v7769_v10  ;;  %v7901_v32 = vrot.slane %v5037_v55, 1  ;;  %v2166_v10 = vmul.f32 %v5039_v12, %v4606_v7 }
 0x11b   :  { %v5272_v6 = vpop.permute.xlu0 %2417  ;;  %v7904_v12 = vrot.slane %v5054_v27, 1  ;;  %v2204_v27 = vmul.f32 %v5165_v9, %v5311_v33 }
 0x11c   :  { %7894 = vst [vmem:[#allocation53_spill] sm:$0xff] %v5272_v6  ;;  %1895 = vrot.lane.b32.xlu0 %v1888_v14, %s4388_s15  ;;  %v7898_v14 = vrot.slane %v5020_v26, 1  ;;  %v957_v0 = vrot.slane %v945_v46, 2  ;;  %v5309_v26 = vmul.f32 %v5172_v54, %v5269_v25  ;;  %v1558_v46 = vsel %vm140_vm1, %v7901_v32, %v1557_v48 }
 0x11d   :  { %v2181_v32 = vrot.slane %v2166_v10, 1  ;;  %v5353_v10 = vmul.f32 %v5172_v54, %v5311_v33 }
 0x11e   :  { %1857 = vrot.lane.b32.xlu1 %v1850_v11, %s4387_s23  ;;  %v1553_v52 = vsel %vm140_vm1, %v7898_v14, %v1552_v19  ;;  %v948_v11 = vmul.f32 %v5165_v9, %v5269_v25  ;;  %v5313_v19 = vpop.permute.xlu1 %189  ;;  %v2176_v14 = vrot.slane %v2163_v4, 1  ;;  %v7770_v48 = vrot.slane %v5309_v26, 2 }
 0x11f   :  { %v5293_v37 = vpop.permute.xlu0 %2421  ;;  %7899 = vst [vmem:[#allocation56_spill] sm:$0xff] %v5313_v19 }
 0x120   :  { %7897 = vst [vmem:[#allocation55_spill] sm:$0xff] %v5293_v37  ;;  %2515 = vrot.lane.b32.xlu0 %v2507_v62, %s4387_s23  ;;  %v5328_v37 = vmul.f32 %v5143_v47, %v5311_v33  ;;  %v962_v55 = vrot.slane %v948_v11, 2 }
 0x122   :  { %1561 = vrot.lane.b32.xlu1 %v1553_v52, %s4388_s15  ;;  %v7902_v52 = vrot.slane %v5290_v17, 2  ;;  %v5342_v19 = vpop.permute.xlu1 %525  ;;  %v7771_v11 = vrot.slane %v5328_v37, 1 }
 0x123   :  { %v5316_v62 = vpop.permute.xlu0 %855  ;;  %7905 = vst [vmem:[#allocation59_spill] sm:$0xff] %v5342_v19 }
 0x124   :  { %7900 = vst [vmem:[#allocation57_spill] sm:$0xff] %v5316_v62  ;;  %2519 = vrot.lane.b32.xlu0 %v2512_v8, %s4387_s23  ;;  %v959_v6 = vsel %vm253_vm3, %v957_v0, %v7902_v52  ;;  %v2177_v8 = vsel %vm140_vm1, %v7904_v12, %v2176_v14  ;;  %v276_v62 = vmul.f32 %v5083_v49, %v4595_v61  ;;  %v2213_v0 = vrot.slane %v2201_v42, 1 }
 0x125   :  { %v5356_v14 = vstv %s3971_s27  ;;  %v7907_v42 = vrot.slane %v5078_v40, 1  ;;  %s5783_s27 = sld [smem:[#allocation2]] }
 0x126   :  { %1565 = vrot.lane.b32.xlu1 %v1558_v46, %s4388_s15  ;;  %v964_v46 = vsel %vm253_vm3, %v962_v55, %v7770_v48  ;;  %v289_v12 = vrot.slane %v276_v62, 2  ;;  %v279_v55 = vmul.f32 %v5083_v49, %v4606_v7  ;;  %v2215_v48 = vsel %vm140_vm1, %v2213_v0, %v7771_v11  ;;  %v5376_v62 = vpop.permute.xlu1 %529 }
 0x127   :  { %v5335_v4 = vpop.permute.xlu0 %859  ;;  %v2182_v52 = vsel %vm140_vm1, %v7907_v42, %v2181_v32  ;;  %v5374_v40 = vmul.f32 %v5143_v47, %v5356_v14  ;;  %7908 = vst [vmem:[#allocation61_spill] sm:$0xff] %v5376_v62  ;;  %v7910_v32 = vrot.slane %v5098_v35, 2  ;;  %v317_v42 = vmul.f32 %v5165_v9, %v5356_v14 }
 0x128   :  { %7903 = vst [vmem:[#allocation58_spill] sm:$0xff] %v5335_v4  ;;  %967 = vrot.lane.b32.xlu0 %v959_v6, %s4387_s23  ;;  %v2218_v4 = vrot.slane %v2204_v27, 1  ;;  %v615_v27 = vmul.f32 %v5121_v34, %v4595_v61  ;;  %v5391_v11 = vmul.f32 %v5172_v54, %v5356_v14  ;;  %v618_v62 = vmul.f32 %v5121_v34, %v4606_v7 }
 0x129   :  { %v290_v0 = vsel %vm253_vm3, %v7910_v32, %v289_v12  ;;  %v7772_v12 = vrot.slane %v5374_v40, 2  ;;  %v7913_v34 = vrot.slane %v5147_v3, 2 }
 0x12a   :  { %2185 = vrot.lane.b32.xlu1 %v2177_v8, %s4387_s23  ;;  %v7774_v8 = vrot.slane %v5353_v10, 1  ;;  %v5407_v19 = vpop.permute.xlu1 %1781 }
 0x12b   :  { %v5358_v6 = vpop.permute.xlu0 %2111  ;;  %7912 = vst [vmem:[#allocation63_spill] sm:$0xff] %v5407_v19 }
 0x12c   :  { %7906 = vst [vmem:[#allocation60_spill] sm:$0xff] %v5358_v6  ;;  %971 = vrot.lane.b32.xlu0 %v964_v46, %s4387_s23  ;;  %v314_v6 = vmul.f32 %v5240_v1, %v5356_v14  ;;  %v294_v46 = vrot.slane %v279_v55, 2  ;;  %v5397_v55 = vstv %s3981_s28  ;;  %s5785_s28 = sld [smem:[#allocation2 + $0x1]] }
 0x12e   :  { %2189 = vrot.lane.b32.xlu1 %v2182_v52, %s4387_s23  ;;  %v2220_v52 = vsel %vm140_vm1, %v2218_v4, %v7774_v8  ;;  %v326_v35 = vrot.slane %v314_v6, 2  ;;  %v331_v4 = vrot.slane %v317_v42, 2  ;;  %v7773_v6 = vrot.slane %v5391_v11, 2  ;;  %v5457_v8 = vld [vmem:[%s7735_s0 + $0x28] sm:$0x3] }
 0x12f   :  { %v5379_v49 = vpop.permute.xlu0 %2115  ;;  %v633_v42 = vrot.slane %v618_v62, 2  ;;  %v656_v62 = vmul.f32 %v5165_v9, %v5397_v55  ;;  %v1874_v3 = vmul.f32 %v5457_v8, %v5178_v51 }
 0x130   :  { %7909 = vst [vmem:[#allocation62_spill] sm:$0xff] %v5379_v49  ;;  %2223 = vrot.lane.b32.xlu0 %v2215_v48, %s4388_s15  ;;  %v7911_v48 = vrot.slane %v5115_v30, 2  ;;  %v628_v49 = vrot.slane %v615_v27, 2  ;;  %v328_v30 = vsel %vm253_vm3, %v326_v35, %v7772_v12  ;;  %v5446_v12 = vpop.permute.xlu1 %1785 }
 0x131   :  { %7914 = vst [vmem:[#allocation64_spill] sm:$0xff] %v5446_v12 }
 0x132   :  { %298 = vrot.lane.b32.xlu1 %v290_v0, %s4387_s23  ;;  %v295_v32 = vsel %vm253_vm3, %v7911_v48, %v294_v46  ;;  %v653_v0 = vmul.f32 %v5240_v1, %v5397_v55  ;;  %v5418_v46 = vmul.f32 %v5143_v47, %v5397_v55  ;;  %v629_v27 = vsel %vm253_vm3, %v7913_v34, %v628_v49 }
 0x133   :  { %v5400_v61 = vpop.permute.xlu0 %223  ;;  %v333_v48 = vsel %vm253_vm3, %v331_v4, %v7773_v6  ;;  %v5442_v49 = vmul.f32 %v5172_v54, %v5397_v55  ;;  %v5444_v34 = vstv %s4000_s5  ;;  %v7916_v4 = vrot.slane %v5176_v20, 2  ;;  %s5792_s5 = sld [smem:[#allocation2 + $0x2]] }
 0x134   :  { %2227 = vrot.lane.b32.xlu0 %v2220_v52, %s4388_s15  ;;  %v5429_v52 = vld [vmem:[%s7735_s0 + $0x10] sm:$0x3]  ;;  %v5466_v12 = vmul.f32 %v5143_v47, %v5444_v34  ;;  %v7917_v20 = vrot.slane %v5418_v46, 2  ;;  %v5480_v38 = vpop.permute.xlu1 %2419 }
 0x135   :  { %v1871_v35 = vmul.f32 %v5429_v52, %v5178_v51  ;;  %v7919_v51 = vrot.slane %v5195_v57, 1  ;;  %v2495_v2 = vmul.f32 %v5429_v52, %v5223_v24  ;;  %7920 = vst [vmem:[#allocation67_spill] sm:$0xff] %v5480_v38  ;;  %v1280_v57 = vmul.f32 %v5165_v9, %v5444_v34 }
 0x136   :  { %302 = vrot.lane.b32.xlu1 %v295_v32, %s4387_s23  ;;  %v665_v32 = vrot.slane %v653_v0, 2  ;;  %v634_v0 = vsel %vm253_vm3, %v7916_v4, %v633_v42  ;;  %v7775_v4 = vrot.slane %v5442_v49, 2  ;;  %v655_v23 = vmul.f32 %v5429_v52, %v5397_v55 }
 0x137   :  { %v5421_v7 = vpop.permute.xlu0 %227  ;;  %v1884_v6 = vrot.slane %v1871_v35, 1  ;;  %v670_v35 = vrot.slane %v656_v62, 2  ;;  %v7776_v62 = vrot.slane %v5466_v12, 2  ;;  %v1294_v38 = vrot.slane %v1280_v57, 2 }
 0x138   :  { %336 = vrot.lane.b32.xlu0 %v328_v30, %s4388_s15  ;;  %v667_v42 = vsel %vm253_vm3, %v665_v32, %v7917_v20 }
 0x13a   :  { %637 = vrot.lane.b32.xlu1 %v629_v27, %s4387_s23  ;;  %v1277_v27 = vmul.f32 %v5240_v1, %v5444_v34 }
 0x13b   :  { %v5449_v30 = vpop.permute.xlu0 %563 }
 0x13c   :  { %7915 = vst [vmem:[#allocation65_spill] sm:$0xff] %v5449_v30  ;;  %340 = vrot.lane.b32.xlu0 %v333_v48, %s4388_s15  ;;  %v1885_v48 = vsel %vm140_vm1, %v7919_v51, %v1884_v6  ;;  %v1889_v30 = vrot.slane %v1874_v3, 1  ;;  %v1289_v32 = vrot.slane %v1277_v27, 2  ;;  %v5491_v6 = vmul.f32 %v5172_v54, %v5444_v34 }
 0x13d   :  { %v5494_v3 = vstv %s4038_s16  ;;  %v7922_v27 = vrot.slane %v5220_v41, 1  ;;  %v2508_v51 = vrot.slane %v2495_v2, 1  ;;  %v5514_v2 = vpop.permute.xlu1 %2423  ;;  %s5841_s16 = sld [smem:[#allocation2 + $0x3]] }
 0x13e   :  { %641 = vrot.lane.b32.xlu1 %v634_v0, %s4387_s23  ;;  %v672_v0 = vsel %vm253_vm3, %v670_v35, %v7775_v4  ;;  %v2498_v35 = vmul.f32 %v5457_v8, %v5223_v24  ;;  %v1291_v4 = vsel %vm253_vm3, %v1289_v32, %v7776_v62  ;;  %v5512_v41 = vmul.f32 %v5143_v47, %v5494_v3 }
 0x13f   :  { %v5473_v19 = vpop.permute.xlu0 %567  ;;  %7923 = vst [vmem:[#allocation69_spill] sm:$0xff] %v5514_v2  ;;  %v947_v24 = vmul.f32 %v5429_v52, %v5269_v25  ;;  %v7925_v32 = vrot.slane %v5246_v15, 1  ;;  %v5529_v62 = vmul.f32 %v5172_v54, %v5494_v3  ;;  %v5535_v15 = vstv %s3991_s18  ;;  %s5977_s18 = sld [smem:[#allocation2 + $0x4]] }
 0x140   :  { %7918 = vst [vmem:[#allocation66_spill] sm:$0xff] %v5473_v19  ;;  %675 = vrot.lane.b32.xlu0 %v667_v42, %s4388_s15  ;;  %v1890_v42 = vsel %vm140_vm1, %v7922_v27, %v1889_v30  ;;  %v2513_v57 = vrot.slane %v2498_v35, 1  ;;  %v2536_v27 = vmul.f32 %v5165_v9, %v5494_v3  ;;  %v7927_v19 = vrot.slane %v5263_v39, 1 }
 0x142   :  { %1893 = vrot.lane.b32.xlu1 %v1885_v48, %s4388_s15  ;;  %v7777_v48 = vrot.slane %v5491_v6, 2  ;;  %v2514_v31 = vsel %vm140_vm1, %v7927_v19, %v2513_v57  ;;  %v7928_v19 = vrot.slane %v5290_v17, 2 }
 0x143   :  { %v5496_v20 = vpop.permute.xlu0 %1187 }
 0x144   :  { %7921 = vst [vmem:[#allocation68_spill] sm:$0xff] %v5496_v20  ;;  %679 = vrot.lane.b32.xlu0 %v672_v0, %s4388_s15  ;;  %v2533_v20 = vmul.f32 %v5240_v1, %v5494_v3  ;;  %v2509_v0 = vsel %vm140_vm1, %v7925_v32, %v2508_v51  ;;  %v960_v51 = vrot.slane %v947_v24, 2  ;;  %v5553_v24 = vmul.f32 %v5143_v47, %v5535_v15 }
 0x146   :  { %1897 = vrot.lane.b32.xlu1 %v1890_v42, %s4388_s15  ;;  %v1296_v42 = vsel %vm253_vm3, %v1294_v38, %v7777_v48  ;;  %v2545_v2 = vrot.slane %v2533_v20, 1  ;;  %v950_v38 = vmul.f32 %v5457_v8, %v5269_v25  ;;  %v2550_v20 = vrot.slane %v2536_v27, 1 }
 0x147   :  { %v5519_v30 = vpop.permute.xlu0 %1191  ;;  %v961_v57 = vsel %vm253_vm3, %v7928_v19, %v960_v51  ;;  %v7779_v27 = vlaneseq  ;;  %v7780_v17 = vrot.slane %v5553_v24, 2  ;;  %v988_v51 = vmul.f32 %v5165_v9, %v5535_v15 }
 0x148   :  { %7924 = vst [vmem:[#allocation70_spill] sm:$0xff] %v5519_v30  ;;  %1299 = vrot.lane.b32.xlu0 %v1291_v4, %s4387_s23  ;;  %v7778_v30 = vrot.slane %v5512_v41, 1 }
 0x14a   :  { %2517 = vrot.lane.b32.xlu1 %v2509_v0, %s4387_s23  ;;  %v2819_v4 = vpop.xlane.xlu1 %2818  ;;  %v985_v0 = vmul.f32 %v5240_v1, %v5535_v15  ;;  %v2547_v39 = vsel %vm140_vm1, %v2545_v2, %v7778_v30  ;;  %v7930_v2 = vrot.slane %v5529_v62, 1 }
 0x14b   :  { %v2823_v35 = vmul.f32 0.03125, %v2819_v4  ;;  %v5540_v32 = vpop.permute.xlu0 %2443 }
 0x14c   :  { %7926 = vst [vmem:[#allocation71_spill] sm:$0xff] %v5540_v32  ;;  %1303 = vrot.lane.b32.xlu0 %v1296_v42, %s4387_s23  ;;  %v965_v32 = vrot.slane %v950_v38, 2  ;;  %v997_v30 = vrot.slane %v985_v0, 2  ;;  %v5578_v38 = vstv %s5537_s19  ;;  %v7934_v0 = vrot.slane %v5309_v26, 2  ;;  %s5983_s19 = sld [smem:[#allocation2 + $0x182]] }
 0x14d   :  { %v2825_v4 = vadd.f32 1e-12, %v2823_v35  ;;  %v2203_v35 = vmul.f32 %v5429_v52, %v5311_v33  ;;  %v1002_v26 = vrot.slane %v988_v51, 2  ;;  %v60_v51 = vld [vmem:[%s7747_s12] sm:$0xff]  ;;  %v1614_v44 = vmul.f32 %v5457_v8, %v5578_v38 }
 0x14e   :  { %2521 = vrot.lane.b32.xlu1 %v2514_v31, %s4387_s23  ;;  %v2822_v25 = vpop.xlane.xlu1 %2821  ;;  %v2552_v31 = vsel %vm140_vm1, %v2550_v20, %v7930_v2  ;;  %v966_v19 = vsel %vm253_vm3, %v7934_v0, %v965_v32  ;;  %v2206_v2 = vmul.f32 %v5457_v8, %v5311_v33  ;;  %v7937_v0 = vrot.slane %v5328_v37, 1 }
 0x14f   :  { %4300 = vrsqrt.f32 %v2825_v4  ;;  %v2824_v42 = vmul.f32 0.03125, %v2822_v25  ;;  %v5562_v48 = vpop.permute.xlu0 %2447  ;;  %v5575_v4 = vmul.f32 %v5172_v54, %v5535_v15  ;;  %v5584_v25 = vshrl.u32 %v7779_v27, 7 }
 0x150   :  { %7929 = vst [vmem:[#allocation72_spill] sm:$0xff] %v5562_v48  ;;  %2555 = vrot.lane.b32.xlu0 %v2547_v39, %s4388_s15  ;;  %v5600_v27 = vmul.f32 %v5143_v47, %v5578_v38 }
 0x151   :  { %v2826_v28 = vadd.f32 1e-12, %v2824_v42  ;;  %7932 = vst [vmem:[#allocation74_spill] sm:$0xff] %v5584_v25  ;;  %v2216_v42 = vrot.slane %v2203_v35, 1  ;;  %v7781_v32 = vrot.slane %v5575_v4, 2 }
 0x152   :  { %969 = vrot.lane.b32.xlu1 %v961_v57, %s4387_s23  ;;  %v5581_v39 = vpop.permute.xlu1 %857  ;;  %v1609_v57 = vmul.f32 %v5240_v1, %v5578_v38 }
 0x153   :  { %7931 = vst [vmem:[#allocation73_spill] sm:$0xff] %v5581_v39  ;;  %4302 = vrsqrt.f32 %v2826_v28  ;;  %v5588_v20 = vpop.permute.xlu0 %895  ;;  %v999_v28 = vsel %vm253_vm3, %v997_v30, %v7780_v17  ;;  %v2217_v48 = vsel %vm140_vm1, %v7937_v0, %v2216_v42  ;;  %v2221_v39 = vrot.slane %v2206_v2, 1 }
 0x154   :  { %7933 = vst [vmem:[#allocation75_spill] sm:$0xff] %v5588_v20  ;;  %2559 = vrot.lane.b32.xlu0 %v2552_v31, %s4388_s15  ;;  %v316_v30 = vmul.f32 %v5429_v52, %v5356_v14  ;;  %v1004_v37 = vsel %vm253_vm3, %v1002_v26, %v7781_v32  ;;  %v1612_v42 = vmul.f32 %v5165_v9, %v5578_v38  ;;  %v7939_v0 = vsub.s32 1, %v5584_v25 }
 0x155   :  { %v5629_v2 = vmul.f32 %v5172_v54, %v5578_v38  ;;  %v5641_v32 = vstv %s5586_s20  ;;  %s6024_s20 = sld [smem:[#allocation2 + $0x407]] }
 0x156   :  { %973 = vrot.lane.b32.xlu1 %v966_v19, %s4387_s23  ;;  %v5607_v35 = vpop.permute.xlu1 %861  ;;  %v1621_v19 = vrot.slane %v1609_v57, 2  ;;  %v2834_v17 = vrot.slane %v60_v51, %v7939_v0  ;;  %v329_v60 = vrot.slane %v316_v30, 2  ;;  %v1626_v26 = vrot.slane %v1612_v42, 2 }
 0x157   :  { %7935 = vst [vmem:[#allocation76_spill] sm:$0xff] %v5607_v35  ;;  %v5610_v31 = vpop.permute.xlu0 %899  ;;  %v7944_v30 = vsub.s32 2, %v5584_v25  ;;  %v7946_v42 = vrot.slane %v5374_v40, 2  ;;  %v2535_v25 = vmul.f32 %v5429_v52, %v5494_v3 }
 0x158   :  { %7936 = vst [vmem:[#allocation77_spill] sm:$0xff] %v5610_v31  ;;  %1007 = vrot.lane.b32.xlu0 %v999_v28, %s4388_s15  ;;  %v7941_v31 = vrot.slane %v5353_v10, 1  ;;  %v5659_v10 = vmul.f32 %v5143_v47, %v5641_v32 }
 0x159   :  { %v4301_v33 = vpop.eup %4300 }
 0x15a   :  { %2225 = vrot.lane.b32.xlu1 %v2217_v48, %s4388_s15  ;;  %v5634_v28 = vpop.permute.xlu1 %2113  ;;  %v2829_v57 = vmul.f32 %v4301_v33, %v4733_v36  ;;  %v2222_v20 = vsel %vm140_vm1, %v7941_v31, %v2221_v39  ;;  %v319_v48 = vmul.f32 %v5457_v8, %v5356_v14  ;;  %v7942_v36 = vrot.slane %v5600_v27, 2 }
 0x15b   :  { %7938 = vst [vmem:[#allocation78_spill] sm:$0xff] %v5634_v28  ;;  %v5643_v35 = vpop.permute.xlu0 %1519 }
 0x15c   :  { %7940 = vst [vmem:[#allocation79_spill] sm:$0xff] %v5643_v35  ;;  %1011 = vrot.lane.b32.xlu0 %v1004_v37, %s4388_s15  ;;  %v1623_v33 = vsel %vm253_vm3, %v1621_v19, %v7942_v36  ;;  %v1317_v35 = vmul.f32 %v5240_v1, %v5641_v32  ;;  %v2835_v31 = vmul.f32 %v2834_v17, %v2829_v57  ;;  %v334_v28 = vrot.slane %v319_v48, 2 }
 0x15d   :  { %v4303_v0 = vpop.eup %4302  ;;  %v2840_v19 = vrot.slane %v60_v51, %v7944_v30  ;;  %v330_v36 = vsel %vm253_vm3, %v7946_v42, %v329_v60  ;;  %v5679_v57 = vmul.f32 %v5172_v54, %v5641_v32  ;;  %v7947_v51 = vrot.slane %v5629_v2, 2 }
 0x15e   :  { %2229 = vrot.lane.b32.xlu1 %v2222_v20, %s4388_s15  ;;  %v5662_v14 = vpop.permute.xlu1 %2117  ;;  %v2830_v39 = vmul.f32 %v4303_v0, %v4749_v43  ;;  %v1320_v43 = vmul.f32 %v5165_v9, %v5641_v32  ;;  %v1329_v0 = vrot.slane %v1317_v35, 2  ;;  %v5686_v48 = vstv %s5631_s3 }
 0x15f   :  { %7943 = vst [vmem:[#allocation80_spill] sm:$0xff] %v5662_v14  ;;  %v5667_v37 = vpop.permute.xlu0 %1523  ;;  %v1628_v40 = vsel %vm253_vm3, %v1626_v26, %v7947_v51  ;;  %v7952_v42 = vrot.slane %v5391_v11, 2  ;;  %v668_v35 = vrot.slane %v655_v23, 2  ;;  %v658_v51 = vmul.f32 %v5457_v8, %v5397_v55 }
 0x160   :  { %7945 = vst [vmem:[#allocation81_spill] sm:$0xff] %v5667_v37  ;;  %1631 = vrot.lane.b32.xlu0 %v1623_v33, %s4387_s23  ;;  %v2836_v20 = vmul.f32 %v2834_v17, %v2830_v39  ;;  %v5691_v33 = vadd.f32 %v2840_v19, %v2835_v31  ;;  %v1334_v60 = vrot.slane %v1320_v43, 2  ;;  %v7782_v31 = vrot.slane %v5679_v57, 2 }
 0x161   :  { %v335_v26 = vsel %vm253_vm3, %v7952_v42, %v334_v28  ;;  %v5713_v23 = vmul.f32 %v5143_v47, %v5686_v48  ;;  %v7956_v43 = vrot.slane %v5418_v46, 2  ;;  %v673_v42 = vrot.slane %v658_v51, 2 }
 0x162   :  { %338 = vrot.lane.b32.xlu1 %v330_v36, %s4388_s15  ;;  %v5689_v17 = vpop.permute.xlu1 %225  ;;  %7949 = vst [vmem:[#allocation83_spill] sm:$0xff] %v5691_v33  ;;  %v5693_v39 = vadd.f32 %v2840_v19, %v2836_v20  ;;  %v1941_v19 = vmul.f32 %v5240_v1, %v5686_v48  ;;  %v7953_v20 = vrot.slane %v5659_v10, 2  ;;  %v1944_v46 = vmul.f32 %v5165_v9, %v5686_v48 }
 0x163   :  { %7948 = vst [vmem:[#allocation82_spill] sm:$0xff] %v5689_v17  ;;  %v5695_v30 = vpop.permute.xlu0 %1227  ;;  %v5739_v51 = vstv %s4011_s24 }
 0x164   :  { %7950 = vst [vmem:[#allocation84_spill] sm:$0xff] %v5693_v39  ;;  %7951 = vst [vmem:[#allocation85_spill] sm:$0xff] %v5695_v30  ;;  %1635 = vrot.lane.b32.xlu0 %v1628_v40, %s4387_s23  ;;  %v2843_v36 = vpack.c.bf16 %v5693_v39, %v5691_v33  ;;  %v1331_v11 = vsel %vm253_vm3, %v1329_v0, %v7953_v20  ;;  %v669_v40 = vsel %vm253_vm3, %v7956_v43, %v668_v35 }
 0x165   :  { %v1279_v0 = vmul.f32 %v5429_v52, %v5444_v34  ;;  %v5737_v35 = vmul.f32 %v5172_v54, %v5686_v48  ;;  %v1282_v20 = vmul.f32 %v5457_v8, %v5444_v34  ;;  %v1649_v39 = vmul.f32 %v5240_v1, %v5739_v51 }
 0x166   :  { %342 = vrot.lane.b32.xlu1 %v335_v26, %s4388_s15  ;;  %v5716_v55 = vpop.permute.xlu1 %229  ;;  %4134 = vmatmul.mubr.msk.bf16.vlgmr.msra.gmra.mrb[0].mxu1 %vm2803_vm0, %v2843_v36  ;;  %v1336_v26 = vsel %vm253_vm3, %v1334_v60, %v7782_v31  ;;  %v1953_v36 = vrot.slane %v1941_v19, 2  ;;  %v7959_v60 = vrot.slane %v5442_v49, 2  ;;  %v7960_v33 = vrot.slane %v5713_v23, 2 }
 0x167   :  { %7954 = vst [vmem:[#allocation86_spill] sm:$0xff] %v5716_v55  ;;  %v5719_v28 = vpop.permute.xlu0 %1231  ;;  %4145 = vmatprep.mubr.msk.bf16.mxu1 %vm4390_vm2, %v7854_v58  ;;  %v1292_v31 = vrot.slane %v1279_v0, 2  ;;  %v1958_v49 = vrot.slane %v1944_v46, 2  ;;  %v1297_v14 = vrot.slane %v1282_v20, 2  ;;  %v7966_v20 = vrot.slane %v5491_v6, 2 }
 0x168   :  { %7955 = vst [vmem:[#allocation87_spill] sm:$0xff] %v5719_v28  ;;  %1339 = vrot.lane.b32.xlu0 %v1331_v11, %s4388_s15  ;;  %v674_v19 = vsel %vm253_vm3, %v7959_v60, %v673_v42  ;;  %v1955_v58 = vsel %vm253_vm3, %v1953_v36, %v7960_v33  ;;  %v7788_v42 = vrot.slane %v5737_v35, 2  ;;  %v1661_v33 = vrot.slane %v1649_v39, 2 }
 0x169   :  { %v5790_v39 = vstv %s4030_s25  ;;  %v7981_v30 = vrot.slane %v5553_v24, 2  ;;  %v1611_v55 = vmul.f32 %v5429_v52, %v5578_v38  ;;  %s6504_s25 = sld [smem:[#allocation2 + $0x301]] }
 0x16a   :  { %677 = vrot.lane.b32.xlu1 %v669_v40, %s4388_s15  ;;  %v5742_v43 = vpop.permute.xlu1 %565  ;;  %v5756_v40 = vmul.f32 %v5143_v47, %v5739_v51  ;;  %v1960_v46 = vsel %vm253_vm3, %v1958_v49, %v7788_v42  ;;  %v1298_v49 = vsel %vm253_vm3, %v7966_v20, %v1297_v14  ;;  %v2538_v42 = vmul.f32 %v5457_v8, %v5494_v3 }
 0x16b   :  { %7957 = vst [vmem:[#allocation88_spill] sm:$0xff] %v5742_v43  ;;  %v5744_v11 = vpop.permute.xlu0 %1851  ;;  %v5810_v6 = vmul.f32 %v5143_v47, %v5790_v39  ;;  %v7969_v14 = vrot.slane %v5512_v41, 1  ;;  %v2276_v20 = vmul.f32 %v5165_v9, %v5790_v39 }
 0x16c   :  { %7958 = vst [vmem:[#allocation89_spill] sm:$0xff] %v5744_v11  ;;  %1343 = vrot.lane.b32.xlu0 %v1336_v26, %s4388_s15  ;;  %v7963_v26 = vrot.slane %v5466_v12, 2  ;;  %v7789_v36 = vrot.slane %v5756_v40, 2  ;;  %v5781_v12 = vmul.f32 %v5172_v54, %v5739_v51  ;;  %v2273_v11 = vmul.f32 %v5240_v1, %v5790_v39 }
 0x16e   :  { %681 = vrot.lane.b32.xlu1 %v674_v19, %s4388_s15  ;;  %v5763_v0 = vpop.permute.xlu1 %569  ;;  %v1293_v60 = vsel %vm253_vm3, %v7963_v26, %v1292_v31  ;;  %v1652_v19 = vmul.f32 %v5165_v9, %v5739_v51  ;;  %v2548_v26 = vrot.slane %v2535_v25, 1 }
 0x16f   :  { %7961 = vst [vmem:[#allocation90_spill] sm:$0xff] %v5763_v0  ;;  %v5765_v34 = vpop.permute.xlu0 %1855 }
 0x170   :  { %7962 = vst [vmem:[#allocation91_spill] sm:$0xff] %v5765_v34  ;;  %1963 = vrot.lane.b32.xlu0 %v1955_v58, %s4387_s23  ;;  %v7790_v34 = vrot.slane %v5781_v12, 2 }
 0x172   :  { %1301 = vrot.lane.b32.xlu1 %v1293_v60, %s4387_s23  ;;  %v5788_v58 = vpop.permute.xlu1 %1189  ;;  %v1663_v60 = vsel %vm253_vm3, %v1661_v33, %v7789_v36  ;;  %v2549_v33 = vsel %vm140_vm1, %v7969_v14, %v2548_v26  ;;  %v2285_v36 = vrot.slane %v2273_v11, 2  ;;  %v69_v14 = vstv %s5783_s27  ;;  %s6173_s27 = sld [smem:[#allocation2 + $0x5]] }
 0x173   :  { %7964 = vst [vmem:[#allocation92_spill] sm:$0xff] %v5788_v58  ;;  %v5794_v31 = vpop.permute.xlu0 %1559  ;;  %v1666_v58 = vrot.slane %v1652_v19, 2  ;;  %v987_v19 = vmul.f32 %v5429_v52, %v5535_v15  ;;  %v990_v26 = vmul.f32 %v5457_v8, %v5535_v15 }
 0x174   :  { %7965 = vst [vmem:[#allocation93_spill] sm:$0xff] %v5794_v31  ;;  %1967 = vrot.lane.b32.xlu0 %v1960_v46, %s4387_s23  ;;  %v2553_v46 = vrot.slane %v2538_v42, 1  ;;  %v5835_v42 = vstv %s4021_s26  ;;  %v2290_v31 = vrot.slane %v2276_v20, 2  ;;  %v5874_v20 = vmul.f32 %v5172_v54, %v69_v14  ;;  %s6142_s26 = sld [smem:[#allocation2 + $0x184]] }
 0x175   :  { %v1668_v41 = vsel %vm253_vm3, %v1666_v58, %v7790_v34  ;;  %v7972_v58 = vrot.slane %v5529_v62, 1  ;;  %v1000_v34 = vrot.slane %v987_v19, 2  ;;  %v5862_v62 = vmul.f32 %v5165_v9, %v69_v14 }
 0x176   :  { %1305 = vrot.lane.b32.xlu1 %v1298_v49, %s4387_s23  ;;  %v5813_v3 = vpop.permute.xlu1 %1193  ;;  %v5829_v49 = vmul.f32 %v5172_v54, %v5790_v39  ;;  %v5871_v19 = vmul.f32 %v5143_v47, %v5835_v42  ;;  %7975 = vst [vmem:[#allocation99_spill] sm:$0xff] %v5874_v20  ;;  %v1005_v43 = vrot.slane %v990_v26, 2  ;;  %v5916_v26 = vstv %s5837_s30  ;;  %s7000_s30 = sld [smem:[#allocation2 + $0x483]] }
 0x177   :  { %7967 = vst [vmem:[#allocation94_spill] sm:$0xff] %v5813_v3  ;;  %v5817_v25 = vpop.permute.xlu0 %1563  ;;  %v2554_v11 = vsel %vm140_vm1, %v7972_v58, %v2553_v46  ;;  %v7974_v46 = vrot.slane %v5810_v6, 2  ;;  %v1001_v0 = vsel %vm253_vm3, %v7981_v30, %v1000_v34  ;;  %v1984_v30 = vmul.f32 %v5165_v9, %v5835_v42 }
 0x178   :  { %7968 = vst [vmem:[#allocation95_spill] sm:$0xff] %v5817_v25  ;;  %1671 = vrot.lane.b32.xlu0 %v1663_v60, %s4388_s15  ;;  %v410_v60 = vstv %s5785_s28  ;;  %v742_v25 = vstv %s5792_s5  ;;  %v5913_v34 = vmul.f32 %v5172_v54, %v5835_v42  ;;  %v7989_v38 = vrot.slane %v5871_v19, 2  ;;  %s6886_s28 = sld [smem:[#allocation2 + $0x481]]  ;;  %s6935_s5 = sld [smem:[#allocation2 + $0x482]] }
 0x179   :  { %v2287_v15 = vsel %vm253_vm3, %v2285_v36, %v7974_v46  ;;  %v5880_v58 = vmul.f32 %v5172_v54, %v410_v60  ;;  %v5883_v28 = vmul.f32 %v5143_v47, %v742_v25  ;;  %v5889_v46 = vstv %s5815_s29  ;;  %s6964_s29 = sld [smem:[#allocation2 + $0x305]] }
 0x17a   :  { %2557 = vrot.lane.b32.xlu1 %v2549_v33, %s4388_s15  ;;  %v5844_v3 = vpop.permute.xlu1 %2445  ;;  %v1981_v33 = vmul.f32 %v5240_v1, %v5835_v42  ;;  %v5899_v17 = vmul.f32 %v5172_v54, %v742_v25  ;;  %v130_v24 = vmul.f32 %v5429_v52, %v5889_v46  ;;  %v5946_v13 = vmul.f32 %v5240_v1, %v742_v25 }
 0x17b   :  { %7970 = vst [vmem:[#allocation96_spill] sm:$0xff] %v5844_v3  ;;  %v5847_v37 = vpop.permute.xlu0 %2183  ;;  %v5859_v3 = vmul.f32 %v5143_v47, %v69_v14  ;;  %7977 = vst [vmem:[#allocation101_spill] sm:$0xff] %v5880_v58  ;;  %v133_v63 = vmul.f32 %v5457_v8, %v5889_v46  ;;  %v131_v45 = vmul.f32 %v5165_v9, %v5889_v46 }
 0x17c   :  { %7971 = vst [vmem:[#allocation97_spill] sm:$0xff] %v5847_v37  ;;  %1675 = vrot.lane.b32.xlu0 %v1668_v41, %s4388_s15  ;;  %v5877_v41 = vmul.f32 %v5143_v47, %v410_v60  ;;  %7978 = vst [vmem:[#allocation102_spill] sm:$0xff] %v5883_v28  ;;  %v1993_v21 = vrot.slane %v1981_v33, 2  ;;  %v5929_v33 = vmul.f32 %v5143_v47, %v5889_v46 }
 0x17d   :  { %7973 = vst [vmem:[#allocation98_spill] sm:$0xff] %v5859_v3  ;;  %7982 = vst [vmem:[#allocation105_spill] sm:$0xff] %v5899_v17  ;;  %v1624_v17 = vrot.slane %v1611_v55, 2  ;;  %v5960_v55 = vstv %s5864_s1  ;;  %v8030_v3 = vrot.slane %v5737_v35, 2  ;;  %s6275_s1 = sld [smem:[#allocation2 + $0x6]] }
 0x17e   :  { %7976 = vst [vmem:[#allocation100_spill] sm:$0xff] %v5877_v41  ;;  %2561 = vrot.lane.b32.xlu1 %v2554_v11, %s4388_s15  ;;  %v5886_v36 = vpop.permute.xlu1 %2449  ;;  %v5902_v11 = vmul.f32 %v5240_v1, %v69_v14  ;;  %v5919_v14 = vmul.f32 %v5240_v1, %v410_v60  ;;  %7988 = vst [vmem:[#allocation109_spill] sm:$0xff] %v5946_v13  ;;  %v471_v58 = vmul.f32 %v5429_v52, %v5960_v55 }
 0x17f   :  { %7979 = vst [vmem:[#allocation103_spill] sm:$0xff] %v5886_v36  ;;  %v5891_v37 = vpop.permute.xlu0 %2187  ;;  %v7983_v36 = vrot.slane %v5829_v49, 2  ;;  %v8003_v41 = vrot.slane %v5629_v2, 2 }
 0x180   :  { %7980 = vst [vmem:[#allocation104_spill] sm:$0xff] %v5891_v37  ;;  %2295 = vrot.lane.b32.xlu0 %v2287_v15, %s4387_s23  ;;  %7984 = vst [vmem:[#allocation106_spill] sm:$0xff] %v5919_v14  ;;  %v5922_v15 = vmul.f32 %v5165_v9, %v410_v60  ;;  %v7987_v60 = vrot.slane %v5575_v4, 2  ;;  %v5957_v4 = vmul.f32 %v5143_v47, %v5916_v26 }
 0x181   :  { %v2292_v37 = vsel %vm253_vm3, %v2290_v31, %v7983_v36  ;;  %v5925_v31 = vstv %s5841_s16  ;;  %s6214_s16 = sld [smem:[#allocation2 + $0x300]] }
 0x182   :  { %7985 = vst [vmem:[#allocation107_spill] sm:$0xff] %v5922_v15  ;;  %1009 = vrot.lane.b32.xlu1 %v1001_v0, %s4388_s15  ;;  %v5932_v36 = vpop.permute.xlu1 %897  ;;  %v1006_v15 = vsel %vm253_vm3, %v7987_v60, %v1005_v43  ;;  %v5950_v0 = vmul.f32 %v5172_v54, %v5889_v46  ;;  %v1995_v43 = vsel %vm253_vm3, %v1993_v21, %v7989_v38  ;;  %v1998_v60 = vrot.slane %v1984_v30, 2 }
 0x183   :  { %7986 = vst [vmem:[#allocation108_spill] sm:$0xff] %v5932_v36  ;;  %v5938_v14 = vpop.permute.xlu0 %296  ;;  %v2605_v36 = vmul.f32 %v5240_v1, %v5916_v26  ;;  %v5968_v28 = vmul.f32 %v5143_v47, %v5925_v31  ;;  %v5975_v29 = vmul.f32 %v5172_v54, %v5925_v31  ;;  %v144_v30 = vrot.slane %v130_v24, 1 }
 0x184   :  { %2299 = vrot.lane.b32.xlu0 %v2292_v37, %s4387_s23  ;;  %v5971_v37 = vmul.f32 %v5165_v9, %v742_v25  ;;  %v7995_v25 = vrot.slane %v5600_v27, 2  ;;  %v147_v27 = vrot.slane %v5950_v0, 1  ;;  %v474_v0 = vmul.f32 %v5457_v8, %v5960_v55 }
 0x185   :  { %7990 = vst [vmem:[#allocation110_spill] sm:$0xff] %v5968_v28  ;;  %7992 = vst [vmem:[#allocation112_spill] sm:$0xff] %v5975_v29  ;;  %v1319_v29 = vmul.f32 %v5429_v52, %v5641_v32  ;;  %v2617_v24 = vrot.slane %v2605_v36, 2  ;;  %v6008_v28 = vmul.f32 %v5172_v54, %v5916_v26  ;;  %v6014_v36 = vmul.f32 %v5172_v54, %v5960_v55 }
 0x186   :  { %7991 = vst [vmem:[#allocation111_spill] sm:$0xff] %v5971_v37  ;;  %1013 = vrot.lane.b32.xlu1 %v1006_v15, %s4388_s15  ;;  %v5981_v21 = vpop.permute.xlu1 %901  ;;  %v1625_v13 = vsel %vm253_vm3, %v7995_v25, %v1624_v17  ;;  %v1629_v37 = vrot.slane %v1614_v44, 2  ;;  %v5996_v15 = vmul.f32 %v5143_v47, %v5960_v55  ;;  %v7996_v44 = vrot.slane %v5913_v34, 2 }
 0x187   :  { %7993 = vst [vmem:[#allocation113_spill] sm:$0xff] %v5981_v21  ;;  %v5985_v38 = vpop.permute.xlu0 %300  ;;  %v2608_v25 = vmul.f32 %v5165_v9, %v5916_v26  ;;  %7997 = vst [vmem:[#allocation115_spill] sm:$0xff] %v6008_v28  ;;  %v1332_v20 = vrot.slane %v1319_v29, 2 }
 0x188   :  { %7994 = vst [vmem:[#allocation114_spill] sm:$0xff] %v5985_v38  ;;  %2003 = vrot.lane.b32.xlu0 %v1995_v43, %s4388_s15  ;;  %v2000_v17 = vsel %vm253_vm3, %v1998_v60, %v7996_v44  ;;  %v6022_v60 = vstv %s5934_s17  ;;  %v8000_v44 = vrot.slane %v5929_v33, 1  ;;  %v1630_v53 = vsel %vm253_vm3, %v8003_v41, %v1629_v37  ;;  %s6328_s17 = sld [smem:[#allocation2 + $0x185]] }
 0x189   :  { %7999 = vst [vmem:[#allocation117_spill] sm:$0xff] %v6022_v60  ;;  %v2622_v41 = vrot.slane %v2608_v25, 2  ;;  %v6055_v37 = vstv %s5977_s18  ;;  %v6079_v38 = vmul.f32 %v5172_v54, %v6022_v60  ;;  %v8013_v54 = vrot.slane %v5996_v15, 1  ;;  %s6412_s18 = sld [smem:[#allocation2 + $0x7]] }
 0x18a   :  { %1633 = vrot.lane.b32.xlu1 %v1625_v13, %s4387_s23  ;;  %v6019_v43 = vpop.permute.xlu1 %1521  ;;  %v6029_v21 = vsel %vm140_vm1, %v8000_v44, %v144_v30  ;;  %v1322_v13 = vmul.f32 %v5457_v8, %v5641_v32  ;;  %v8004_v30 = vrot.slane %v5957_v4, 2  ;;  %v6052_v32 = vmul.f32 %v5143_v47, %v6022_v60 }
 0x18b   :  { %7998 = vst [vmem:[#allocation116_spill] sm:$0xff] %v6019_v43  ;;  %8001 = vst [vmem:[#allocation118_spill] sm:$0xff] %v6029_v21  ;;  %v6031_v56 = vpop.permute.xlu0 %635  ;;  %v149_v43 = vrot.slane %v133_v63, 1  ;;  %v2313_v63 = vmul.f32 %v5240_v1, %v6022_v60  ;;  %v484_v44 = vrot.slane %v471_v58, 1  ;;  %v1943_v21 = vmul.f32 %v5429_v52, %v5686_v48 }
 0x18c   :  { %8002 = vst [vmem:[#allocation119_spill] sm:$0xff] %v6031_v56  ;;  %2007 = vrot.lane.b32.xlu0 %v2000_v17, %s4388_s15  ;;  %v2619_v2 = vsel %vm253_vm3, %v2617_v24, %v8004_v30  ;;  %8005 = vst [vmem:[#allocation120_spill] sm:$0xff] %v6052_v32  ;;  %v489_v17 = vrot.slane %v474_v0, 1  ;;  %v6062_v24 = vstv %s5983_s19  ;;  %v8008_v30 = vrot.slane %v5659_v10, 2  ;;  %v6084_v10 = vld [vmem:[%s7735_s0 + $0x8] sm:$0xff]  ;;  %s6416_s19 = sld [smem:[#allocation2 + $0x186]] }
 0x18d   :  { %v1337_v47 = vrot.slane %v1322_v13, 2  ;;  %v6072_v58 = vsel %vm140_vm1, %v147_v27, %v149_v43  ;;  %v146_v0 = vrot.slane %v131_v45, 1  ;;  %8010 = vst [vmem:[#allocation124_spill] sm:$0xff] %v6079_v38  ;;  %v8012_v45 = vrot.slane %v6008_v28, 2 }
 0x18e   :  { %1637 = vrot.lane.b32.xlu1 %v1630_v53, %s4387_s23  ;;  %v6059_v56 = vpop.permute.xlu1 %1525  ;;  %v1333_v29 = vsel %vm253_vm3, %v8008_v30, %v1332_v20  ;;  %8009 = vst [vmem:[#allocation123_spill] sm:$0xff] %v6072_v58  ;;  %v2316_v53 = vmul.f32 %v5165_v9, %v6022_v60  ;;  %v6088_v20 = vmul.f32 %v6084_v10, %v6055_v37  ;;  %v2325_v13 = vrot.slane %v2313_v63, 2 }
 0x18f   :  { %8006 = vst [vmem:[#allocation121_spill] sm:$0xff] %v6059_v56  ;;  %v6064_v25 = vpop.permute.xlu0 %639  ;;  %v2624_v43 = vsel %vm253_vm3, %v2622_v41, %v8012_v45  ;;  %v6101_v30 = vmul.f32 %v6084_v10, %v6062_v24  ;;  %v6106_v56 = vld [vmem:[%s7735_s0 + $0x20] sm:$0xff]  ;;  %v6116_v45 = vstv %s6024_s20  ;;  %v1946_v58 = vmul.f32 %v5457_v8, %v5686_v48  ;;  %s6430_s20 = sld [smem:[#allocation2 + $0x480]] }
 0x190   :  { %8007 = vst [vmem:[#allocation122_spill] sm:$0xff] %v6064_v25  ;;  %2627 = vrot.lane.b32.xlu0 %v2619_v2, %s4387_s23  ;;  %8011 = vst [vmem:[#allocation125_spill] sm:$0xff] %v6088_v20  ;;  %v6097_v2 = vsel %vm140_vm1, %v8013_v54, %v484_v44  ;;  %v6110_v41 = vmul.f32 %v6106_v56, %v6062_v24  ;;  %v8017_v44 = vrot.slane %v6014_v36, 1  ;;  %v8020_v25 = vrot.slane %v5679_v57, 2 }
 0x191   :  { %8014 = vst [vmem:[#allocation126_spill] sm:$0xff] %v6097_v2  ;;  %8016 = vst [vmem:[#allocation128_spill] sm:$0xff] %v6116_v45  ;;  %v1956_v2 = vrot.slane %v1943_v21, 2  ;;  %v2330_v28 = vrot.slane %v2316_v53, 2  ;;  %v8022_v57 = vrot.slane %v6052_v32, 2  ;;  %v2645_v21 = vmul.f32 %v5240_v1, %v6116_v45 }
 0x192   :  { %1341 = vrot.lane.b32.xlu1 %v1333_v29, %s4388_s15  ;;  %v6113_v63 = vpop.permute.xlu1 %1229  ;;  %v6121_v54 = vsel %vm140_vm1, %v8017_v44, %v489_v17  ;;  %v1338_v20 = vsel %vm253_vm3, %v8020_v25, %v1337_v47  ;;  %v6131_v29 = vsel %vm140_vm1, %v146_v0, %v147_v27  ;;  %v6140_v44 = vmul.f32 %v6106_v56, %v6055_v37 }
 0x193   :  { %8015 = vst [vmem:[#allocation127_spill] sm:$0xff] %v6113_v63  ;;  %8018 = vst [vmem:[#allocation129_spill] sm:$0xff] %v6121_v54  ;;  %v6123_v9 = vpop.permute.xlu0 %1891  ;;  %v6134_v63 = vstv %s6041_s21  ;;  %v2327_v48 = vsel %vm253_vm3, %v2325_v13, %v8022_v57  ;;  %v6151_v27 = vmul.f32 %v6084_v10, %v6116_v45  ;;  %v803_v0 = vmul.f32 %v5429_v52, %v6062_v24  ;;  %s4395_s21 = smov 104  }
 0x194   :  { %8019 = vst [vmem:[#allocation130_spill] sm:$0xff] %v6123_v9  ;;  %2631 = vrot.lane.b32.xlu0 %v2624_v43, %s4387_s23  ;;  %8021 = vst [vmem:[#allocation131_spill] sm:$0xff] %v6140_v44  ;;  %v806_v53 = vmul.f32 %v5457_v8, %v6062_v24  ;;  %v6164_v1 = vmul.f32 %v6084_v10, %v6134_v63  ;;  %v8025_v57 = vrot.slane %v5713_v23, 2  ;;  %v1961_v25 = vrot.slane %v1946_v58, 2  ;;  %v6191_v9 = vld [vmem:[%s7735_s0 + $0x18] sm:$0xff] }
 0x195   :  { %v1651_v17 = vmul.f32 %v5429_v52, %v5739_v51  ;;  %v8026_v23 = vrot.slane %v6079_v38, 2  ;;  %v2648_v44 = vmul.f32 %v6191_v9, %v6116_v45  ;;  %v6197_v54 = vmul.f32 %v6106_v56, %v6116_v45 }
 0x196   :  { %1345 = vrot.lane.b32.xlu1 %v1338_v20, %s4388_s15  ;;  %v6160_v43 = vpop.permute.xlu1 %1233  ;;  %v1957_v47 = vsel %vm253_vm3, %v8025_v57, %v1956_v2  ;;  %v6177_v20 = vmul.f32 %v6106_v56, %v6134_v63  ;;  %v2657_v2 = vrot.slane %v2645_v21, 2  ;;  %v821_v57 = vrot.slane %v806_v53, 1 }
 0x197   :  { %8023 = vst [vmem:[#allocation132_spill] sm:$0xff] %v6160_v43  ;;  %v6166_v13 = vpop.permute.xlu0 %1895  ;;  %v1135_v43 = vmul.f32 %v5429_v52, %v6134_v63  ;;  %v2332_v58 = vsel %vm253_vm3, %v2330_v28, %v8026_v23  ;;  %v816_v23 = vrot.slane %v803_v0, 1  ;;  %v1664_v60 = vrot.slane %v1651_v17, 2 }
 0x198   :  { %8024 = vst [vmem:[#allocation133_spill] sm:$0xff] %v6166_v13  ;;  %v1138_v13 = vmul.f32 %v5457_v8, %v6134_v63  ;;  %2335 = vrot.lane.b32.xlu0 %v2327_v48, %s4388_s15  ;;  %v6202_v48 = vld [vmem:[%s7735_s0] sm:$0xff]  ;;  %v6228_v45 = vstv %s6142_s26  ;;  %v8031_v35 = vrot.slane %v6151_v27, 2  ;;  %v2662_v17 = vrot.slane %v2648_v44, 2  ;;  %s6567_s26 = sld [smem:[#allocation2 + $0x187]] }
 0x199   :  { %v6206_v28 = vmul.f32 %v6202_v48, %v5925_v31  ;;  %v128_v21 = vmul.f32 %v6202_v48, %v5889_v46  ;;  %v1654_v46 = vmul.f32 %v5457_v8, %v5739_v51  ;;  %v469_v0 = vmul.f32 %v6202_v48, %v5960_v55 }
 0x19a   :  { %1965 = vrot.lane.b32.xlu1 %v1957_v47, %s4387_s23  ;;  %v6211_v38 = vpop.permute.xlu1 %1853  ;;  %v1148_v53 = vrot.slane %v1135_v43, 1  ;;  %v8032_v47 = vrot.slane %v6101_v30, 1  ;;  %v6251_v44 = vmul.f32 %v6191_v9, %v5925_v31  ;;  %v8038_v31 = vrot.slane %v6164_v1, 1 }
 0x19b   :  { %8027 = vst [vmem:[#allocation134_spill] sm:$0xff] %v6206_v28  ;;  %8028 = vst [vmem:[#allocation135_spill] sm:$0xff] %v6211_v38  ;;  %v6216_v32 = vpop.permute.xlu0 %2515  ;;  %v1962_v28 = vsel %vm253_vm3, %v8030_v3, %v1961_v25  ;;  %v1153_v38 = vrot.slane %v1138_v13, 1  ;;  %v2659_v3 = vsel %vm253_vm3, %v2657_v2, %v8031_v35  ;;  %v141_v51 = vrot.slane %v128_v21, 1 }
 0x19c   :  { %8029 = vst [vmem:[#allocation136_spill] sm:$0xff] %v6216_v32  ;;  %2339 = vrot.lane.b32.xlu0 %v2332_v58, %s4388_s15  ;;  %v472_v32 = vmul.f32 %v6191_v9, %v5960_v55  ;;  %v6239_v43 = vsel %vm140_vm1, %v8032_v47, %v816_v23  ;;  %v8033_v13 = vrot.slane %v6110_v41, 1  ;;  %v8036_v55 = vrot.slane %v5756_v40, 2 }
 0x19d   :  { %v1669_v47 = vrot.slane %v1654_v46, 2  ;;  %v2275_v35 = vmul.f32 %v5429_v52, %v5790_v39  ;;  %v1467_v40 = vmul.f32 %v5429_v52, %v6228_v45  ;;  %v801_v46 = vmul.f32 %v6202_v48, %v6062_v24 }
 0x19e   :  { %v6244_v58 = vsel %vm140_vm1, %v8033_v13, %v821_v57  ;;  %1969 = vrot.lane.b32.xlu1 %v1962_v28, %s4387_s23  ;;  %v6247_v2 = vpop.permute.xlu1 %1857  ;;  %v1665_v23 = vsel %vm253_vm3, %v8036_v55, %v1664_v60  ;;  %v6261_v57 = vstv %s6173_s27  ;;  %v6265_v28 = vmul.f32 %v6084_v10, %v6228_v45  ;;  %s6744_s27 = sld [smem:[#allocation2 + $0x303]] }
 0x19f   :  { %8034 = vst [vmem:[#allocation137_spill] sm:$0xff] %v6247_v2  ;;  %v6253_v21 = vpop.permute.xlu0 %2519  ;;  %8037 = vst [vmem:[#allocation139_spill] sm:$0xff] %v6261_v57  ;;  %v6270_v13 = vsel %vm140_vm1, %v8038_v31, %v1148_v53  ;;  %v481_v60 = vrot.slane %v469_v0, 1  ;;  %v8040_v55 = vrot.slane %v6177_v20, 1  ;;  %v8042_v2 = vrot.slane %v6197_v54, 2 }
 0x1a0   :  { %8035 = vst [vmem:[#allocation138_spill] sm:$0xff] %v6253_v21  ;;  %8039 = vst [vmem:[#allocation140_spill] sm:$0xff] %v6270_v13  ;;  %2667 = vrot.lane.b32.xlu0 %v2659_v3, %s4388_s15  ;;  %v96_v31 = vadd.f32 %v4693_v18, %v5902_v11  ;;  %v8043_v3 = vrot.slane %v5929_v33, 1  ;;  %v486_v0 = vrot.slane %v472_v32, 1  ;;  %v6294_v13 = vmul.f32 %v6106_v56, %v6228_v45 }
 0x1a1   :  { %v6282_v25 = vsel %vm140_vm1, %v8040_v55, %v1153_v38  ;;  %v2664_v53 = vsel %vm253_vm3, %v2662_v17, %v8042_v2  ;;  %v6300_v55 = vstv %s6214_s16  ;;  %v8046_v17 = vrot.slane %v5781_v12, 2  ;;  %s7011_s16 = sld [smem:[#allocation2 + $0x306]] }
 0x1a2   :  { %8041 = vst [vmem:[#allocation141_spill] sm:$0xff] %v6282_v25  ;;  %v143_v21 = vsel %vm140_vm1, %v141_v51, %v8043_v3  ;;  %1673 = vrot.lane.b32.xlu1 %v1665_v23, %s4388_s15  ;;  %v6297_v38 = vpop.permute.xlu1 %1561  ;;  %v2288_v11 = vrot.slane %v2275_v35, 2  ;;  %v2278_v33 = vmul.f32 %v5457_v8, %v5790_v39  ;;  %v804_v32 = vmul.f32 %v6191_v9, %v6062_v24 }
 0x1a3   :  { %8044 = vst [vmem:[#allocation142_spill] sm:$0xff] %v6297_v38  ;;  %v6302_v25 = vpop.permute.xlu0 %967  ;;  %v1670_v18 = vsel %vm253_vm3, %v8046_v17, %v1669_v47  ;;  %v7798_v51 = vrot.slane %v6265_v28, 1  ;;  %v1480_v2 = vrot.slane %v1467_v40, 1  ;;  %v1470_v23 = vmul.f32 %v5457_v8, %v6228_v45 }
 0x1a4   :  { %8045 = vst [vmem:[#allocation143_spill] sm:$0xff] %v6302_v25  ;;  %2671 = vrot.lane.b32.xlu0 %v2664_v53, %s4388_s15  ;;  %v6317_v12 = vmul.f32 %v6202_v48, %v6055_v37  ;;  %v6321_v47 = vmul.f32 %v6191_v9, %v6055_v37  ;;  %v8047_v39 = vrot.slane %v5996_v15, 1  ;;  %v813_v35 = vrot.slane %v801_v46, 1  ;;  %v8118_v25 = vld [vmem:[#allocation12_spill] sm:$0xff] }
 0x1a5   :  { %v122_v40 = vadd.f32 %v4773_v59, %v96_v31  ;;  %v8048_v53 = vrot.slane %v6014_v36, 1  ;;  %v241_v37 = vmul.f32 %v6202_v48, %v6300_v55  ;;  %v6340_v15 = vmul.f32 %v6084_v10, %v6300_v55 }
 0x1a6   :  { %v6326_v24 = vsel %vm140_vm1, %v481_v60, %v8047_v39  ;;  %1677 = vrot.lane.b32.xlu1 %v1670_v18, %s4388_s15  ;;  %v6343_v60 = vpop.permute.xlu1 %1565  ;;  %v8051_v59 = vrot.slane %v5810_v6, 2  ;;  %v2293_v31 = vrot.slane %v2278_v33, 2  ;;  %v98_v39 = vadd.f32 %v4648_v50, %v5862_v62 }
 0x1a7   :  { %v6334_v3 = vsel %vm140_vm1, %v486_v0, %v8048_v53  ;;  %8049 = vst [vmem:[#allocation144_spill] sm:$0xff] %v6343_v60  ;;  %v6346_v17 = vpop.permute.xlu0 %971  ;;  %v1983_v0 = vmul.f32 %v5429_v52, %v5835_v42  ;;  %v818_v53 = vrot.slane %v804_v32, 1  ;;  %v6358_v18 = vsel %vm140_vm1, %v7798_v51, %v1480_v2 }
 0x1a8   :  { %8050 = vst [vmem:[#allocation145_spill] sm:$0xff] %v6346_v17  ;;  %v2289_v36 = vsel %vm253_vm3, %v8051_v59, %v2288_v11  ;;  %v1485_v46 = vrot.slane %v1470_v23, 1  ;;  %v6361_v60 = vstv %s6275_s1  ;;  %v8053_v6 = vrot.slane %v6101_v30, 1  ;;  %s7042_s1 = sld [smem:[#allocation2 + $0x484]] }
 0x1a9   :  { %8052 = vst [vmem:[#allocation146_spill] sm:$0xff] %v6361_v60  ;;  %v1133_v52 = vmul.f32 %v6202_v48, %v6134_v63  ;;  %v244_v50 = vmul.f32 %v6191_v9, %v6300_v55  ;;  %v124_v62 = vadd.f32 %v4789_v16, %v98_v39  ;;  %v155_v33 = vadd.f32 %v143_v21, %v122_v40 }
 0x1aa   :  { %v6366_v11 = vsel %vm140_vm1, %v813_v35, %v8053_v6  ;;  %v254_v32 = vrot.slane %v241_v37, 2  ;;  %v7799_v2 = vrot.slane %v6340_v15, 2  ;;  %2297 = vrot.lane.b32.xlu1 %v2289_v36, %s4387_s23  ;;  %v6375_v23 = vpop.permute.xlu1 %2185  ;;  %v6379_v30 = vmul.f32 %v6106_v56, %v6300_v55 }
 0x1ab   :  { %8054 = vst [vmem:[#allocation147_spill] sm:$0xff] %v6375_v23  ;;  %v6381_v35 = vpop.permute.xlu0 %2223  ;;  %v8056_v59 = vrot.slane %v5829_v49, 2  ;;  %v1996_v16 = vrot.slane %v1983_v0, 2  ;;  %v1986_v21 = vmul.f32 %v5457_v8, %v5835_v42  ;;  %v6390_v40 = vmul.f32 %v6202_v48, %v6261_v57 }
 0x1ac   :  { %8055 = vst [vmem:[#allocation148_spill] sm:$0xff] %v6381_v35  ;;  %v195_v37 = vadd.f32 %v5124_v22, %v155_v33  ;;  %v8057_v36 = vrot.slane %v6110_v41, 1  ;;  %v8058_v51 = vrot.slane %v6294_v13, 1  ;;  %v1145_v8 = vrot.slane %v1133_v52, 1 }
 0x1ad   :  { %v2294_v6 = vsel %vm253_vm3, %v8056_v59, %v2293_v31  ;;  %v6405_v31 = vmul.f32 %v6191_v9, %v6261_v57  ;;  %v1136_v42 = vmul.f32 %v6191_v9, %v6134_v63  ;;  %v6410_v0 = vstv %s6328_s17  ;;  %v8082_v57 = vld [vmem:[#allocation114_spill] sm:$0xff]  ;;  %s4391_s17 = smov 96  }
 0x1ae   :  { %v6396_v39 = vsel %vm140_vm1, %v818_v53, %v8057_v36  ;;  %v6401_v49 = vsel %vm140_vm1, %v8058_v51, %v1485_v46  ;;  %8060 = vst [vmem:[#allocation150_spill] sm:$0xff] %v6410_v0  ;;  %v157_v22 = vadd.f32 %v6131_v29, %v124_v62  ;;  %v235_v41 = vadd.f32 %v5400_v61, %v195_v37  ;;  %v6422_v53 = vpop.permute.xlu1 %2189  ;;  %v6435_v62 = vld [vmem:[%s7735_s0 + $0x10] sm:$0x3] }
 0x1af   :  { %8059 = vst [vmem:[#allocation149_spill] sm:$0xff] %v6401_v49  ;;  %v256_v51 = vsel %vm253_vm3, %v254_v32, %v7799_v2  ;;  %v259_v46 = vrot.slane %v244_v50, 2  ;;  %2301 = vrot.lane.b32.xlu1 %v2294_v6, %s4387_s23  ;;  %8061 = vst [vmem:[#allocation151_spill] sm:$0xff] %v6422_v53  ;;  %v7800_v63 = vrot.slane %v6379_v30, 2  ;;  %v6425_v52 = vpop.permute.xlu0 %2227  ;;  %v8063_v33 = vrot.slane %v5871_v19, 2  ;;  %v8083_v49 = vld [vmem:[#allocation99_spill] sm:$0xff] }
 0x1b0   :  { %8062 = vst [vmem:[#allocation152_spill] sm:$0xff] %v6425_v52  ;;  %v2001_v61 = vrot.slane %v1986_v21, 2  ;;  %v2607_v50 = vmul.f32 %v6435_v62, %v5916_v26  ;;  %v6441_v32 = vmul.f32 %v6202_v48, %v6361_v60  ;;  %v197_v59 = vadd.f32 %v5150_v5, %v157_v22  ;;  %v8084_v52 = vld [vmem:[#allocation6_spill] sm:$0xff] }
 0x1b1   :  { %v1997_v29 = vsel %vm253_vm3, %v8063_v33, %v1996_v16  ;;  %v1465_v19 = vmul.f32 %v6202_v48, %v6228_v45  ;;  %v6448_v6 = vmul.f32 %v6084_v10, %v6410_v0  ;;  %v8066_v16 = vrot.slane %v6164_v1, 1 }
 0x1b2   :  { %8064 = vst [vmem:[#allocation153_spill] sm:$0xff] %v6441_v32  ;;  %v1150_v37 = vrot.slane %v1136_v42, 1  ;;  %v1468_v36 = vmul.f32 %v6191_v9, %v6228_v45  ;;  %v6459_v33 = vmul.f32 %v6106_v56, %v6410_v0  ;;  %v6463_v5 = vmul.f32 %v6191_v9, %v6361_v60 }
 0x1b3   :  { %8065 = vst [vmem:[#allocation154_spill] sm:$0xff] %v6448_v6  ;;  %v6453_v21 = vsel %vm140_vm1, %v1145_v8, %v8066_v16  ;;  %v237_v22 = vadd.f32 %v5421_v7, %v197_v59  ;;  %v268_v2 = vadd.f32 %v256_v51, %v235_v41  ;;  %v6468_v1 = vmul.f32 %v6435_v62, %v6410_v0  ;;  %v6471_v8 = vpop.permute.xlu1 %298  ;;  %v337_v42 = vpop.permute.xlu0 %336  ;;  %v6482_v51 = vld [vmem:[%s7735_s0 + $0x28] sm:$0x3] }
 0x1b4   :  { %8067 = vst [vmem:[#allocation155_spill] sm:$0xff] %v6459_v33  ;;  %8068 = vst [vmem:[#allocation156_spill] sm:$0xff] %v6463_v5  ;;  %2005 = vrot.lane.b32.xlu1 %v1997_v29, %s4388_s15  ;;  %v261_v45 = vsel %vm253_vm3, %v259_v46, %v7800_v63  ;;  %v8071_v16 = vrot.slane %v5913_v34, 2  ;;  %v2620_v41 = vrot.slane %v2607_v50, 2  ;;  %v2610_v29 = vmul.f32 %v6482_v51, %v5916_v26  ;;  %v8078_v26 = vld [vmem:[#allocation117_spill] sm:$0xff]  ;;  %v8143_v5 = vld [vmem:[#allocation20_spill] sm:$0xff] }
 0x1b5   :  { %8069 = vst [vmem:[#allocation157_spill] sm:$0xff] %v6468_v1  ;;  %8070 = vst [vmem:[#allocation158_spill] sm:$0xff] %v6471_v8  ;;  %v1477_v59 = vrot.slane %v1465_v19, 1  ;;  %v1797_v53 = vmul.f32 %v6202_v48, %v6410_v0  ;;  %v308_v34 = vadd.f32 %v5938_v14, %v268_v2  ;;  %v1800_v63 = vmul.f32 %v6191_v9, %v6410_v0  ;;  %v8079_v1 = vld [vmem:[#allocation98_spill] sm:$0xff] }
 0x1b6   :  { %v2002_v7 = vsel %vm253_vm3, %v8071_v16, %v2001_v61  ;;  %v8072_v61 = vrot.slane %v6177_v20, 1  ;;  %v1482_v16 = vrot.slane %v1468_v36, 1  ;;  %v6499_v23 = vstv %s6412_s18  ;;  %v8141_v8 = vld [vmem:[#allocation110_spill] sm:$0xff]  ;;  %s4392_s18 = smov 88  }
 0x1b7   :  { %8073 = vst [vmem:[#allocation159_spill] sm:$0xff] %v6499_v23  ;;  %v6502_v19 = vstv %s6416_s19  ;;  %v270_v60 = vadd.f32 %v261_v45, %v237_v22  ;;  %v348_v46 = vadd.f32 %v337_v42, %v308_v34  ;;  %v6507_v14 = vpop.permute.xlu1 %302  ;;  %v6510_v20 = vstv %s6430_s20  ;;  %v341_v2 = vpop.permute.xlu0 %340  ;;  %v8080_v22 = vld [vmem:[#allocation5_spill] sm:$0xff]  ;;  %s7112_s19 = sld [smem:[#allocation2 + $0x485]]  ;;  %s7121_s20 = sld [smem:[#allocation2 + $0x307]] }
 0x1b8   :  { %v6493_v50 = vsel %vm140_vm1, %v1150_v37, %v8072_v61  ;;  %8074 = vst [vmem:[#allocation160_spill] sm:$0xff] %v6502_v19  ;;  %2009 = vrot.lane.b32.xlu1 %v2002_v7, %s4388_s15  ;;  %8075 = vst [vmem:[#allocation161_spill] sm:$0xff] %v6507_v14  ;;  %v8077_v37 = vrot.slane %v5957_v4, 2  ;;  %v2625_v61 = vrot.slane %v2610_v29, 2  ;;  %v2315_v0 = vmul.f32 %v6435_v62, %v8078_v26 }
 0x1b9   :  { %8076 = vst [vmem:[#allocation162_spill] sm:$0xff] %v6510_v20  ;;  %v97_v45 = vadd.f32 %v8080_v22, %v8079_v1  ;;  %v8081_v42 = vrot.slane %v6265_v28, 1  ;;  %v1809_v34 = vrot.slane %v1797_v53, 1  ;;  %v310_v38 = vadd.f32 %v8082_v57, %v270_v60  ;;  %v8086_v22 = vld [vmem:[#allocation100_spill] sm:$0xff]  ;;  %v8087_v28 = vld [vmem:[#allocation7_spill] sm:$0xff] }
 0x1ba   :  { %v2621_v36 = vsel %vm253_vm3, %v8077_v37, %v2620_v41  ;;  %v99_v4 = vadd.f32 %v8084_v52, %v8083_v49  ;;  %v8085_v41 = vrot.slane %v6294_v13, 1  ;;  %v1814_v37 = vrot.slane %v1800_v63, 1  ;;  %v8092_v52 = vld [vmem:[#allocation115_spill] sm:$0xff] }
 0x1bb   :  { %v6522_v7 = vsel %vm140_vm1, %v1477_v59, %v8081_v42  ;;  %v2129_v1 = vmul.f32 %v6202_v48, %v6502_v19  ;;  %v438_v35 = vadd.f32 %v8087_v28, %v8086_v22  ;;  %v6538_v53 = vmul.f32 %v6084_v10, %v6502_v19  ;;  %v6542_v13 = vpop.permute.xlu1 %637  ;;  %v6548_v63 = vpop.permute.xlu0 %675 }
 0x1bc   :  { %v6530_v29 = vsel %vm140_vm1, %v1482_v16, %v8085_v41  ;;  %v354_v57 = vadd.f32 %v6510_v20, %v348_v46  ;;  %v350_v60 = vadd.f32 %v341_v2, %v310_v38  ;;  %2629 = vrot.lane.b32.xlu1 %v2621_v36, %s4387_s23  ;;  %8089 = vst [vmem:[#allocation98_spill] sm:$0xff] %v6542_v13  ;;  %8091 = vst [vmem:[#allocation114_spill] sm:$0xff] %v6548_v63  ;;  %v8094_v38 = vld [vmem:[#allocation101_spill] sm:$0xff]  ;;  %v8095_v2 = vld [vmem:[#allocation8_spill] sm:$0xff] }
 0x1bd   :  { %8088 = vst [vmem:[#allocation117_spill] sm:$0xff] %v6538_v53  ;;  %v6546_v49 = vmul.f32 %v6202_v48, %v6499_v23  ;;  %v8093_v59 = vrot.slane %v8092_v52, 2  ;;  %v2328_v42 = vrot.slane %v2315_v0, 2  ;;  %v2318_v46 = vmul.f32 %v6482_v51, %v8078_v26  ;;  %v8096_v41 = vld [vmem:[#allocation13_spill] sm:$0xff]  ;;  %v8100_v0 = vld [vmem:[#allocation102_spill] sm:$0xff]  ;;  %v8102_v26 = vld [vmem:[#allocation15_spill] sm:$0xff] }
 0x1be   :  { %v440_v36 = vadd.f32 %v8095_v2, %v8094_v38  ;;  %v123_v22 = vadd.f32 %v8096_v41, %v97_v45  ;;  %v6560_v28 = vmul.f32 %v6191_v9, %v6499_v23  ;;  %v8103_v38 = vrot.slane %v6459_v33, 1  ;;  %v8110_v41 = vld [vmem:[#allocation105_spill] sm:$0xff]  ;;  %v8111_v33 = vld [vmem:[#allocation10_spill] sm:$0xff]  ;;  %v8119_v13 = vld [vmem:[#allocation123_spill] sm:$0xff] }
 0x1bf   :  { %8090 = vst [vmem:[#allocation5_spill] sm:$0xff] %v6546_v49  ;;  %v2626_v16 = vsel %vm253_vm3, %v8093_v59, %v2625_v61  ;;  %v8098_v49 = vrot.slane %v6448_v6, 1  ;;  %v8101_v61 = vld [vmem:[#allocation9_spill] sm:$0xff]  ;;  %v125_v59 = vadd.f32 %v8102_v26, %v99_v4  ;;  %v2141_v2 = vrot.slane %v2129_v1, 1  ;;  %v8107_v4 = vld [vmem:[#allocation120_spill] sm:$0xff] }
 0x1c0   :  { %8097 = vst [vmem:[#allocation99_spill] sm:$0xff] %v6560_v28  ;;  %v770_v52 = vadd.f32 %v8101_v61, %v8100_v0  ;;  %v6575_v45 = vsel %vm140_vm1, %v1814_v37, %v8103_v38  ;;  %v6579_v23 = vstv %s6504_s25  ;;  %2633 = vrot.lane.b32.xlu1 %v2626_v16, %s4387_s23  ;;  %v358_v6 = vmax.f32 %v354_v57, 0.0  ;;  %v6585_v0 = vpop.permute.xlu0 %679  ;;  %v8109_v1 = vld [vmem:[#allocation128_spill] sm:$0xff]  ;;  %s6617_s23 = sld [smem:[#allocation2 + $0x302]] }
 0x1c1   :  { %v6565_v17 = vsel %vm140_vm1, %v1809_v34, %v8098_v49  ;;  %8104 = vst [vmem:[#allocation100_spill] sm:$0xff] %v6575_v45  ;;  %v356_v34 = vadd.f32 %v6510_v20, %v350_v60  ;;  %v6583_v49 = vpop.permute.xlu1 %641  ;;  %8106 = vst [vmem:[#allocation115_spill] sm:$0xff] %v6585_v0  ;;  %v8108_v61 = vrot.slane %v8107_v4, 2  ;;  %v2333_v37 = vrot.slane %v2318_v46, 2  ;;  %v8112_v60 = vld [vmem:[#allocation118_spill] sm:$0xff]  ;;  %v8116_v46 = vld [vmem:[#allocation17_spill] sm:$0xff] }
 0x1c2   :  { %8099 = vst [vmem:[#allocation6_spill] sm:$0xff] %v6565_v17  ;;  %8105 = vst [vmem:[#allocation7_spill] sm:$0xff] %v6583_v49  ;;  %v2647_v38 = vmul.f32 %v6435_v62, %v8109_v1  ;;  %v772_v28 = vadd.f32 %v8111_v33, %v8110_v41  ;;  %v6595_v45 = vadd.f32 %v8112_v60, %v123_v22  ;;  %v8114_v4 = vld [vmem:[#allocation106_spill] sm:$0xff]  ;;  %v8117_v49 = vld [vmem:[#allocation107_spill] sm:$0xff] }
 0x1c3   :  { %v2329_v26 = vsel %vm253_vm3, %v8108_v61, %v2328_v42  ;;  %v2132_v57 = vmul.f32 %v6191_v9, %v6502_v19  ;;  %v6601_v16 = vmul.f32 %v6106_v56, %v6502_v19  ;;  %v8115_v42 = vld [vmem:[#allocation11_spill] sm:$0xff]  ;;  %v464_v17 = vadd.f32 %v8116_v46, %v438_v35 }
 0x1c4   :  { %v437_v61 = vadd.f32 %v8115_v42, %v8114_v4  ;;  %v439_v20 = vadd.f32 %v8118_v25, %v8117_v49  ;;  %v6609_v33 = vadd.f32 %v8119_v13, %v125_v59  ;;  %v581_v22 = vmul.f32 %v6202_v48, %v6579_v23  ;;  %2337 = vrot.lane.b32.xlu1 %v2329_v26, %s4388_s15  ;;  %v6628_v49 = vpop.permute.xlu0 %1299  ;;  %v8124_v4 = vld [vmem:[#allocation124_spill] sm:$0xff] }
 0x1c5   :  { %8113 = vst [vmem:[#allocation101_spill] sm:$0xff] %v6601_v16  ;;  %v6615_v41 = vmul.f32 %v6084_v10, %v6579_v23  ;;  %v6620_v60 = vpop.permute.xlu1 %1893  ;;  %v363_v35 = vsel %vm362_vm4, %v358_v6, 0.0  ;;  %v360_v25 = vmax.f32 %v356_v34, 0.0  ;;  %v8121_v13 = vrot.slane %v6538_v53, 1  ;;  %8123 = vst [vmem:[#allocation102_spill] sm:$0xff] %v6628_v49  ;;  %v8130_v49 = vld [vmem:[#allocation126_spill] sm:$0xff] }
 0x1c6   :  { %8120 = vst [vmem:[#allocation8_spill] sm:$0xff] %v6620_v60  ;;  %364 = vadd.xlane.f32.xlu0 %v363_v35  ;;  %v8125_v42 = vrot.slane %v8124_v4, 2  ;;  %v2660_v19 = vrot.slane %v2647_v38, 2  ;;  %v2650_v26 = vmul.f32 %v6482_v51, %v8109_v1  ;;  %v8126_v60 = vld [vmem:[#allocation18_spill] sm:$0xff]  ;;  %v2146_v6 = vrot.slane %v2132_v57, 1  ;;  %v8138_v34 = vld [vmem:[#allocation129_spill] sm:$0xff] }
 0x1c7   :  { %v6626_v59 = vsel %vm140_vm1, %v2141_v2, %v8121_v13  ;;  %v466_v0 = vadd.f32 %v8126_v60, %v440_v36  ;;  %v6638_v53 = vstv %s6567_s26  ;;  %v8128_v2 = vld [vmem:[#allocation109_spill] sm:$0xff]  ;;  %v8129_v13 = vld [vmem:[#allocation14_spill] sm:$0xff]  ;;  %v6643_v35 = vadd.f32 %v8130_v49, %v464_v17  ;;  %v8137_v60 = vld [vmem:[#allocation19_spill] sm:$0xff] }
 0x1c8   :  { %8122 = vst [vmem:[#allocation13_spill] sm:$0xff] %v6626_v59  ;;  %v2334_v46 = vsel %vm253_vm3, %v8125_v42, %v2333_v37  ;;  %8127 = vst [vmem:[#allocation9_spill] sm:$0xff] %v6638_v53  ;;  %v769_v59 = vadd.f32 %v8129_v13, %v8128_v2  ;;  %v584_v37 = vmul.f32 %v6191_v9, %v6579_v23  ;;  %v8131_v1 = vld [vmem:[#allocation26_spill] sm:$0xff]  ;;  %v593_v57 = vrot.slane %v581_v22, 2  ;;  %v6663_v2 = vpop.permute.xlu0 %1303  ;;  %v8136_v13 = vld [vmem:[#allocation28_spill] sm:$0xff] }
 0x1c9   :  { %v6649_v38 = vmul.f32 %v6106_v56, %v6579_v23  ;;  %v796_v36 = vadd.f32 %v8131_v1, %v770_v52  ;;  %2341 = vrot.lane.b32.xlu1 %v2334_v46, %s4388_s15  ;;  %v6654_v4 = vpop.permute.xlu1 %1897  ;;  %v369_v42 = vsel %vm362_vm4, %v360_v25, 0.0  ;;  %v2461_v17 = vmul.f32 %v6202_v48, %v6638_v53  ;;  %8134 = vst [vmem:[#allocation128_spill] sm:$0xff] %v6663_v2  ;;  %v8142_v2 = vld [vmem:[#allocation21_spill] sm:$0xff] }
 0x1ca   :  { %8132 = vst [vmem:[#allocation15_spill] sm:$0xff] %v6654_v4  ;;  %v6661_v49 = vmul.f32 %v6084_v10, %v6638_v53  ;;  %370 = vadd.xlane.f32.xlu0 %v369_v42  ;;  %v8135_v52 = vrot.slane %v6151_v27, 2  ;;  %v2665_v46 = vrot.slane %v2650_v26, 2  ;;  %v798_v1 = vadd.f32 %v8136_v13, %v772_v28  ;;  %v8144_v26 = vld [vmem:[#allocation111_spill] sm:$0xff]  ;;  %v8145_v28 = vld [vmem:[#allocation16_spill] sm:$0xff] }
 0x1cb   :  { %v463_v25 = vadd.f32 %v8137_v60, %v437_v61  ;;  %v6671_v4 = vadd.f32 %v8138_v34, %v466_v0  ;;  %v8139_v14 = vrot.slane %v6601_v16, 1  ;;  %v1102_v42 = vadd.f32 %v8142_v2, %v8141_v8  ;;  %v8146_v61 = vld [vmem:[#allocation112_spill] sm:$0xff]  ;;  %v8147_v60 = vld [vmem:[#allocation23_spill] sm:$0xff] }
 0x1cc   :  { %8133 = vst [vmem:[#allocation120_spill] sm:$0xff] %v6661_v49  ;;  %v2661_v22 = vsel %vm253_vm3, %v8135_v52, %v2660_v19  ;;  %v465_v27 = vadd.f32 %v8143_v5, %v439_v20  ;;  %v598_v32 = vrot.slane %v584_v37, 2  ;;  %v7815_v19 = vrot.slane %v6649_v38, 2  ;;  %v6701_v37 = vpop.permute.xlu0 %2555 }
 0x1cd   :  { %v6676_v63 = vsel %vm140_vm1, %v2146_v6, %v8139_v14  ;;  %v771_v52 = vadd.f32 %v8145_v28, %v8144_v26  ;;  %v1104_v0 = vadd.f32 %v8147_v60, %v8146_v61  ;;  %v6687_v34 = vadd.f32 %v6239_v43, %v796_v36  ;;  %2669 = vrot.lane.b32.xlu1 %v2661_v22, %s4388_s15  ;;  %v6693_v14 = vpop.permute.xlu1 %2517  ;;  %v8154_v28 = vld [vmem:[#allocation31_spill] sm:$0xff] }
 0x1ce   :  { %8140 = vst [vmem:[#allocation105_spill] sm:$0xff] %v6676_v63  ;;  %v6690_v13 = vstv %s6617_s23  ;;  %8148 = vst [vmem:[#allocation10_spill] sm:$0xff] %v6693_v14  ;;  %v8149_v5 = vrot.slane %v6615_v41, 2  ;;  %v2473_v20 = vrot.slane %v2461_v17, 1  ;;  %v7819_v6 = vrot.slane %v6661_v49, 1  ;;  %v8153_v17 = vld [vmem:[#allocation125_spill] sm:$0xff] }
 0x1cf   :  { %8150 = vst [vmem:[#allocation118_spill] sm:$0xff] %v6701_v37  ;;  %v8151_v2 = vrot.slane %v6197_v54, 2  ;;  %v6707_v36 = vadd.f32 %v6326_v24, %v463_v25  ;;  %v6710_v22 = vadd.f32 %v6244_v58, %v798_v1  ;;  %v2464_v26 = vmul.f32 %v6191_v9, %v6638_v53  ;;  %v8156_v1 = vld [vmem:[#allocation33_spill] sm:$0xff]  ;;  %s7198_s23 = sld [smem:[#allocation2 + $0x486]] }
 0x1d0   :  { %v6698_v8 = vsel %vm253_vm3, %v593_v57, %v8149_v5  ;;  %v6716_v57 = vmul.f32 %v6106_v56, %v6638_v53  ;;  %v1434_v61 = vadd.f32 %v8154_v28, %v8153_v17  ;;  %v6721_v54 = vadd.f32 %v6334_v3, %v465_v27  ;;  %v8159_v5 = vld [vmem:[#allocation134_spill] sm:$0xff]  ;;  %v8161_v28 = vld [vmem:[#allocation36_spill] sm:$0xff]  ;;  %v6759_v16 = vpop.permute.xlu0 %2559 }
 0x1d1   :  { %v2666_v43 = vsel %vm253_vm3, %v8151_v2, %v2665_v46  ;;  %v6726_v24 = vsel %vm253_vm3, %v598_v32, %v7815_v19  ;;  %v913_v58 = vmul.f32 %v6202_v48, %v6690_v13  ;;  %v8155_v46 = vld [vmem:[#allocation131_spill] sm:$0xff]  ;;  %v6736_v60 = vmul.f32 %v6084_v10, %v6690_v13  ;;  %v6747_v32 = vpop.permute.xlu1 %2521  ;;  %v8160_v2 = vld [vmem:[#allocation22_spill] sm:$0xff]  ;;  %8164 = vst [vmem:[#allocation12_spill] sm:$0xff] %v6759_v16 }
 0x1d2   :  { %8152 = vst [vmem:[#allocation106_spill] sm:$0xff] %v6716_v57  ;;  %v6732_v25 = vadd.f32 %v8156_v1, %v8155_v46  ;;  %v916_v3 = vmul.f32 %v6191_v9, %v6690_v13  ;;  %v6742_v27 = vmul.f32 %v6106_v56, %v6690_v13  ;;  %2673 = vrot.lane.b32.xlu1 %v2666_v43, %s4388_s15  ;;  %8158 = vst [vmem:[#allocation17_spill] sm:$0xff] %v6747_v32  ;;  %v8162_v1 = vld [vmem:[#allocation24_spill] sm:$0xff]  ;;  %v8165_v53 = vld [vmem:[#allocation38_spill] sm:$0xff]  ;;  %s6796_s15 = sld [smem:[#allocation2 + $0x304]] }
 0x1d3   :  { %v1101_v17 = vadd.f32 %v8160_v2, %v8159_v5  ;;  %v1128_v46 = vadd.f32 %v8161_v28, %v1102_v42  ;;  %v1103_v19 = vadd.f32 %v8162_v1, %v6251_v44  ;;  %v6757_v14 = vsel %vm140_vm1, %v2473_v20, %v7819_v6  ;;  %v8166_v43 = vld [vmem:[#allocation25_spill] sm:$0xff]  ;;  %v8167_v5 = vld [vmem:[#allocation27_spill] sm:$0xff] }
 0x1d4   :  { %8157 = vst [vmem:[#allocation11_spill] sm:$0xff] %v6732_v25  ;;  %8163 = vst [vmem:[#allocation107_spill] sm:$0xff] %v6757_v14  ;;  %v1130_v25 = vadd.f32 %v8165_v53, %v1104_v0  ;;  %v795_v37 = vadd.f32 %v8166_v43, %v769_v59  ;;  %v2478_v32 = vrot.slane %v2464_v26, 1  ;;  %v797_v2 = vadd.f32 %v8167_v5, %v771_v52  ;;  %v8168_v20 = vld [vmem:[#allocation45_spill] sm:$0xff]  ;;  %v8169_v0 = vld [vmem:[#allocation32_spill] sm:$0xff]  ;;  %v6781_v63 = vpop.permute.xlu0 %1007 }
 0x1d5   :  { %v925_v42 = vrot.slane %v913_v58, 2  ;;  %v243_v44 = vmul.f32 %v6435_v62, %v6300_v55  ;;  %v246_v28 = vmul.f32 %v6482_v51, %v6300_v55  ;;  %v1460_v1 = vadd.f32 %v8168_v20, %v1434_v61  ;;  %v6772_v59 = vpop.permute.xlu1 %969  ;;  %v8170_v43 = vld [vmem:[#allocation34_spill] sm:$0xff]  ;;  %v8171_v58 = vld [vmem:[#allocation140_spill] sm:$0xff]  ;;  %v8173_v61 = vld [vmem:[#allocation29_spill] sm:$0xff] }
 0x1d6   :  { %v930_v49 = vrot.slane %v916_v3, 2  ;;  %v1127_v26 = vadd.f32 %v8169_v0, %v1101_v17  ;;  %v1129_v52 = vadd.f32 %v8170_v43, %v1103_v19  ;;  %v6777_v5 = vadd.f32 %v8171_v58, %v1128_v46  ;;  %v8174_v53 = vld [vmem:[#allocation141_spill] sm:$0xff]  ;;  %v8178_v46 = vld [vmem:[#allocation30_spill] sm:$0xff] }
 0x1d7   :  { %v583_v55 = vmul.f32 %v6435_v62, %v6579_v23  ;;  %v1433_v3 = vadd.f32 %v8173_v61, %v6317_v12  ;;  %v6786_v20 = vadd.f32 %v6366_v11, %v795_v37  ;;  %v6789_v6 = vadd.f32 %v8174_v53, %v1130_v25 }
 0x1d8   :  { %8172 = vst [vmem:[#allocation123_spill] sm:$0xff] %v6777_v5  ;;  %v8176_v19 = vrot.slane %v6716_v57, 1  ;;  %v1435_v0 = vadd.f32 %v8178_v46, %v6321_v47  ;;  %v6801_v43 = vadd.f32 %v6396_v39, %v797_v2  ;;  %v257_v12 = vrot.slane %v243_v44, 2  ;;  %v6829_v44 = vpop.permute.xlu0 %1011  ;;  %v8184_v46 = vld [vmem:[#allocation37_spill] sm:$0xff]  ;;  %v8226_v5 = vld [vmem:[#allocation162_spill] sm:$0xff] }
 0x1d9   :  { %8175 = vst [vmem:[#allocation124_spill] sm:$0xff] %v6789_v6  ;;  %v262_v58 = vrot.slane %v246_v28, 2  ;;  %v6804_v11 = vadd.f32 %v6358_v18, %v1460_v1  ;;  %v8180_v37 = vrot.slane %v6736_v60, 2  ;;  %v6817_v61 = vstv %s6744_s27  ;;  %v6819_v47 = vpop.permute.xlu1 %973  ;;  %v8182_v28 = vld [vmem:[#allocation35_spill] sm:$0xff]  ;;  %v8183_v1 = vld [vmem:[#allocation54_spill] sm:$0xff]  ;;  %s7244_s27 = sld [smem:[#allocation2 + $0x487]] }
 0x1da   :  { %v6794_v17 = vsel %vm140_vm1, %v2478_v32, %v8176_v19  ;;  %v8181_v32 = vrot.slane %v6742_v27, 2  ;;  %v6822_v39 = vadd.f32 %v6453_v21, %v1127_v26  ;;  %v6825_v18 = vadd.f32 %v6493_v50, %v1129_v52  ;;  %v8185_v26 = vld [vmem:[#allocation39_spill] sm:$0xff] }
 0x1db   :  { %8177 = vst [vmem:[#allocation18_spill] sm:$0xff] %v6794_v17  ;;  %8179 = vst [vmem:[#allocation109_spill] sm:$0xff] %v6804_v11  ;;  %v6809_v25 = vsel %vm253_vm3, %v925_v42, %v8180_v37  ;;  %v596_v2 = vrot.slane %v583_v55, 2  ;;  %v586_v42 = vmul.f32 %v6482_v51, %v6579_v23  ;;  %v196_v19 = vadd.f32 %v8183_v1, %v6595_v45  ;;  %v8192_v1 = vld [vmem:[#allocation40_spill] sm:$0xff] }
 0x1dc   :  { %v6814_v53 = vsel %vm253_vm3, %v930_v49, %v8181_v32  ;;  %v6833_v49 = vadd.f32 %v8182_v28, %v6390_v40  ;;  %v6839_v21 = vadd.f32 %v8184_v46, %v6405_v31  ;;  %v1459_v50 = vadd.f32 %v8185_v26, %v1433_v3  ;;  %v8188_v31 = vld [vmem:[#allocation47_spill] sm:$0xff] }
 0x1dd   :  { %v8186_v52 = vrot.slane %v6340_v15, 2  ;;  %v8187_v23 = vrot.slane %v6379_v30, 2  ;;  %v1245_v40 = vmul.f32 %v6202_v48, %v6817_v61  ;;  %v6852_v45 = vmul.f32 %v6084_v10, %v6817_v61 }
 0x1de   :  { %v535_v32 = vadd.f32 %v8188_v31, %v6707_v36  ;;  %v1248_v15 = vmul.f32 %v6191_v9, %v6817_v61  ;;  %v6860_v3 = vmul.f32 %v6106_v56, %v6817_v61  ;;  %v915_v30 = vmul.f32 %v6435_v62, %v6690_v13  ;;  %v8194_v31 = vld [vmem:[#allocation65_spill] sm:$0xff] }
 0x1df   :  { %v258_v55 = vsel %vm253_vm3, %v8186_v52, %v257_v12  ;;  %v263_v37 = vsel %vm253_vm3, %v8187_v23, %v262_v58  ;;  %v6864_v12 = vpop.permute.xlu1 %2225  ;;  %v8191_v58 = vld [vmem:[#allocation56_spill] sm:$0xff]  ;;  %v1461_v46 = vadd.f32 %v8192_v1, %v1435_v0  ;;  %v8193_v26 = vrot.slane %v6615_v41, 2  ;;  %v6872_v23 = vpop.permute.xlu0 %1631 }
 0x1e0   :  { %8189 = vst [vmem:[#allocation14_spill] sm:$0xff] %v6860_v3  ;;  %8190 = vst [vmem:[#allocation126_spill] sm:$0xff] %v6864_v12  ;;  %v198_v28 = vadd.f32 %v8191_v58, %v6609_v33  ;;  %v601_v52 = vrot.slane %v586_v42, 2  ;;  %v575_v57 = vadd.f32 %v8194_v31, %v535_v32  ;;  %v6876_v11 = vadd.f32 %v6522_v7, %v1459_v50  ;;  %v8196_v33 = vld [vmem:[#allocation59_spill] sm:$0xff]  ;;  %v8197_v58 = vld [vmem:[#allocation82_spill] sm:$0xff] }
 0x1e1   :  { %v597_v36 = vsel %vm253_vm3, %v8193_v26, %v596_v2  ;;  %v918_v12 = vmul.f32 %v6482_v51, %v6690_v13  ;;  %v6881_v16 = vstv %s6796_s15  ;;  %v536_v0 = vadd.f32 %v8196_v33, %v6643_v35  ;;  %v8198_v32 = vld [vmem:[#allocation48_spill] sm:$0xff]  ;;  %v8200_v31 = vld [vmem:[#allocation61_spill] sm:$0xff]  ;;  %s4401_s15 = smov 56  }
 0x1e2   :  { %8195 = vst [vmem:[#allocation26_spill] sm:$0xff] %v6881_v16  ;;  %v236_v41 = vadd.f32 %v8197_v58, %v196_v19  ;;  %v1257_v2 = vrot.slane %v1245_v40, 2  ;;  %v537_v1 = vadd.f32 %v8198_v32, %v6721_v54  ;;  %v1262_v7 = vrot.slane %v1248_v15, 2  ;;  %v8201_v19 = vld [vmem:[#allocation86_spill] sm:$0xff]  ;;  %v8203_v54 = vld [vmem:[#allocation153_spill] sm:$0xff] }
 0x1e3   :  { %v928_v26 = vrot.slane %v915_v30, 2  ;;  %v6892_v13 = vpop.permute.xlu1 %2229  ;;  %v538_v17 = vadd.f32 %v8200_v31, %v6671_v4  ;;  %v6897_v35 = vadd.f32 %v6530_v29, %v1461_v46  ;;  %v238_v33 = vadd.f32 %v8201_v19, %v198_v28  ;;  %v6903_v42 = vpop.permute.xlu0 %1635  ;;  %v8204_v15 = vld [vmem:[#allocation42_spill] sm:$0xff]  ;;  %v8206_v31 = vld [vmem:[#allocation156_spill] sm:$0xff] }
 0x1e4   :  { %8199 = vst [vmem:[#allocation28_spill] sm:$0xff] %v6892_v13  ;;  %v8202_v40 = vrot.slane %v6649_v38, 2  ;;  %v6907_v32 = vadd.f32 %v8204_v15, %v8203_v54  ;;  %v8205_v30 = vld [vmem:[#allocation66_spill] sm:$0xff]  ;;  %v607_v13 = vadd.f32 %v6698_v8, %v575_v57  ;;  %v933_v4 = vrot.slane %v918_v12, 2  ;;  %v8207_v29 = vld [vmem:[#allocation44_spill] sm:$0xff] }
 0x1e5   :  { %v577_v50 = vadd.f32 %v8205_v30, %v537_v1  ;;  %v6913_v46 = vadd.f32 %v8207_v29, %v8206_v31  ;;  %v269_v28 = vadd.f32 %v258_v55, %v236_v41  ;;  %v8208_v38 = vrot.slane %v6852_v45, 2  ;;  %v8210_v1 = vld [vmem:[#allocation119_spill] sm:$0xff]  ;;  %v8213_v15 = vld [vmem:[#allocation88_spill] sm:$0xff]  ;;  %v8214_v31 = vld [vmem:[#allocation158_spill] sm:$0xff] }
 0x1e6   :  { %v602_v58 = vsel %vm253_vm3, %v8202_v40, %v601_v52  ;;  %v1577_v19 = vmul.f32 %v6202_v48, %v6881_v16  ;;  %v8209_v40 = vld [vmem:[#allocation57_spill] sm:$0xff]  ;;  %v647_v8 = vadd.f32 %v8210_v1, %v607_v13  ;;  %v8211_v57 = vrot.slane %v6860_v3, 2  ;;  %v8220_v3 = vld [vmem:[#allocation122_spill] sm:$0xff] }
 0x1e7   :  { %v6918_v52 = vsel %vm253_vm3, %v1257_v2, %v8208_v38  ;;  %v867_v54 = vadd.f32 %v8209_v40, %v6786_v20  ;;  %v8212_v55 = vrot.slane %v6736_v60, 2  ;;  %v339_v2 = vpop.permute.xlu1 %338  ;;  %v576_v30 = vadd.f32 %v8213_v15, %v536_v0  ;;  %v6943_v38 = vpop.permute.xlu0 %1339  ;;  %v8218_v0 = vld [vmem:[#allocation161_spill] sm:$0xff] }
 0x1e8   :  { %v6928_v12 = vsel %vm253_vm3, %v1262_v7, %v8211_v57  ;;  %v309_v20 = vadd.f32 %v8214_v31, %v269_v28  ;;  %v271_v29 = vadd.f32 %v263_v37, %v238_v33  ;;  %v6941_v13 = vmul.f32 %v6084_v10, %v6881_v16  ;;  %v8215_v7 = vld [vmem:[#allocation75_spill] sm:$0xff]  ;;  %v8219_v31 = vld [vmem:[#allocation58_spill] sm:$0xff] }
 0x1e9   :  { %v6933_v41 = vsel %vm253_vm3, %v8212_v55, %v928_v26  ;;  %v907_v40 = vadd.f32 %v8215_v7, %v867_v54  ;;  %v609_v60 = vadd.f32 %v6726_v24, %v577_v50  ;;  %v8216_v26 = vld [vmem:[#allocation114_spill] sm:$0xff]  ;;  %v8217_v57 = vrot.slane %v6742_v27, 2 }
 0x1ea   :  { %v687_v1 = vadd.f32 %v8216_v26, %v647_v8  ;;  %v311_v28 = vadd.f32 %v8218_v0, %v271_v29  ;;  %v692_v37 = vstv %s6886_s28  ;;  %v1589_v33 = vrot.slane %v1577_v19, 2 }
 0x1eb   :  { %v6951_v55 = vsel %vm253_vm3, %v8217_v57, %v933_v4  ;;  %v349_v15 = vadd.f32 %v339_v2, %v309_v20  ;;  %v869_v14 = vadd.f32 %v8219_v31, %v6801_v43  ;;  %v649_v6 = vadd.f32 %v8220_v3, %v609_v60  ;;  %v343_v27 = vpop.permute.xlu1 %342  ;;  %v8221_v4 = vld [vmem:[#allocation90_spill] sm:$0xff]  ;;  %v6968_v43 = vpop.permute.xlu0 %1343  ;;  %v8222_v3 = vld [vmem:[#allocation77_spill] sm:$0xff]  ;;  %v8223_v60 = vld [vmem:[#allocation115_spill] sm:$0xff] }
 0x1ec   :  { %v1580_v24 = vmul.f32 %v6191_v9, %v6881_v16  ;;  %v6962_v50 = vmul.f32 %v6106_v56, %v6881_v16  ;;  %v578_v54 = vadd.f32 %v8221_v4, %v538_v17  ;;  %v608_v19 = vadd.f32 %v597_v36, %v576_v30  ;;  %v8224_v57 = vld [vmem:[#allocation68_spill] sm:$0xff]  ;;  %v8225_v31 = vld [vmem:[#allocation98_spill] sm:$0xff]  ;;  %v8227_v30 = vld [vmem:[#allocation143_spill] sm:$0xff] }
 0x1ed   :  { %v1590_v8 = vrot.slane %v6941_v13, 2  ;;  %v351_v2 = vadd.f32 %v343_v27, %v311_v28  ;;  %v909_v20 = vadd.f32 %v8222_v3, %v869_v14  ;;  %v939_v29 = vadd.f32 %v6809_v25, %v907_v40  ;;  %v8228_v40 = vld [vmem:[#allocation85_spill] sm:$0xff] }
 0x1ee   :  { %v693_v7 = vadd.f32 %v692_v37, %v687_v1  ;;  %v689_v26 = vadd.f32 %v8223_v60, %v649_v6  ;;  %v1199_v0 = vadd.f32 %v8224_v57, %v6822_v39  ;;  %v648_v16 = vadd.f32 %v8225_v31, %v608_v19 }
 0x1ef   :  { %v355_v17 = vadd.f32 %v8226_v5, %v349_v15  ;;  %v357_v36 = vadd.f32 %v8226_v5, %v351_v2  ;;  %v979_v28 = vadd.f32 %v8227_v30, %v939_v29  ;;  %v6980_v27 = vstv %s6935_s5  ;;  %v678_v25 = vpop.permute.xlu1 %677  ;;  %v6984_v39 = vpop.permute.xlu0 %1963  ;;  %v8229_v29 = vld [vmem:[#allocation7_spill] sm:$0xff] }
 0x1f0   :  { %v1594_v4 = vrot.slane %v1580_v24, 2  ;;  %v1595_v14 = vrot.slane %v6962_v50, 2  ;;  %v1239_v1 = vadd.f32 %v8228_v40, %v1199_v0  ;;  %v610_v6 = vadd.f32 %v602_v58, %v578_v54  ;;  %v8230_v0 = vld [vmem:[#allocation70_spill] sm:$0xff] }
 0x1f1   :  { %v688_v3 = vadd.f32 %v678_v25, %v648_v16  ;;  %v361_v19 = vmax.f32 %v357_v36, 0.0  ;;  %v941_v15 = vadd.f32 %v6814_v53, %v909_v20  ;;  %v695_v60 = vadd.f32 %v692_v37, %v689_v26  ;;  %v8231_v20 = vld [vmem:[#allocation50_spill] sm:$0xff]  ;;  %v8232_v26 = vld [vmem:[#allocation145_spill] sm:$0xff] }
 0x1f2   :  { %v1019_v5 = vadd.f32 %v6781_v63, %v979_v28  ;;  %v697_v2 = vmax.f32 %v693_v7, 0.0  ;;  %v650_v57 = vadd.f32 %v8229_v29, %v610_v6  ;;  %v359_v30 = vmax.f32 %v355_v17, 0.0  ;;  %v8233_v28 = vld [vmem:[#allocation87_spill] sm:$0xff] }
 0x1f3   :  { %v694_v24 = vadd.f32 %v692_v37, %v688_v3  ;;  %v372_v31 = vsel %vm362_vm4, %v361_v19, 0.0  ;;  %v1201_v58 = vadd.f32 %v8230_v0, %v6825_v18  ;;  %v1591_v16 = vsel %vm253_vm3, %v1589_v33, %v1590_v8  ;;  %v682_v54 = vpop.permute.xlu1 %681  ;;  %v7009_v33 = vpop.permute.xlu0 %1967 }
 0x1f4   :  { %v6998_v53 = vsel %vm253_vm3, %v1594_v4, %v1595_v14  ;;  %v7003_v63 = vstv %s6964_s29  ;;  %373 = vadd.xlane.f32.xlu0 %v372_v31  ;;  %v1791_v7 = vadd.f32 %v8231_v20, %v6833_v49  ;;  %v981_v18 = vadd.f32 %v8232_v26, %v941_v15 }
 0x1f5   :  { %v1271_v17 = vadd.f32 %v6918_v52, %v1239_v1  ;;  %v690_v36 = vadd.f32 %v682_v54, %v650_v57  ;;  %v1241_v4 = vadd.f32 %v8233_v28, %v1201_v58  ;;  %v1025_v25 = vadd.f32 %v6980_v27, %v1019_v5  ;;  %v8234_v52 = vld [vmem:[#allocation79_spill] sm:$0xff] }
 0x1f6   :  { %v701_v40 = vsel %vm362_vm4, %v697_v2, 0.0  ;;  %v699_v6 = vmax.f32 %v695_v60, 0.0  ;;  %v1021_v3 = vadd.f32 %v6829_v44, %v981_v18  ;;  %v366_v49 = vsel %vm362_vm4, %v359_v30, 0.0  ;;  %v8235_v44 = vld [vmem:[#allocation6_spill] sm:$0xff]  ;;  %v8237_v30 = vld [vmem:[#allocation93_spill] sm:$0xff] }
 0x1f7   :  { %v696_v19 = vadd.f32 %v692_v37, %v690_v36  ;;  %v698_v15 = vmax.f32 %v694_v24, 0.0  ;;  %v1531_v1 = vadd.f32 %v8234_v52, %v6876_v11  ;;  %v7022_v29 = vmul.f32 %v6202_v48, %v7003_v63  ;;  %v7028_v5 = vpop.permute.xlu1 %1301  ;;  %367 = vadd.xlane.f32.xlu1 %v366_v49  ;;  %v8236_v60 = vld [vmem:[#allocation102_spill] sm:$0xff]  ;;  %v1672_v31 = vpop.permute.xlu0 %1671  ;;  %v8239_v36 = vld [vmem:[#allocation81_spill] sm:$0xff] }
 0x1f8   :  { %v7026_v57 = vmul.f32 %v6435_v62, %v6817_v61  ;;  %702 = vadd.xlane.f32.xlu0 %v701_v40  ;;  %v1823_v37 = vadd.f32 %v8235_v44, %v1791_v7  ;;  %v1311_v2 = vadd.f32 %v8236_v60, %v1271_v17  ;;  %v7034_v11 = vmul.f32 %v6084_v10, %v7003_v63 }
 0x1f9   :  { %v7038_v24 = vmul.f32 %v6191_v9, %v7003_v63  ;;  %v1571_v0 = vadd.f32 %v8237_v30, %v1531_v1  ;;  %v1273_v58 = vadd.f32 %v6928_v12, %v1241_v4  ;;  %v707_v54 = vsel %vm362_vm4, %v699_v6, 0.0  ;;  %v8238_v9 = vld [vmem:[#allocation52_spill] sm:$0xff] }
 0x1fa   :  { %v1029_v20 = vmax.f32 %v1025_v25, 0.0  ;;  %v1027_v7 = vadd.f32 %v6980_v27, %v1021_v3  ;;  %v1351_v10 = vadd.f32 %v6943_v38, %v1311_v2  ;;  %v704_v26 = vsel %vm362_vm4, %v698_v15, 0.0  ;;  %v8240_v38 = vld [vmem:[#allocation128_spill] sm:$0xff]  ;;  %v8242_v15 = vld [vmem:[#allocation95_spill] sm:$0xff] }
 0x1fb   :  { %v700_v18 = vmax.f32 %v696_v19, 0.0  ;;  %v1793_v17 = vadd.f32 %v8238_v9, %v6839_v21  ;;  %v1533_v28 = vadd.f32 %v8239_v36, %v6897_v35  ;;  %v7053_v12 = vstv %s7000_s30  ;;  %v7059_v25 = vpop.permute.xlu1 %1305  ;;  %705 = vadd.xlane.f32.xlu1 %v704_v26  ;;  %v1676_v21 = vpop.permute.xlu0 %1675  ;;  %v8241_v35 = vld [vmem:[#allocation73_spill] sm:$0xff]  ;;  %v8243_v30 = vld [vmem:[#allocation100_spill] sm:$0xff]  ;;  %s4402_s30 = smov 16  }
 0x1fc   :  { %v7057_v4 = vmul.f32 %v6106_v56, %v7003_v63  ;;  %708 = vadd.xlane.f32.xlu0 %v707_v54  ;;  %v1313_v40 = vadd.f32 %v8240_v38, %v1273_v58  ;;  %v1921_v6 = vrot.slane %v7022_v29, 2  ;;  %v1922_v3 = vrot.slane %v7034_v11, 2 }
 0x1fd   :  { %v7065_v19 = vstv %s7011_s16  ;;  %v868_v49 = vadd.f32 %v8241_v35, %v6687_v34  ;;  %v1573_v52 = vadd.f32 %v8242_v15, %v1533_v28  ;;  %v1603_v56 = vadd.f32 %v1591_v16, %v1571_v0  ;;  %v8244_v16 = vld [vmem:[#allocation89_spill] sm:$0xff]  ;;  %v8248_v15 = vld [vmem:[#allocation91_spill] sm:$0xff] }
 0x1fe   :  { %v1033_v1 = vsel %vm362_vm4, %v1029_v20, 0.0  ;;  %v1357_v44 = vadd.f32 %v7053_v12, %v1351_v10  ;;  %v1353_v60 = vadd.f32 %v6968_v43, %v1313_v40  ;;  %v710_v2 = vsel %vm362_vm4, %v700_v18, 0.0  ;;  %v8245_v20 = vld [vmem:[#allocation108_spill] sm:$0xff]  ;;  %v7087_v10 = vld [vmem:[%s7735_s0 + $0x8] sm:$0xff] }
 0x1ff   :  { %v1031_v29 = vmax.f32 %v1027_v7, 0.0  ;;  %v1825_v58 = vadd.f32 %v8243_v30, %v1793_v17  ;;  %v1643_v54 = vadd.f32 %v6872_v23, %v1603_v56  ;;  %v1926_v26 = vrot.slane %v7038_v24, 2  ;;  %v7078_v9 = vpop.permute.xlu1 %2557  ;;  %711 = vadd.xlane.f32.xlu1 %v710_v2  ;;  %v7093_v24 = vpop.permute.xlu0 %2295  ;;  %v8246_v18 = vld [vmem:[#allocation76_spill] sm:$0xff] }
 0x200   :  { %v1927_v34 = vrot.slane %v7057_v4, 2  ;;  %1034 = vadd.xlane.f32.xlu0 %v1033_v1  ;;  %v1863_v0 = vadd.f32 %v8244_v16, %v1823_v37  ;;  %v908_v43 = vadd.f32 %v8245_v20, %v868_v49  ;;  %v2241_v7 = vmul.f32 %v6202_v48, %v7065_v19  ;;  %v8247_v48 = vld [vmem:[#allocation130_spill] sm:$0xff] }
 0x201   :  { %v7091_v23 = vmul.f32 %v7087_v10, %v7065_v19  ;;  %v870_v17 = vadd.f32 %v8246_v18, %v6710_v22  ;;  %v1605_v37 = vadd.f32 %v6998_v53, %v1573_v52  ;;  %v7099_v36 = vstv %s7042_s1  ;;  %v8253_v18 = vld [vmem:[#allocation60_spill] sm:$0xff] }
 0x202   :  { %v1683_v28 = vadd.f32 %v1672_v31, %v1643_v54  ;;  %v1903_v38 = vadd.f32 %v8247_v48, %v1863_v0  ;;  %v1359_v40 = vadd.f32 %v7053_v12, %v1353_v60  ;;  %v1039_v35 = vsel %vm362_vm4, %v1031_v29, 0.0  ;;  %v8249_v31 = vld [vmem:[#allocation113_spill] sm:$0xff] }
 0x203   :  { %v1361_v49 = vmax.f32 %v1357_v44, 0.0  ;;  %v1865_v56 = vadd.f32 %v8248_v15, %v1825_v58  ;;  %v1645_v1 = vadd.f32 %v6903_v42, %v1605_v37  ;;  %v1923_v22 = vsel %vm253_vm3, %v1921_v6, %v1922_v3  ;;  %v7110_v52 = vpop.permute.xlu1 %2561  ;;  %v7119_v29 = vpop.permute.xlu0 %2299  ;;  %v8250_v6 = vld [vmem:[#allocation133_spill] sm:$0xff] }
 0x204   :  { %v1260_v53 = vrot.slane %v7026_v57, 2  ;;  %1040 = vadd.xlane.f32.xlu0 %v1039_v35  ;;  %v910_v60 = vadd.f32 %v8249_v31, %v870_v17  ;;  %v940_v2 = vadd.f32 %v6933_v41, %v908_v43  ;;  %v1928_v44 = vsel %vm253_vm3, %v1926_v26, %v1927_v34  ;;  %v8251_v43 = vld [vmem:[#allocation5_spill] sm:$0xff] }
 0x205   :  { %v2253_v42 = vrot.slane %v2241_v7, 2  ;;  %v1905_v57 = vadd.f32 %v8250_v6, %v1865_v56  ;;  %v1689_v30 = vadd.f32 %v7099_v36, %v1683_v28  ;;  %v1685_v58 = vadd.f32 %v1676_v21, %v1645_v1  ;;  %v8252_v26 = vld [vmem:[#allocation53_spill] sm:$0xff] }
 0x206   :  { %v2254_v54 = vrot.slane %v7091_v23, 2  ;;  %v980_v16 = vadd.f32 %v6772_v59, %v940_v2  ;;  %v1935_v0 = vadd.f32 %v1923_v22, %v1903_v38  ;;  %v1365_v41 = vsel %vm362_vm4, %v1361_v49, 0.0  ;;  %v8255_v59 = vld [vmem:[#allocation99_spill] sm:$0xff]  ;;  %v8257_v31 = vld [vmem:[#allocation13_spill] sm:$0xff]  ;;  %v4363_v2 = vld [vmem:[%s7735_s0 + $0x18] sm:$0xff] }
 0x207   :  { %v1363_v20 = vmax.f32 %v1359_v40, 0.0  ;;  %v2429_v7 = vadd.f32 %v8252_v26, %v8251_v43  ;;  %v2123_v17 = vadd.f32 %v8253_v18, %v6907_v32  ;;  %v8254_v37 = vrot.slane %v6852_v45, 2  ;;  %v1010_v28 = vpop.permute.xlu1 %1009  ;;  %v8256_v38 = vld [vmem:[#allocation55_spill] sm:$0xff]  ;;  %v2004_v15 = vpop.permute.xlu0 %2003  ;;  %v8260_v18 = vld [vmem:[#allocation92_spill] sm:$0xff]  ;;  %v8323_v23 = vld [vmem:[#allocation69_spill] sm:$0xff] }
 0x208   :  { %v1250_v21 = vmul.f32 %v6482_v51, %v6817_v61  ;;  %1366 = vadd.xlane.f32.xlu0 %v1365_v41  ;;  %v7141_v35 = vadd.f32 %v8256_v38, %v8255_v59  ;;  %v942_v40 = vadd.f32 %v6951_v55, %v910_v60  ;;  %v1975_v49 = vadd.f32 %v6984_v39, %v1935_v0  ;;  %v8259_v26 = vld [vmem:[#allocation123_spill] sm:$0xff] }
 0x209   :  { %v7135_v48 = vsel %vm253_vm3, %v8254_v37, %v1260_v53  ;;  %v1020_v32 = vadd.f32 %v1010_v28, %v980_v16  ;;  %v1937_v45 = vadd.f32 %v1928_v44, %v1905_v57  ;;  %v1691_v56 = vadd.f32 %v7099_v36, %v1685_v58 }
 0x20a   :  { %v7149_v61 = vsel %vm253_vm3, %v2253_v42, %v2254_v54  ;;  %v1693_v1 = vmax.f32 %v1689_v30, 0.0  ;;  %v982_v22 = vadd.f32 %v6819_v47, %v942_v40  ;;  %v2015_v55 = vadd.f32 %v2004_v15, %v1975_v49  ;;  %v7162_v42 = vld [vmem:[%s7735_s0 + $0x20] sm:$0xff] }
 0x20b   :  { %v1026_v53 = vadd.f32 %v6980_v27, %v1020_v32  ;;  %v1371_v39 = vsel %vm362_vm4, %v1363_v20, 0.0  ;;  %v2155_v60 = vadd.f32 %v8257_v31, %v2123_v17  ;;  %v2244_v44 = vmul.f32 %v4363_v2, %v7065_v19  ;;  %v1014_v57 = vpop.permute.xlu1 %1013  ;;  %v2008_v16 = vpop.permute.xlu0 %2007  ;;  %v8258_v20 = vld [vmem:[#allocation62_spill] sm:$0xff]  ;;  %v8261_v49 = vld [vmem:[#allocation97_spill] sm:$0xff]  ;;  %v8263_v31 = vld [vmem:[#allocation71_spill] sm:$0xff] }
 0x20c   :  { %v7166_v47 = vmul.f32 %v7162_v42, %v7065_v19  ;;  %v7169_v6 = vstv %s7112_s19  ;;  %1372 = vadd.xlane.f32.xlu0 %v1371_v39  ;;  %v1977_v30 = vadd.f32 %v7009_v33, %v1937_v45  ;;  %v1022_v58 = vadd.f32 %v1014_v57, %v982_v22  ;;  %v8264_v57 = vld [vmem:[#allocation124_spill] sm:$0xff]  ;;  %s4393_s19 = smov 112  }
 0x20d   :  { %v1030_v0 = vmax.f32 %v1026_v53, 0.0  ;;  %v7173_v41 = vstv %s7121_s20  ;;  %v2125_v43 = vadd.f32 %v8258_v20, %v6913_v46  ;;  %v1200_v17 = vadd.f32 %v8260_v18, %v8259_v26  ;;  %v4365_v46 = vld [vmem:[%s7735_s0] sm:$0xff]  ;;  %v8267_v20 = vld [vmem:[#allocation148_spill] sm:$0xff]  ;;  %s4394_s20 = smov 120  }
 0x20e   :  { %v1697_v37 = vsel %vm362_vm4, %v1693_v1, 0.0  ;;  %v1695_v28 = vmax.f32 %v1691_v56, 0.0  ;;  %v2021_v59 = vadd.f32 %v7169_v6, %v2015_v55  ;;  %v1028_v38 = vadd.f32 %v6980_v27, %v1022_v58  ;;  %v8262_v27 = vld [vmem:[#allocation127_spill] sm:$0xff] }
 0x20f   :  { %v2017_v40 = vadd.f32 %v2008_v16, %v1977_v30  ;;  %v1036_v33 = vsel %vm362_vm4, %v1030_v0, 0.0  ;;  %v2195_v32 = vadd.f32 %v8261_v49, %v2155_v60  ;;  %v1265_v15 = vrot.slane %v1250_v21, 2  ;;  %v7184_v45 = vpop.permute.xlu1 %1633  ;;  %v7196_v21 = vpop.permute.xlu0 %2627  ;;  %v8265_v30 = vld [vmem:[#allocation94_spill] sm:$0xff]  ;;  %v8266_v16 = vld [vmem:[#allocation105_spill] sm:$0xff] }
 0x210   :  { %1037 = vadd.xlane.f32.xlu1 %v1036_v33  ;;  %1698 = vadd.xlane.f32.xlu0 %v1697_v37  ;;  %v2573_v56 = vmul.f32 %v4365_v46, %v7173_v41  ;;  %v7192_v1 = vmul.f32 %v7087_v10, %v7173_v41  ;;  %v1240_v22 = vadd.f32 %v8262_v27, %v1200_v17  ;;  %v2258_v53 = vrot.slane %v2244_v44, 2  ;;  %v8268_v33 = vld [vmem:[#allocation104_spill] sm:$0xff]  ;;  %v8269_v49 = vld [vmem:[#allocation14_spill] sm:$0xff] }
 0x211   :  { %v2259_v55 = vrot.slane %v7166_v47, 2  ;;  %v1032_v39 = vmax.f32 %v1028_v38, 0.0  ;;  %v2455_v60 = vadd.f32 %v8263_v31, %v2429_v7  ;;  %v1202_v58 = vadd.f32 %v8265_v30, %v8264_v57  ;;  %v8273_v30 = vld [vmem:[#allocation107_spill] sm:$0xff] }
 0x212   :  { %v2157_v0 = vadd.f32 %v8266_v16, %v2125_v43  ;;  %v2235_v26 = vadd.f32 %v8267_v20, %v2195_v32  ;;  %v2025_v18 = vmax.f32 %v2021_v59, 0.0  ;;  %v2023_v17 = vadd.f32 %v7169_v6, %v2017_v40  ;;  %v8271_v43 = vld [vmem:[#allocation132_spill] sm:$0xff] }
 0x213   :  { %v1042_v44 = vsel %vm362_vm4, %v1032_v39, 0.0  ;;  %v1703_v37 = vsel %vm362_vm4, %v1695_v28, 0.0  ;;  %v8270_v46 = vrot.slane %v8269_v49, 2  ;;  %v2585_v27 = vrot.slane %v2573_v56, 2  ;;  %v7213_v57 = vpop.permute.xlu1 %1637  ;;  %v7221_v39 = vpop.permute.xlu0 %2631 }
 0x214   :  { %v2197_v38 = vadd.f32 %v8268_v33, %v2157_v0  ;;  %v2586_v31 = vrot.slane %v7192_v1, 2  ;;  %1043 = vadd.xlane.f32.xlu1 %v1042_v44  ;;  %1704 = vadd.xlane.f32.xlu0 %v1703_v37  ;;  %v1242_v59 = vadd.f32 %v8271_v43, %v1202_v58  ;;  %v1272_v40 = vadd.f32 %v7135_v48, %v1240_v22  ;;  %v8274_v0 = vld [vmem:[#allocation152_spill] sm:$0xff]  ;;  %v8276_v33 = vld [vmem:[#allocation26_spill] sm:$0xff] }
 0x215   :  { %v1266_v7 = vsel %vm253_vm3, %v8270_v46, %v1265_v15  ;;  %v2260_v28 = vsel %vm253_vm3, %v2258_v53, %v2259_v55  ;;  %v2576_v32 = vmul.f32 %v4363_v2, %v7173_v41  ;;  %v8272_v15 = vld [vmem:[#allocation72_spill] sm:$0xff]  ;;  %v2487_v16 = vadd.f32 %v8273_v30, %v2455_v60 }
 0x216   :  { %v2457_v56 = vadd.f32 %v8272_v15, %v7141_v35  ;;  %v2237_v20 = vadd.f32 %v8274_v0, %v2197_v38  ;;  %v2267_v58 = vadd.f32 %v7149_v61, %v2235_v26  ;;  %v1312_v48 = vadd.f32 %v7028_v5, %v1272_v40  ;;  %v8275_v44 = vld [vmem:[#allocation136_spill] sm:$0xff] }
 0x217   :  { %v2027_v22 = vmax.f32 %v2023_v17, 0.0  ;;  %v7231_v53 = vmul.f32 %v7162_v42, %v7173_v41  ;;  %v2029_v2 = vsel %vm362_vm4, %v2025_v18, 0.0  ;;  %v2527_v37 = vadd.f32 %v8275_v44, %v2487_v16  ;;  %v1342_v26 = vpop.permute.xlu1 %1341  ;;  %v2336_v46 = vpop.permute.xlu0 %2335  ;;  %v8277_v18 = vld [vmem:[#allocation18_spill] sm:$0xff] }
 0x218   :  { %v2307_v35 = vadd.f32 %v7093_v24, %v2267_v58  ;;  %v1579_v60 = vmul.f32 %v6435_v62, %v8276_v33  ;;  %v2587_v61 = vsel %vm253_vm3, %v2585_v27, %v2586_v31  ;;  %2030 = vadd.xlane.f32.xlu0 %v2029_v2  ;;  %v1274_v5 = vadd.f32 %v1266_v7, %v1242_v59  ;;  %v8278_v24 = vld [vmem:[#allocation118_spill] sm:$0xff]  ;;  %v8279_v59 = vld [vmem:[#allocation11_spill] sm:$0xff] }
 0x219   :  { %v2590_v17 = vrot.slane %v2576_v32, 2  ;;  %v1352_v38 = vadd.f32 %v1342_v26, %v1312_v48  ;;  %v7242_v49 = vstv %s7198_s23  ;;  %v2489_v43 = vadd.f32 %v8277_v18, %v2457_v56  ;;  %v8280_v32 = vld [vmem:[#allocation46_spill] sm:$0xff]  ;;  %v8282_v26 = vld [vmem:[#allocation12_spill] sm:$0xff]  ;;  %v8283_v18 = vld [vmem:[#allocation109_spill] sm:$0xff]  ;;  %s4399_s23 = smov 48  }
 0x21a   :  { %v2567_v40 = vadd.f32 %v8278_v24, %v2527_v37  ;;  %v2269_v15 = vadd.f32 %v2260_v28, %v2237_v20  ;;  %v2347_v62 = vadd.f32 %v2336_v46, %v2307_v35  ;;  %v1314_v30 = vadd.f32 %v7059_v25, %v1274_v5  ;;  %v8281_v58 = vld [vmem:[#allocation138_spill] sm:$0xff] }
 0x21b   :  { %v2591_v27 = vrot.slane %v7231_v53, 2  ;;  %v1358_v16 = vadd.f32 %v7053_v12, %v1352_v38  ;;  %v2035_v7 = vsel %vm362_vm4, %v2027_v22, 0.0  ;;  %v1462_v0 = vadd.f32 %v8280_v32, %v8279_v59  ;;  %v1346_v44 = vpop.permute.xlu1 %1345  ;;  %v2340_v37 = vpop.permute.xlu0 %2339 }
 0x21c   :  { %v2529_v48 = vadd.f32 %v8281_v58, %v2489_v43  ;;  %v2309_v2 = vadd.f32 %v7119_v29, %v2269_v15  ;;  %v2353_v56 = vadd.f32 %v7242_v49, %v2347_v62  ;;  %2036 = vadd.xlane.f32.xlu0 %v2035_v7  ;;  %v1592_v28 = vrot.slane %v1579_v60, 2  ;;  %v8284_v43 = vld [vmem:[#allocation116_spill] sm:$0xff] }
 0x21d   :  { %v1582_v25 = vmul.f32 %v6482_v51, %v8276_v33  ;;  %v1354_v20 = vadd.f32 %v1346_v44, %v1314_v30  ;;  %v1362_v35 = vmax.f32 %v1358_v16, 0.0  ;;  %v2599_v5 = vadd.f32 %v2587_v61, %v2567_v40  ;;  %v8285_v33 = vld [vmem:[#allocation149_spill] sm:$0xff]  ;;  %v8286_v16 = vld [vmem:[#allocation142_spill] sm:$0xff] }
 0x21e   :  { %v2569_v22 = vadd.f32 %v8282_v26, %v2529_v48  ;;  %v2357_v38 = vmax.f32 %v2353_v56, 0.0  ;;  %v2349_v46 = vadd.f32 %v2340_v37, %v2309_v2  ;;  %v1532_v29 = vadd.f32 %v8284_v43, %v8283_v18  ;;  %v8287_v2 = vld [vmem:[#allocation139_spill] sm:$0xff]  ;;  %v8288_v44 = vld [vmem:[#allocation121_spill] sm:$0xff]  ;;  %v7294_v18 = vld [vmem:[%s7735_s0 + $0x28] sm:$0x3] }
 0x21f   :  { %v2592_v24 = vsel %vm253_vm3, %v2590_v17, %v2591_v27  ;;  %v1360_v60 = vadd.f32 %v7053_v12, %v1354_v20  ;;  %v1368_v51 = vsel %vm362_vm4, %v1362_v35, 0.0  ;;  %v1494_v15 = vadd.f32 %v8285_v33, %v1462_v0  ;;  %v7270_v61 = vpop.permute.xlu1 %1965  ;;  %v2668_v59 = vpop.permute.xlu0 %2667 }
 0x220   :  { %v2639_v62 = vadd.f32 %v7196_v21, %v2599_v5  ;;  %v2355_v30 = vadd.f32 %v7242_v49, %v2349_v46  ;;  %1369 = vadd.xlane.f32.xlu1 %v1368_v51  ;;  %v2361_v40 = vsel %vm362_vm4, %v2357_v38, 0.0  ;;  %v1572_v7 = vadd.f32 %v8286_v16, %v1532_v29  ;;  %v8292_v51 = vld [vmem:[#allocation41_spill] sm:$0xff] }
 0x221   :  { %v1593_v17 = vsel %vm253_vm3, %v1590_v8, %v1592_v28  ;;  %v7278_v12 = vstv %s7244_s27  ;;  %2362 = vadd.xlane.f32.xlu0 %v2361_v40  ;;  %v1364_v32 = vmax.f32 %v1360_v60, 0.0  ;;  %v1597_v0 = vrot.slane %v1582_v25, 2  ;;  %v8289_v25 = vld [vmem:[#allocation157_spill] sm:$0xff]  ;;  %s4400_s27 = smov 40  }
 0x222   :  { %v2601_v21 = vadd.f32 %v2592_v24, %v2569_v22  ;;  %v2359_v58 = vmax.f32 %v2355_v30, 0.0  ;;  %v2679_v48 = vadd.f32 %v2668_v59, %v2639_v62  ;;  %v1740_v56 = vmul.f32 %v7087_v10, %v8287_v2  ;;  %v8290_v22 = vld [vmem:[#allocation144_spill] sm:$0xff] }
 0x223   :  { %v1534_v20 = vadd.f32 %v8288_v44, %v1494_v15  ;;  %v1374_v37 = vsel %vm362_vm4, %v1364_v32, 0.0  ;;  %v7286_v28 = vpop.permute.xlu1 %1969  ;;  %v1812_v26 = vrot.slane %v8289_v25, 1  ;;  %v1604_v38 = vadd.f32 %v1593_v17, %v1572_v7  ;;  %v2672_v46 = vpop.permute.xlu0 %2671  ;;  %v8293_v7 = vld [vmem:[#allocation63_spill] sm:$0xff] }
 0x224   :  { %v2641_v13 = vadd.f32 %v7221_v39, %v2601_v21  ;;  %v2685_v8 = vadd.f32 %v7278_v12, %v2679_v48  ;;  %1375 = vadd.xlane.f32.xlu1 %v1374_v37  ;;  %v2367_v35 = vsel %vm362_vm4, %v2359_v58, 0.0  ;;  %v8291_v39 = vld [vmem:[#allocation150_spill] sm:$0xff]  ;;  %v1598_v29 = vsel %vm253_vm3, %v1595_v14, %v1597_v0  ;;  %v7314_v58 = vld [vmem:[%s7735_s0 + $0x10] sm:$0x3] }
 0x225   :  { %v1574_v5 = vadd.f32 %v8290_v22, %v1534_v20  ;;  %2368 = vadd.xlane.f32.xlu0 %v2367_v35  ;;  %v1802_v43 = vmul.f32 %v7294_v18, %v8291_v39  ;;  %v1766_v33 = vadd.f32 %v8292_v51, %v1740_v56  ;;  %v1742_v15 = vmul.f32 %v7162_v42, %v8287_v2  ;;  %v8294_v14 = vld [vmem:[#allocation154_spill] sm:$0xff]  ;;  %v8296_v2 = vld [vmem:[#allocation43_spill] sm:$0xff] }
 0x226   :  { %v2689_v24 = vmax.f32 %v2685_v8, 0.0  ;;  %v2681_v60 = vadd.f32 %v2672_v46, %v2641_v13  ;;  %v1644_v62 = vadd.f32 %v7184_v45, %v1604_v38  ;;  %v8295_v32 = vrot.slane %v8294_v14, 1  ;;  %v8297_v8 = vld [vmem:[#allocation64_spill] sm:$0xff] }
 0x227   :  { %v1674_v40 = vpop.permute.xlu1 %1673  ;;  %v1792_v17 = vadd.f32 %v8293_v7, %v1766_v33  ;;  %v1606_v59 = vadd.f32 %v1598_v29, %v1574_v5  ;;  %v1817_v21 = vrot.slane %v1802_v43, 1  ;;  %v1911_v45 = vmul.f32 %v7314_v58, %v7003_v63  ;;  %v8298_v5 = vld [vmem:[#allocation155_spill] sm:$0xff] }
 0x228   :  { %v2687_v30 = vadd.f32 %v7278_v12, %v2681_v60  ;;  %v2693_v16 = vsel %vm362_vm4, %v2689_v24, 0.0  ;;  %v1684_v50 = vadd.f32 %v1674_v40, %v1644_v62  ;;  %v1813_v0 = vsel %vm140_vm1, %v8295_v32, %v1812_v26  ;;  %v8302_v40 = vld [vmem:[#allocation160_spill] sm:$0xff] }
 0x229   :  { %2694 = vadd.xlane.f32.xlu0 %v2693_v16  ;;  %v1768_v56 = vadd.f32 %v8296_v2, %v1742_v15  ;;  %v1646_v44 = vadd.f32 %v7213_v57, %v1606_v59  ;;  %v1824_v25 = vadd.f32 %v1813_v0, %v1792_v17  ;;  %v8299_v38 = vrot.slane %v8298_v5, 1  ;;  %v8300_v57 = vld [vmem:[#allocation135_spill] sm:$0xff]  ;;  %v8301_v15 = vld [vmem:[#allocation8_spill] sm:$0xff]  ;;  %v8303_v17 = vld [vmem:[#allocation146_spill] sm:$0xff] }
 0x22a   :  { %v2691_v48 = vmax.f32 %v2687_v30, 0.0  ;;  %v1690_v20 = vadd.f32 %v7099_v36, %v1684_v50  ;;  %v1924_v39 = vrot.slane %v1911_v45, 2  ;;  %v1914_v43 = vmul.f32 %v7294_v18, %v7003_v63  ;;  %v8304_v59 = vld [vmem:[#allocation137_spill] sm:$0xff]  ;;  %v8305_v0 = vld [vmem:[#allocation15_spill] sm:$0xff] }
 0x22b   :  { %v1678_v37 = vpop.permute.xlu1 %1677  ;;  %v1794_v35 = vadd.f32 %v8297_v8, %v1768_v56  ;;  %v1818_v46 = vsel %vm140_vm1, %v8299_v38, %v1817_v21  ;;  %v1864_v29 = vadd.f32 %v8300_v57, %v1824_v25  ;;  %v2131_v16 = vmul.f32 %v7314_v58, %v8302_v40  ;;  %v8306_v2 = vld [vmem:[#allocation49_spill] sm:$0xff]  ;;  %v8308_v25 = vld [vmem:[#allocation78_spill] sm:$0xff]  ;;  %v8312_v57 = vld [vmem:[#allocation51_spill] sm:$0xff] }
 0x22c   :  { %v2699_v13 = vsel %vm362_vm4, %v2691_v48, 0.0  ;;  %v1686_v26 = vadd.f32 %v1678_v37, %v1646_v44  ;;  %v1694_v22 = vmax.f32 %v1690_v20, 0.0  ;;  %v1925_v63 = vsel %vm253_vm3, %v1922_v3, %v1924_v39  ;;  %v8307_v37 = vld [vmem:[#allocation9_spill] sm:$0xff]  ;;  %v8311_v39 = vld [vmem:[#allocation74_spill] sm:$0xff] }
 0x22d   :  { %2700 = vadd.xlane.f32.xlu0 %v2699_v13  ;;  %v1826_v33 = vadd.f32 %v1818_v46, %v1794_v35  ;;  %v1904_v62 = vadd.f32 %v8301_v15, %v1864_v29  ;;  %v1929_v7 = vrot.slane %v1914_v43, 2  ;;  %v2144_v48 = vrot.slane %v2131_v16, 1  ;;  %v8309_v5 = vld [vmem:[#allocation117_spill] sm:$0xff]  ;;  %v8313_v29 = vld [vmem:[#allocation159_spill] sm:$0xff]  ;;  %v8314_v16 = vld [vmem:[#allocation80_spill] sm:$0xff] }
 0x22e   :  { %v1692_v24 = vadd.f32 %v7099_v36, %v1686_v26  ;;  %v1700_v60 = vsel %vm362_vm4, %v1694_v22, 0.0  ;;  %v2072_v36 = vmul.f32 %v7087_v10, %v8303_v17  ;;  %v2134_v11 = vmul.f32 %v7294_v18, %v8302_v40 }
 0x22f   :  { %v7331_v51 = vpop.permute.xlu1 %2297  ;;  %1701 = vadd.xlane.f32.xlu1 %v1700_v60  ;;  %v1866_v50 = vadd.f32 %v8304_v59, %v1826_v33  ;;  %v1936_v45 = vadd.f32 %v1925_v63, %v1904_v62  ;;  %v1930_v3 = vsel %vm253_vm3, %v1927_v34, %v1929_v7  ;;  %v2074_v44 = vmul.f32 %v7162_v42, %v8303_v17 }
 0x230   :  { %v1696_v30 = vmax.f32 %v1692_v24, 0.0  ;;  %v2098_v56 = vadd.f32 %v8306_v2, %v2072_v36  ;;  %v2463_v13 = vmul.f32 %v7314_v58, %v8307_v37  ;;  %v2243_v8 = vmul.f32 %v7314_v58, %v7065_v19 }
 0x231   :  { %v1906_v21 = vadd.f32 %v8305_v0, %v1866_v50  ;;  %v1976_v20 = vadd.f32 %v7270_v61, %v1936_v45  ;;  %v8310_v34 = vrot.slane %v8309_v5, 1  ;;  %v2149_v46 = vrot.slane %v2134_v11, 1  ;;  %v8315_v50 = vld [vmem:[#allocation101_spill] sm:$0xff]  ;;  %v8317_v45 = vld [vmem:[#allocation67_spill] sm:$0xff] }
 0x232   :  { %v1706_v14 = vsel %vm362_vm4, %v1696_v30, 0.0  ;;  %v2124_v26 = vadd.f32 %v8308_v25, %v2098_v56  ;;  %v2850_v43 = vsub.s32 3, %v8311_v39  ;;  %v2100_v61 = vadd.f32 %v8312_v57, %v2074_v44  ;;  %v7382_v0 = vld [vmem:[%s7747_s12] sm:$0xff]  ;;  %v8318_v11 = vld [vmem:[#allocation147_spill] sm:$0xff]  ;;  %v8319_v44 = vld [vmem:[#allocation120_spill] sm:$0xff] }
 0x233   :  { %v7343_v32 = vpop.permute.xlu1 %2301  ;;  %1707 = vadd.xlane.f32.xlu1 %v1706_v14  ;;  %v1938_v22 = vadd.f32 %v1930_v3, %v1906_v21  ;;  %v2145_v38 = vsel %vm140_vm1, %v8310_v34, %v2144_v48  ;;  %v2404_v24 = vmul.f32 %v7087_v10, %v8313_v29  ;;  %v2476_v15 = vrot.slane %v2463_v13, 1  ;;  %v8321_v25 = vld [vmem:[#allocation96_spill] sm:$0xff] }
 0x234   :  { %v2466_v62 = vmul.f32 %v7294_v18, %v8307_v37  ;;  %v2256_v30 = vrot.slane %v2243_v8, 2  ;;  %v2126_v63 = vadd.f32 %v8314_v16, %v2100_v61  ;;  %v2156_v7 = vadd.f32 %v2145_v38, %v2124_v26 }
 0x235   :  { %v1978_v60 = vadd.f32 %v7286_v28, %v1938_v22  ;;  %v2406_v59 = vmul.f32 %v7162_v42, %v8313_v29  ;;  %v8316_v10 = vrot.slane %v8315_v50, 1  ;;  %v2246_v14 = vmul.f32 %v7294_v18, %v7065_v19 }
 0x236   :  { %v2851_v21 = vrot.slane %v7382_v0, %v2850_v43  ;;  %v2430_v48 = vadd.f32 %v8317_v45, %v2404_v24  ;;  %v2196_v42 = vadd.f32 %v8318_v11, %v2156_v7  ;;  %v8320_v19 = vrot.slane %v8319_v44, 1 }
 0x237   :  { %v2006_v35 = vpop.permute.xlu1 %2005  ;;  %v2150_v28 = vsel %vm140_vm1, %v8316_v10, %v2149_v46  ;;  %v2481_v37 = vrot.slane %v2466_v62, 1  ;;  %v2257_v13 = vsel %vm253_vm3, %v2254_v54, %v2256_v30  ;;  %v2261_v38 = vrot.slane %v2246_v14, 2  ;;  %v8324_v54 = vld [vmem:[#allocation151_spill] sm:$0xff]  ;;  %v8329_v14 = vld [vmem:[#allocation10_spill] sm:$0xff] }
 0x238   :  { %v2016_v4 = vadd.f32 %v2006_v35, %v1976_v20  ;;  %v2477_v20 = vsel %vm140_vm1, %v8320_v19, %v2476_v15  ;;  %v2456_v26 = vadd.f32 %v8321_v25, %v2430_v48  ;;  %v2158_v22 = vadd.f32 %v2150_v28, %v2126_v63  ;;  %v8325_v30 = vld [vmem:[#allocation103_spill] sm:$0xff]  ;;  %v8326_v63 = vld [vmem:[#allocation28_spill] sm:$0xff] }
 0x239   :  { %v2901_v2 = vpop.f32.mrb[0].mxu1  ;;  %v2575_v57 = vmul.f32 %v7314_v58, %v7173_v41  ;;  %v2432_v24 = vadd.f32 %v8323_v23, %v2406_v59  ;;  %v2262_v59 = vsel %vm253_vm3, %v2259_v55, %v2261_v38  ;;  %v2578_v28 = vmul.f32 %v7294_v18, %v7173_v41  ;;  %v8330_v55 = vld [vmem:[#allocation17_spill] sm:$0xff] }
 0x23a   :  { %v2022_v33 = vadd.f32 %v7169_v6, %v2016_v4  ;;  %v4135_v35 = vpop.f32.mrb[1].mxu1  ;;  %v8322_v4 = vld [vmem:[#allocation126_spill] sm:$0xff]  ;;  %v2902_v46 = vadd.f32 %v2901_v2, %v2851_v21  ;;  %v2488_v16 = vadd.f32 %v2477_v20, %v2456_v26 }
 0x23b   :  { %v2010_v40 = vpop.permute.xlu1 %2009  ;;  %v2904_v34 = vpop.f32.mrb[2].mxu1  ;;  %v2588_v10 = vrot.slane %v2575_v57, 2  ;;  %v8331_v57 = vlaneseq }
 0x23c   :  { %v2026_v17 = vmax.f32 %v2022_v33, 0.0  ;;  %v2018_v36 = vadd.f32 %v2010_v40, %v1978_v60  ;;  %v2905_v61 = vadd.f32 %v2904_v34, %v2851_v21  ;;  %v4136_v29 = vpop.f32.mrb[3].mxu1  ;;  %v2198_v60 = vadd.f32 %v8324_v54, %v2158_v22 }
 0x23d   :  { %v2458_v40 = vadd.f32 %v8325_v30, %v2432_v24  ;;  %v2528_v21 = vadd.f32 %v8329_v14, %v2488_v16  ;;  %v2589_v47 = vsel %vm253_vm3, %v2586_v31, %v2588_v10 }
 0x23e   :  { %v2024_v3 = vadd.f32 %v7169_v6, %v2018_v36  ;;  %v2032_v56 = vsel %vm362_vm4, %v2026_v17, 0.0  ;;  %v2236_v6 = vadd.f32 %v8322_v4, %v2196_v42  ;;  %v7404_v15 = vpack.c.bf16 %v2905_v61, %v2902_v46  ;;  %v8327_v36 = vld [vmem:[#allocation106_spill] sm:$0xff] }
 0x23f   :  { %v2630_v8 = vpop.permute.xlu1 %2629  ;;  %2033 = vadd.xlane.f32.xlu1 %v2032_v56  ;;  %v2238_v7 = vadd.f32 %v8326_v63, %v2198_v60  ;;  %v8328_v58 = vrot.slane %v8327_v36, 1  ;;  %v2568_v42 = vadd.f32 %v7078_v9, %v2528_v21  ;;  %v2593_v56 = vrot.slane %v2578_v28, 2 }
 0x240   :  { %v2028_v5 = vmax.f32 %v2024_v3, 0.0  ;;  %v2268_v17 = vadd.f32 %v2257_v13, %v2236_v6  ;;  %v380_v61 = vand.u32 127, %v8331_v57 }
 0x241   :  { %v2482_v50 = vsel %vm140_vm1, %v8328_v58, %v2481_v37  ;;  %v2270_v3 = vadd.f32 %v2262_v59, %v2238_v7  ;;  %v2600_v20 = vadd.f32 %v2589_v47, %v2568_v42  ;;  %v2594_v9 = vsel %vm253_vm3, %v2591_v27, %v2593_v56 }
 0x242   :  { %v2038_v33 = vsel %vm362_vm4, %v2028_v5, 0.0  ;;  %v2308_v45 = vadd.f32 %v7331_v51, %v2268_v17  ;;  %v2490_v11 = vadd.f32 %v2482_v50, %v2458_v40  ;;  %v385_v29 = vadd.s32 4294967288, %v380_v61 }
 0x243   :  { %v2634_v62 = vpop.permute.xlu1 %2633  ;;  %2039 = vadd.xlane.f32.xlu1 %v2038_v33  ;;  %v2310_v19 = vadd.f32 %v7343_v32, %v2270_v3  ;;  %v2640_v1 = vadd.f32 %v2630_v8, %v2600_v20  ;;  %v7441_v60 = vsub.s32 %v380_v61, %v8311_v39  ;;  %vm2753_vm1 = vcmask 64512  }
 0x244   :  { %v2530_v44 = vadd.f32 %v8330_v55, %v2490_v11  ;;  %v7438_v24 = vsub.s32 %v385_v29, %v8311_v39  ;;  %vm3422_vm3 = vcmask 195584  }
 0x246   :  { %v2570_v51 = vadd.f32 %v7110_v52, %v2530_v44 }
 0x247   :  { %v2338_v48 = vpop.permute.xlu1 %2337 }
 0x248   :  { %v2348_v2 = vadd.f32 %v2338_v48, %v2308_v45  ;;  %v2602_v32 = vadd.f32 %v2594_v9, %v2570_v51 }
 0x24a   :  { %v2354_v41 = vadd.f32 %v7242_v49, %v2348_v2  ;;  %v2642_v4 = vadd.f32 %v2634_v62, %v2602_v32 }
 0x24b   :  { %v2342_v18 = vpop.permute.xlu1 %2341 }
 0x24c   :  { %v2358_v37 = vmax.f32 %v2354_v41, 0.0  ;;  %v2350_v13 = vadd.f32 %v2342_v18, %v2310_v19 }
 0x24e   :  { %v2356_v31 = vadd.f32 %v7242_v49, %v2350_v13  ;;  %v2364_v35 = vsel %vm362_vm4, %v2358_v37, 0.0 }
 0x24f   :  { %v2670_v25 = vpop.permute.xlu1 %2669  ;;  %2365 = vadd.xlane.f32.xlu1 %v2364_v35 }
 0x250   :  { %v2360_v26 = vmax.f32 %v2356_v31, 0.0  ;;  %v2680_v22 = vadd.f32 %v2670_v25, %v2640_v1 }
 0x252   :  { %v2686_v52 = vadd.f32 %v7278_v12, %v2680_v22  ;;  %v2370_v6 = vsel %vm362_vm4, %v2360_v26, 0.0 }
 0x253   :  { %v2674_v5 = vpop.permute.xlu1 %2673  ;;  %2371 = vadd.xlane.f32.xlu1 %v2370_v6  ;;  %v365_v46 = vpop.xlane.xlu0 %364 }
 0x254   :  { %v2690_v53 = vmax.f32 %v2686_v52, 0.0  ;;  %v2682_v34 = vadd.f32 %v2674_v5, %v2642_v4  ;;  %v384_v30 = vrot.slane %v365_v46, %v7441_v60 }
 0x256   :  { %v2688_v27 = vadd.f32 %v7278_v12, %v2682_v34  ;;  %v2696_v49 = vsel %vm362_vm4, %v2690_v53, 0.0 }
 0x257   :  { %2697 = vadd.xlane.f32.xlu1 %v2696_v49  ;;  %v371_v23 = vpop.xlane.xlu0 %370 }
 0x258   :  { %v2692_v8 = vmax.f32 %v2688_v27, 0.0  ;;  %v395_v40 = vrot.slane %v371_v23, %v7441_v60 }
 0x25a   :  { %v2702_v38 = vsel %vm362_vm4, %v2692_v8, 0.0 }
 0x25b   :  { %2703 = vadd.xlane.f32.xlu1 %v2702_v38 }
 0x281   :  { %v374_v54 = vpop.xlane.xlu0 %373 }
 0x282   :  { %v399_v12 = vrot.slane %v374_v54, %v7438_v24 }
 0x284   :  { %v368_v33 = vpop.xlane.xlu1 %367  ;;  %v400_v7 = vsel %vm390_vm5, %v399_v12, %v395_v40 }
 0x285   :  { %v703_v62 = vpop.xlane.xlu0 %702  ;;  %v389_v16 = vrot.slane %v368_v33, %v7438_v24 }
 0x286   :  { %v720_v28 = vrot.slane %v703_v62, %v7441_v60 }
 0x287   :  { %v391_v63 = vsel %vm390_vm5, %v389_v16, %v384_v30 }
 0x288   :  { %v706_v17 = vpop.xlane.xlu1 %705  ;;  %v402_v36 = vsel %vm401_vm6, %v400_v7, %v391_v63 }
 0x289   :  { %v405_v58 = vsel %vm404_vm7, %v402_v36, 0.0  ;;  %v709_v50 = vpop.xlane.xlu0 %708  ;;  %v724_v59 = vrot.slane %v706_v17, %v7438_v24 }
 0x28a   :  { %406 = vadd.xlane.f32.xlu0 %v405_v58  ;;  %v729_v14 = vrot.slane %v709_v50, %v7441_v60 }
 0x28b   :  { %v725_v45 = vsel %vm390_vm5, %v724_v59, %v720_v28 }
 0x28c   :  { %v712_v10 = vpop.xlane.xlu1 %711 }
 0x28d   :  { %v733_v21 = vrot.slane %v712_v10, %v7438_v24  ;;  %v1035_v3 = vpop.xlane.xlu0 %1034 }
 0x28e   :  { %v1052_v44 = vrot.slane %v1035_v3, %v7441_v60 }
 0x28f   :  { %v734_v48 = vsel %vm390_vm5, %v733_v21, %v729_v14 }
 0x290   :  { %v735_v11 = vsel %vm401_vm6, %v734_v48, %v725_v45 }
 0x291   :  { %v737_v42 = vsel %vm404_vm7, %v735_v11, 0.0  ;;  %v1041_v47 = vpop.xlane.xlu0 %1040 }
 0x292   :  { %738 = vadd.xlane.f32.xlu1 %v737_v42  ;;  %v1061_v19 = vrot.slane %v1041_v47, %v7441_v60 }
 0x295   :  { %v1367_v13 = vpop.xlane.xlu0 %1366 }
 0x296   :  { %v1384_v25 = vrot.slane %v1367_v13, %v7441_v60 }
 0x299   :  { %v1373_v1 = vpop.xlane.xlu0 %1372 }
 0x29a   :  { %v1393_v32 = vrot.slane %v1373_v1, %v7441_v60  ;;  %v2748_v1 = vld [vmem:[%s7737_s2] sm:$0xf]  ;;  %s4396_s2 = smov 80  }
 0x29d   :  { %v1038_v2 = vpop.xlane.xlu1 %1037  ;;  %v1699_v5 = vpop.xlane.xlu0 %1698 }
 0x29e   :  { %v1056_v56 = vrot.slane %v1038_v2, %v7438_v24  ;;  %v1716_v8 = vrot.slane %v1699_v5, %v7441_v60 }
 0x2a0   :  { %v1057_v18 = vsel %vm390_vm5, %v1056_v56, %v1052_v44 }
 0x2a1   :  { %v1044_v55 = vpop.xlane.xlu1 %1043  ;;  %v1705_v34 = vpop.xlane.xlu0 %1704 }
 0x2a2   :  { %v1065_v41 = vrot.slane %v1044_v55, %v7438_v24  ;;  %v1725_v38 = vrot.slane %v1705_v34, %v7441_v60 }
 0x2a4   :  { %v1066_v51 = vsel %vm390_vm5, %v1065_v41, %v1061_v19 }
 0x2a5   :  { %v1067_v20 = vsel %vm401_vm6, %v1066_v51, %v1057_v18  ;;  %v2031_v54 = vpop.xlane.xlu0 %2030 }
 0x2a6   :  { %v1069_v37 = vsel %vm404_vm7, %v1067_v20, 0.0  ;;  %v2048_v40 = vrot.slane %v2031_v54, %v7441_v60 }
 0x2a7   :  { %1070 = vadd.xlane.f32.xlu0 %v1069_v37 }
 0x2a9   :  { %v2037_v33 = vpop.xlane.xlu0 %2036 }
 0x2aa   :  { %v2057_v16 = vrot.slane %v2037_v33, %v7441_v60 }
 0x2ad   :  { %v1370_v9 = vpop.xlane.xlu1 %1369 }
 0x2ae   :  { %v1388_v31 = vrot.slane %v1370_v9, %v7438_v24  ;;  %v2363_v36 = vpop.xlane.xlu0 %2362 }
 0x2af   :  { %v2380_v45 = vrot.slane %v2363_v36, %v7441_v60 }
 0x2b0   :  { %v1389_v22 = vsel %vm390_vm5, %v1388_v31, %v1384_v25  ;;  %v2759_v31 = vsel %vm2757_vm8, %v2748_v1, 0 }
 0x2b1   :  { %v1376_v35 = vpop.xlane.xlu1 %1375  ;;  %4124 = vmatpush3.bf16.msra.mxu0 %v2759_v31 }
 0x2b2   :  { %v1397_v26 = vrot.slane %v1376_v35, %v7438_v24  ;;  %v2369_v59 = vpop.xlane.xlu0 %2368  ;;  %v8332_v35 = vmov 0.0  }
 0x2b3   :  { %v2389_v48 = vrot.slane %v2369_v59, %v7441_v60  ;;  %4137 = vmatprep.subr.bf16.mxu0 %v8332_v35 }
 0x2b4   :  { %v1398_v4 = vsel %vm390_vm5, %v1397_v26, %v1393_v32 }
 0x2b5   :  { %v1399_v52 = vsel %vm401_vm6, %v1398_v4, %v1389_v22 }
 0x2b6   :  { %v1401_v6 = vsel %vm404_vm7, %v1399_v52, 0.0  ;;  %v2695_v14 = vpop.xlane.xlu0 %2694 }
 0x2b7   :  { %1402 = vadd.xlane.f32.xlu1 %v1401_v6  ;;  %v2712_v41 = vrot.slane %v2695_v14, %v7441_v60 }
 0x2ba   :  { %v2701_v55 = vpop.xlane.xlu0 %2700 }
 0x2bb   :  { %v2721_v18 = vrot.slane %v2701_v55, %v7441_v60 }
 0x2bc   :  { %v1702_v53 = vpop.xlane.xlu1 %1701 }
 0x2bd   :  { %v1720_v27 = vrot.slane %v1702_v53, %v7438_v24 }
 0x2bf   :  { %v1721_v57 = vsel %vm390_vm5, %v1720_v27, %v1716_v8 }
 0x2c0   :  { %v1708_v49 = vpop.xlane.xlu1 %1707 }
 0x2c1   :  { %v1729_v46 = vrot.slane %v1708_v49, %v7438_v24 }
 0x2c3   :  { %v1730_v61 = vsel %vm390_vm5, %v1729_v46, %v1725_v38 }
 0x2c4   :  { %v1731_v29 = vsel %vm401_vm6, %v1730_v61, %v1721_v57 }
 0x2c5   :  { %v1733_v23 = vsel %vm404_vm7, %v1731_v29, 0.0 }
 0x2c6   :  { %1734 = vadd.xlane.f32.xlu0 %v1733_v23 }
 0x2cc   :  { %v2034_v12 = vpop.xlane.xlu1 %2033 }
 0x2cd   :  { %v2052_v62 = vrot.slane %v2034_v12, %v7438_v24 }
 0x2cf   :  { %v2053_v7 = vsel %vm390_vm5, %v2052_v62, %v2048_v40 }
 0x2d0   :  { %v2040_v30 = vpop.xlane.xlu1 %2039 }
 0x2d1   :  { %v2061_v63 = vrot.slane %v2040_v30, %v7438_v24 }
 0x2d3   :  { %v2062_v17 = vsel %vm390_vm5, %v2061_v63, %v2057_v16 }
 0x2d4   :  { %v2063_v58 = vsel %vm401_vm6, %v2062_v17, %v2053_v7 }
 0x2d5   :  { %v2065_v50 = vsel %vm404_vm7, %v2063_v58, 0.0 }
 0x2d6   :  { %2066 = vadd.xlane.f32.xlu1 %v2065_v50 }
 0x2dc   :  { %v2366_v10 = vpop.xlane.xlu1 %2365 }
 0x2dd   :  { %v2384_v28 = vrot.slane %v2366_v10, %v7438_v24 }
 0x2df   :  { %v2385_v42 = vsel %vm390_vm5, %v2384_v28, %v2380_v45  ;;  %v2909_v45 = vld [vmem:[%s7739_s4] sm:$0xff] }
 0x2e0   :  { %v2372_v21 = vpop.xlane.xlu1 %2371 }
 0x2e1   :  { %v2393_v11 = vrot.slane %v2372_v21, %v7438_v24 }
 0x2e3   :  { %v2394_v3 = vsel %vm390_vm5, %v2393_v11, %v2389_v48  ;;  %v2910_v11 = vld [vmem:[%s7739_s4 + $0x8] sm:$0xff]  ;;  %s4398_s4 = smov 64  }
 0x2e4   :  { %v2698_v2 = vpop.xlane.xlu1 %2697  ;;  %v2395_v47 = vsel %vm401_vm6, %v2394_v3, %v2385_v42 }
 0x2e5   :  { %v2397_v56 = vsel %vm404_vm7, %v2395_v47, 0.0  ;;  %v2716_v44 = vrot.slane %v2698_v2, %v7438_v24 }
 0x2e6   :  { %2398 = vadd.xlane.f32.xlu0 %v2397_v56 }
 0x2e7   :  { %v2717_v20 = vsel %vm390_vm5, %v2716_v44, %v2712_v41 }
 0x2e8   :  { %v2704_v19 = vpop.xlane.xlu1 %2703 }
 0x2e9   :  { %v2725_v51 = vrot.slane %v2704_v19, %v7438_v24 }
 0x2eb   :  { %v2726_v37 = vsel %vm390_vm5, %v2725_v51, %v2721_v18 }
 0x2ec   :  { %v2727_v13 = vsel %vm401_vm6, %v2726_v37, %v2717_v20 }
 0x2ed   :  { %v2729_v9 = vsel %vm404_vm7, %v2727_v13, 0.0 }
 0x2ee   :  { %2730 = vadd.xlane.f32.xlu1 %v2729_v9 }
 0x2fc   :  { %2912 = vrot.lane.b32.xlu0 %v7404_v15, %s4391_s17 }
 0x2ff   :  { %3033 = vrot.lane.b32.xlu1 %v7404_v15, %s4392_s18 }
 0x300   :  { %3152 = vrot.lane.b32.xlu0 %v7404_v15, %s4393_s19 }
 0x303   :  { %3031 = vrot.lane.b32.xlu1 %v7404_v15, %s4394_s20 }
 0x304   :  { %3273 = vrot.lane.b32.xlu0 %v7404_v15, %s4395_s21 }
 0x307   :  { %3154 = vrot.lane.b32.xlu1 %v7404_v15, %s4396_s2 }
 0x30b   :  { %3275 = vrot.lane.b32.xlu1 %v7404_v15, %s4397_s22 }
 0x317   :  { %v407_v24 = vpop.xlane.xlu0 %406 }
 0x318   :  { %v408_v6 = vmul.f32 0.00390625, %v407_v24 }
 0x31f   :  { %v739_v60 = vpop.xlane.xlu1 %738 }
 0x320   :  { %v740_v22 = vmul.f32 0.00390625, %v739_v60 }
 0x322   :  { %v2734_v27 = vsel %vm2733_vm9, %v408_v6, %v740_v22 }
 0x334   :  { %v1071_v25 = vpop.xlane.xlu0 %1070 }
 0x335   :  { %v1072_v4 = vmul.f32 0.00390625, %v1071_v25 }
 0x337   :  { %v2736_v8 = vsel %vm2735_vm10, %v2734_v27, %v1072_v4 }
 0x344   :  { %v1403_v32 = vpop.xlane.xlu1 %1402 }
 0x345   :  { %v1404_v5 = vmul.f32 0.00390625, %v1403_v32 }
 0x347   :  { %v2738_v46 = vsel %vm2737_vm11, %v2736_v8, %v1404_v5 }
 0x353   :  { %v1735_v26 = vpop.xlane.xlu0 %1734 }
 0x354   :  { %v1736_v34 = vmul.f32 0.00390625, %v1735_v26 }
 0x356   :  { %v2740_v57 = vsel %vm2739_vm12, %v2738_v46, %v1736_v34 }
 0x363   :  { %v2067_v52 = vpop.xlane.xlu1 %2066 }
 0x364   :  { %v2068_v49 = vmul.f32 0.00390625, %v2067_v52 }
 0x366   :  { %v2742_v29 = vsel %vm2741_vm13, %v2740_v57, %v2068_v49 }
 0x373   :  { %v2399_v53 = vpop.xlane.xlu0 %2398 }
 0x374   :  { %v2400_v38 = vmul.f32 0.00390625, %v2399_v53 }
 0x376   :  { %v2744_v54 = vsel %vm2743_vm14, %v2742_v29, %v2400_v38 }
 0x377   :  { %v2913_v12 = vpop.permute.xlu0 %2912 }
 0x378   :  { %v2918_v30 = vsel %vm2753_vm1, %v2913_v12, 0 }
 0x37b   :  { %v2731_v61 = vpop.xlane.xlu1 %2730  ;;  %v3153_v58 = vpop.permute.xlu0 %3152 }
 0x37c   :  { %v2732_v23 = vmul.f32 0.00390625, %v2731_v61 }
 0x37e   :  { %v2746_v33 = vsel %vm2745_vm15, %v2744_v54, %v2732_v23 }
 0x37f   :  { %v2747_v62 = vpack.c.bf16 %v2746_v33, %v2746_v33  ;;  %v3034_v40 = vpop.permute.xlu1 %3033  ;;  %v3274_v59 = vpop.permute.xlu0 %3273 }
 0x380   :  { %v3039_v63 = vsel %vm2753_vm1, %v3034_v40, 0 }
 0x381   :  { %4126 = vmatmul.mubr.msk.bf16.vlgmr.msra.gmra.mrb[0].mxu0 %vm2753_vm1, %v2747_v62 }
 0x382   :  { %4138 = vmatpush3.bf16.xpose.msra.mxu0 %v2918_v30  ;;  %4139 = vmatprep.mubr.msk.bf16.mxu0 %vm4390_vm2, %v8332_v35 }
 0x383   :  { %4149 = vmatprep.subr.bf16.mxu0 %v8332_v35  ;;  %v3032_v16 = vpop.permute.xlu1 %3031 }
 0x387   :  { %v3155_v7 = vpop.permute.xlu1 %3154 }
 0x388   :  { %v3160_v17 = vsel %vm2753_vm1, %v3155_v7, 0 }
 0x389   :  { %4140 = vmatmul.mubr.msk.bf16.vlgmr.msra.gmra.mrb[4].mxu0 %vm2753_vm1, %v7404_v15 }
 0x38a   :  { %4150 = vmatpush3.bf16.xpose.msra.mxu0 %v3039_v63  ;;  %4151 = vmatprep.mubr.msk.bf16.mxu0 %vm4390_vm2, %v8332_v35 }
 0x38b   :  { %4161 = vmatprep.subr.bf16.mxu0 %v8332_v35  ;;  %v3276_v36 = vpop.permute.xlu1 %3275 }
 0x38c   :  { %v3281_v50 = vsel %vm2753_vm1, %v3276_v36, 0 }
 0x391   :  { %4152 = vmatmul.mubr.msk.bf16.vlgmr.msra.gmra.mrb[8].mxu0 %vm2753_vm1, %v3032_v16 }
 0x392   :  { %4162 = vmatpush3.bf16.xpose.msra.mxu0 %v3160_v17  ;;  %4163 = vmatprep.mubr.msk.bf16.mxu0 %vm4390_vm2, %v8332_v35 }
 0x393   :  { %4173 = vmatprep.subr.bf16.mxu0 %v8332_v35 }
 0x399   :  { %4164 = vmatmul.mubr.msk.bf16.vlgmr.msra.gmra.mrb[12].mxu0 %vm2753_vm1, %v3153_v58 }
 0x39a   :  { %4174 = vmatpush3.bf16.xpose.msra.mxu0 %v3281_v50  ;;  %4175 = vmatprep.mubr.msk.bf16.mxu0 %vm4390_vm2, %v8332_v35 }
 0x39b   :  { %4185 = vmatprep.subr.bf16.mxu0 %v8332_v35 }
 0x3a1   :  { %4176 = vmatmul.mubr.msk.bf16.vlgmr.msra.gmra.mrb[16].mxu0 %vm2753_vm1, %v3274_v59 }
 0x3a2   :  { %4189 = vmatprep.mubr.msk.bf16.mxu0 %vm4390_vm2, %v8332_v35 }
 0x454   :  { %v7542_v10 = vpop.f32.mrb[0].mxu0 }
 0x455   :  { %v4127_v28 = vpop.f32.mrb[1].mxu0 }
 0x456   :  { %v2798_v14 = vpop.f32.mrb[2].mxu0 }
 0x457   :  { %v4128_v21 = vpop.f32.mrb[3].mxu0 }
 0x45c   :  { %v2954_v48 = vpop.f32.mrb[4].mxu0 }
 0x45d   :  { %v2955_v42 = vadd.f32 %v2954_v48, %v2909_v45  ;;  %v4141_v3 = vpop.f32.mrb[5].mxu0 }
 0x45e   :  { %v2957_v2 = vpop.f32.mrb[6].mxu0 }
 0x45f   :  { %v2958_v47 = vadd.f32 %v2957_v2, %v2910_v11  ;;  %v4142_v56 = vpop.f32.mrb[7].mxu0  ;;  %v2961_v55 = vsel %vm362_vm4, %v2955_v42, -inf }
 0x460   :  { %2962 = vmax.xlane.f32.xlu1 %v2961_v55 }
 0x461   :  { %v2964_v44 = vsel %vm362_vm4, %v2958_v47, -inf }
 0x462   :  { %2965 = vmax.xlane.f32.xlu0 %v2964_v44 }
 0x464   :  { %v3075_v19 = vpop.f32.mrb[8].mxu0 }
 0x465   :  { %v3076_v41 = vadd.f32 %v3075_v19, %v2909_v45  ;;  %v4153_v18 = vpop.f32.mrb[9].mxu0 }
 0x466   :  { %v3078_v51 = vpop.f32.mrb[10].mxu0 }
 0x467   :  { %v3079_v20 = vadd.f32 %v3078_v51, %v2910_v11  ;;  %v4154_v37 = vpop.f32.mrb[11].mxu0  ;;  %v3082_v13 = vsel %vm362_vm4, %v3076_v41, -inf }
 0x468   :  { %3083 = vmax.xlane.f32.xlu0 %v3082_v13 }
 0x469   :  { %v3085_v9 = vsel %vm362_vm4, %v3079_v20, -inf }
 0x46c   :  { %3086 = vmax.xlane.f32.xlu0 %v3085_v9  ;;  %v3196_v1 = vpop.f32.mrb[12].mxu0 }
 0x46d   :  { %v3197_v31 = vadd.f32 %v3196_v1, %v2909_v45  ;;  %v4165_v24 = vpop.f32.mrb[13].mxu0 }
 0x46e   :  { %v3199_v60 = vpop.f32.mrb[14].mxu0 }
 0x46f   :  { %v3200_v25 = vadd.f32 %v3199_v60, %v2910_v11  ;;  %v4166_v32 = vpop.f32.mrb[15].mxu0  ;;  %v3203_v26 = vsel %vm362_vm4, %v3197_v31, -inf }
 0x470   :  { %3204 = vmax.xlane.f32.xlu1 %v3203_v26 }
 0x471   :  { %v3206_v22 = vsel %vm362_vm4, %v3200_v25, -inf }
 0x472   :  { %3207 = vmax.xlane.f32.xlu0 %v3206_v22 }
 0x474   :  { %v3317_v4 = vpop.f32.mrb[16].mxu0 }
 0x475   :  { %v3318_v52 = vadd.f32 %v3317_v4, %v2909_v45  ;;  %v4177_v6 = vpop.f32.mrb[17].mxu0 }
 0x476   :  { %v3320_v5 = vpop.f32.mrb[18].mxu0 }
 0x477   :  { %v3321_v53 = vadd.f32 %v3320_v5, %v2910_v11  ;;  %v4178_v34 = vpop.f32.mrb[19].mxu0  ;;  %v3324_v27 = vsel %vm362_vm4, %v3318_v52, -inf }
 0x478   :  { %3325 = vmax.xlane.f32.xlu1 %v3324_v27 }
 0x479   :  { %v3327_v49 = vsel %vm362_vm4, %v3321_v53, -inf }
 0x47a   :  { %3328 = vmax.xlane.f32.xlu0 %v3327_v49 }
 0x489   :  { %2984 = vrot.lane.b32.xlu1 %v7404_v15, %s4398_s4 }
 0x4ed   :  { %v2963_v8 = vpop.xlane.xlu1 %2962 }
 0x4ee   :  { %v2967_v38 = vsub.f32 %v2955_v42, %v2963_v8 }
 0x4ef   :  { %v2966_v46 = vpop.xlane.xlu0 %2965 }
 0x4f0   :  { %v2969_v57 = vmul.f32 1.442695, %v2967_v38  ;;  %v2968_v61 = vsub.f32 %v2958_v47, %v2966_v46 }
 0x4f2   :  { %4304 = vpow2.f32 %v2969_v57  ;;  %v2971_v29 = vmul.f32 1.442695, %v2968_v61 }
 0x4f4   :  { %4306 = vpow2.f32 %v2971_v29 }
 0x4f5   :  { %v3084_v23 = vpop.xlane.xlu0 %3083 }
 0x4f6   :  { %v3088_v54 = vsub.f32 %v3076_v41, %v3084_v23 }
 0x4f8   :  { %v3090_v12 = vmul.f32 1.442695, %v3088_v54 }
 0x4f9   :  { %v3087_v33 = vpop.xlane.xlu0 %3086 }
 0x4fa   :  { %4308 = vpow2.f32 %v3090_v12  ;;  %v3089_v62 = vsub.f32 %v3079_v20, %v3087_v33 }
 0x4fc   :  { %v4305_v30 = vpop.eup %4304  ;;  %v3092_v40 = vmul.f32 1.442695, %v3089_v62 }
 0x4fd   :  { %v3205_v16 = vpop.xlane.xlu1 %3204  ;;  %v2973_v63 = vsel %vm362_vm4, %v4305_v30, 0.0 }
 0x4fe   :  { %v4307_v7 = vpop.eup %4306  ;;  %4310 = vpow2.f32 %v3092_v40  ;;  %v3209_v17 = vsub.f32 %v3197_v31, %v3205_v16  ;;  %2974 = vadd.xlane.f32.xlu1 %v2973_v63 }
 0x4ff   :  { %v3208_v36 = vpop.xlane.xlu0 %3207  ;;  %v2976_v58 = vsel %vm362_vm4, %v4307_v7, 0.0 }
 0x500   :  { %v3211_v50 = vmul.f32 1.442695, %v3209_v17  ;;  %v3210_v59 = vsub.f32 %v3200_v25, %v3208_v36  ;;  %2977 = vadd.xlane.f32.xlu0 %v2976_v58 }
 0x502   :  { %4312 = vpow2.f32 %v3211_v50  ;;  %v3213_v28 = vmul.f32 1.442695, %v3210_v59  ;;  %v4282_v59 = vld [vmem:[%s7741_s6] sm:$0xff]  }
 0x503   :  { %4186 = vmatpush3.bf16.msra.mxu0 %v4282_v59 }
 0x504   :  { %v4309_v14 = vpop.eup %4308  ;;  %4314 = vpow2.f32 %v3213_v28  ;;  %4187 = vmatprep.subr.bf16.mxu0 %v8332_v35 }
 0x505   :  { %v3326_v21 = vpop.xlane.xlu1 %3325  ;;  %v3094_v45 = vsel %vm362_vm4, %v4309_v14, 0.0 }
 0x506   :  { %v3330_v48 = vsub.f32 %v3318_v52, %v3326_v21  ;;  %3095 = vadd.xlane.f32.xlu1 %v3094_v45 }
 0x507   :  { %v3329_v11 = vpop.xlane.xlu0 %3328 }
 0x508   :  { %v4311_v42 = vpop.eup %4310  ;;  %v3332_v3 = vmul.f32 1.442695, %v3330_v48  ;;  %v3331_v2 = vsub.f32 %v3321_v53, %v3329_v11  ;;  %v4283_v48 = vld [vmem:[%s7741_s6 + $0x8] sm:$0xff]  }
 0x509   :  { %v2985_v47 = vpop.permute.xlu1 %2984  ;;  %v3097_v56 = vsel %vm362_vm4, %v4311_v42, 0.0  ;;  %4188 = vmatpush3.bf16.msra.mxu0 %v4283_v48 }
 0x50a   :  { %4316 = vpow2.f32 %v3332_v3  ;;  %v3334_v55 = vmul.f32 1.442695, %v3331_v2  ;;  %4144 = vmatpush3.bf16.msra.mxu1 %v2985_v47  ;;  %3098 = vadd.xlane.f32.xlu0 %v3097_v56 }
 0x50b   :  { %4155 = vmatprep.subr.bf16.mxu1 %v8332_v35  ;;  %4201 = vmatprep.subr.bf16.mxu0 %v8332_v35 }
 0x50c   :  { %v4313_v44 = vpop.eup %4312  ;;  %4318 = vpow2.f32 %v3334_v55 }
 0x50d   :  { %v3215_v19 = vsel %vm362_vm4, %v4313_v44, 0.0 }
 0x50e   :  { %v4315_v41 = vpop.eup %4314  ;;  %3216 = vadd.xlane.f32.xlu1 %v3215_v19 }
 0x50f   :  { %v3218_v18 = vsel %vm362_vm4, %v4315_v41, 0.0 }
 0x510   :  { %3219 = vadd.xlane.f32.xlu0 %v3218_v18 }
 0x514   :  { %v4317_v51 = vpop.eup %4316 }
 0x515   :  { %v3336_v20 = vsel %vm362_vm4, %v4317_v51, 0.0 }
 0x516   :  { %v4319_v37 = vpop.eup %4318  ;;  %3337 = vadd.xlane.f32.xlu1 %v3336_v20 }
 0x517   :  { %v3339_v13 = vsel %vm362_vm4, %v4319_v37, 0.0 }
 0x518   :  { %3340 = vadd.xlane.f32.xlu0 %v3339_v13 }
 0x527   :  { %3226 = vrot.lane.b32.xlu1 %v7404_v15, %s4399_s23 }
 0x52b   :  { %3347 = vrot.lane.b32.xlu1 %v7404_v15, %s4400_s27 }
 0x52e   :  { %3105 = vrot.lane.b32.xlu0 %v7404_v15, %s4401_s15 }
 0x58b   :  { %v2975_v9 = vpop.xlane.xlu1 %2974 }
 0x58c   :  { %4320 = vrcp.f32 %v2975_v9 }
 0x58d   :  { %v2978_v1 = vpop.xlane.xlu0 %2977 }
 0x58e   :  { %4322 = vrcp.f32 %v2978_v1 }
 0x593   :  { %v3096_v26 = vpop.xlane.xlu1 %3095 }
 0x596   :  { %v4321_v31 = vpop.eup %4320 }
 0x597   :  { %v3099_v24 = vpop.xlane.xlu0 %3098  ;;  %v2981_v25 = vmul.f32 %v4321_v31, %v4305_v30 }
 0x598   :  { %v4323_v60 = vpop.eup %4322  ;;  %4324 = vrcp.f32 %v3099_v24 }
 0x599   :  { %v2982_v32 = vmul.f32 %v4323_v60, %v4307_v7  ;;  %4326 = vrcp.f32 %v3096_v26 }
 0x59b   :  { %v2983_v22 = vpack.c.bf16 %v2982_v32, %v2981_v25  ;;  %v3217_v15 = vpop.xlane.xlu1 %3216 }
 0x59d   :  { %4146 = vmatmul.mubr.msk.bf16.vlgmr.msra.gmra.mrb[4].mxu1 %vm362_vm4, %v2983_v22  ;;  %v3220_v4 = vpop.xlane.xlu0 %3219 }
 0x59e   :  { %4157 = vmatprep.mubr.msk.bf16.mxu1 %vm4390_vm2, %v8332_v35  ;;  %4328 = vrcp.f32 %v3220_v4  ;;  %v3432_v4 = vsub.s32 4, %v8311_v39 }
 0x59f   :  { %4330 = vrcp.f32 %v3217_v15 }
 0x5a0   :  { %v3433_v15 = vrot.slane %v7382_v0, %v3432_v4 }
 0x5a2   :  { %v4325_v52 = vpop.eup %4324 }
 0x5a3   :  { %v4327_v5 = vpop.eup %4326  ;;  %v3103_v53 = vmul.f32 %v4325_v52, %v4311_v42  ;;  %v3338_v34 = vpop.xlane.xlu1 %3337 }
 0x5a4   :  { %v3102_v27 = vmul.f32 %v4327_v5, %v4309_v14 }
 0x5a5   :  { %v3341_v6 = vpop.xlane.xlu0 %3340 }
 0x5a6   :  { %4332 = vrcp.f32 %v3341_v6  ;;  %v3104_v8 = vpack.c.bf16 %v3103_v53, %v3102_v27 }
 0x5a7   :  { %4334 = vrcp.f32 %v3338_v34  ;;  %v3227_v46 = vpop.permute.xlu1 %3226  ;;  %v8333_v34 = vld [vmem:[#allocation83_spill] sm:$0xff] }
 0x5a8   :  { %v4329_v38 = vpop.eup %4328 }
 0x5a9   :  { %v3106_v49 = vpop.permute.xlu0 %3105  ;;  %v4331_v57 = vpop.eup %4330  ;;  %v3224_v61 = vmul.f32 %v4329_v38, %v4315_v41  ;;  %v8334_v38 = vld [vmem:[#allocation84_spill] sm:$0xff] }
 0x5aa   :  { %4156 = vmatpush3.bf16.msra.mxu1 %v3106_v49  ;;  %v3223_v29 = vmul.f32 %v4331_v57, %v4313_v44 }
 0x5ab   :  { %4167 = vmatprep.subr.bf16.mxu1 %v8332_v35  ;;  %v3348_v12 = vpop.permute.xlu1 %3347 }
 0x5ac   :  { %v3225_v23 = vpack.c.bf16 %v3224_v61, %v3223_v29 }
 0x5ad   :  { %4158 = vmatmul.mubr.msk.bf16.vlgmr.msra.gmra.mrb[8].mxu1 %vm362_vm4, %v3104_v8 }
 0x5ae   :  { %4168 = vmatpush3.bf16.msra.mxu1 %v3227_v46  ;;  %4169 = vmatprep.mubr.msk.bf16.mxu1 %vm4390_vm2, %v8332_v35 }
 0x5af   :  { %4179 = vmatprep.subr.bf16.mxu1 %v8332_v35 }
 0x5b0   :  { %v4333_v54 = vpop.eup %4332 }
 0x5b1   :  { %v4335_v33 = vpop.eup %4334  ;;  %v3345_v62 = vmul.f32 %v4333_v54, %v4319_v37 }
 0x5b2   :  { %v3344_v30 = vmul.f32 %v4335_v33, %v4317_v51 }
 0x5b4   :  { %v3346_v40 = vpack.c.bf16 %v3345_v62, %v3344_v30 }
 0x5b5   :  { %4170 = vmatmul.mubr.msk.bf16.vlgmr.msra.gmra.mrb[12].mxu1 %vm362_vm4, %v3225_v23 }
 0x5b6   :  { %4180 = vmatpush3.bf16.msra.mxu1 %v3348_v12  ;;  %4181 = vmatprep.mubr.msk.bf16.mxu1 %vm4390_vm2, %v8332_v35 }
 0x5b7   :  { %4193 = vmatprep.subr.bf16.mxu1 %v8332_v35 }
 0x5bd   :  { %4182 = vmatmul.mubr.msk.bf16.vlgmr.msra.gmra.mrb[16].mxu1 %vm362_vm4, %v3346_v40 }
 0x5be   :  { %4197 = vmatprep.mubr.msk.bf16.mxu1 %vm4390_vm2, %v8332_v35 }
 0x670   :  { %v3024_v16 = vpop.f32.mrb[4].mxu1 }
 0x671   :  { %v4147_v63 = vpop.f32.mrb[5].mxu1 }
 0x672   :  { %v3027_v7 = vpop.f32.mrb[6].mxu1  ;;  %v4284_v63 = vld [vmem:[%s7742_s7] sm:$0xff]  }
 0x673   :  { %v4148_v17 = vpop.f32.mrb[7].mxu1  ;;  %4194 = vmatpush3.bf16.msra.mxu1 %v4284_v63 }
 0x674   :  { %4195 = vmatprep.subr.bf16.mxu1 %v8332_v35 }
 0x680   :  { %v3145_v36 = vpop.f32.mrb[8].mxu1 }
 0x681   :  { %v4159_v58 = vpop.f32.mrb[9].mxu1 }
 0x682   :  { %v3148_v50 = vpop.f32.mrb[10].mxu1 }
 0x683   :  { %v4265_v28 = vpack.i.bf16 %v3148_v50, %v3145_v36  ;;  %v4160_v14 = vpop.f32.mrb[11].mxu1 }
 0x684   :  { %v3520_v14 = vsub.s32 5, %v8311_v39 }
 0x685   :  { %4266 = vrot.lane.b32.xlu1 %v4265_v28, %s4386_s14  ;;  %s4403_s14 = smov 24  }
 0x688   :  { %v3266_v21 = vpop.f32.mrb[12].mxu1 }
 0x689   :  { %v4171_v45 = vpop.f32.mrb[13].mxu1 }
 0x68a   :  { %v3269_v11 = vpop.f32.mrb[14].mxu1  ;;  %v7624_v45 = vld [vmem:[%s7747_s12] sm:$0xff] }
 0x68b   :  { %v4270_v42 = vpack.i.bf16 %v3269_v11, %v3266_v21  ;;  %v4172_v3 = vpop.f32.mrb[15].mxu1  ;;  %v3521_v48 = vrot.slane %v7624_v45, %v3520_v14 }
 0x68d   :  { %4271 = vrot.lane.b32.xlu0 %v4270_v42, %s4402_s30  ;;  %v3526_v42 = vsub.s32 6, %v8311_v39 }
 0x690   :  { %v3387_v2 = vpop.f32.mrb[16].mxu1 }
 0x691   :  { %v4183_v47 = vpop.f32.mrb[17].mxu1 }
 0x692   :  { %v3390_v56 = vpop.f32.mrb[18].mxu1 }
 0x693   :  { %v4275_v55 = vpack.i.bf16 %v3390_v56, %v3387_v2  ;;  %v4184_v44 = vpop.f32.mrb[19].mxu1  ;;  %v3527_v56 = vrot.slane %v7624_v45, %v3526_v42 }
 0x695   :  { %4276 = vrot.lane.b32.xlu1 %v4275_v55, %s4403_s14 }
 0x6f7   :  { %v4267_v19 = vpop.permute.xlu1 %4266 }
 0x6f8   :  { %v4269_v18 = vunpack.i.h.bf16 %v4267_v19  ;;  %v4268_v51 = vunpack.i.l.bf16 %v4267_v19 }
 0x6fa   :  { %v3419_v9 = vsel %vm2753_vm1, %v3027_v7, %v4269_v18  ;;  %v3418_v1 = vsel %vm2753_vm1, %v3024_v16, %v4268_v51  ;;  %v4285_v7 = vld [vmem:[%s7742_s7 + $0x8] sm:$0xff]   ;;  %v4286_v18 = vld [vmem:[%s7743_s8] sm:$0xff]  }
 0x6fb   :  { %4196 = vmatpush3.bf16.msra.mxu1 %v4285_v7  ;;  %v4287_v51 = vld [vmem:[%s7743_s8 + $0x8] sm:$0xff]  }
 0x6fc   :  { %4221 = vmatprep.subr.bf16.mxu1 %v8332_v35 }
 0x6ff   :  { %v4272_v41 = vpop.permute.xlu0 %4271 }
 0x700   :  { %v4274_v20 = vunpack.i.h.bf16 %v4272_v41  ;;  %v4273_v37 = vunpack.i.l.bf16 %v4272_v41 }
 0x702   :  { %v3421_v60 = vsel %vm362_vm4, %v3419_v9, %v4274_v20  ;;  %v3420_v25 = vsel %vm362_vm4, %v3418_v1, %v4273_v37  ;;  %v4288_v20 = vld [vmem:[%s7743_s8 + $0x10] sm:$0xff]   ;;  %v4289_v37 = vld [vmem:[%s7743_s8 + $0x18] sm:$0xff]   ;;  %v4291_v9 = vld [vmem:[%s7743_s8 + $0x28] sm:$0xff]   ;;  %vm3766_vm4 = vcmask 1040384  }
 0x703   :  { %v4292_v1 = vld [vmem:[%s7743_s8 + $0x30] sm:$0xff]  }
 0x707   :  { %v4277_v13 = vpop.permute.xlu1 %4276 }
 0x708   :  { %v4279_v31 = vunpack.i.h.bf16 %v4277_v13  ;;  %v4278_v24 = vunpack.i.l.bf16 %v4277_v13  ;;  %v4290_v13 = vld [vmem:[%s7743_s8 + $0x20] sm:$0xff]  }
 0x70a   :  { %v3424_v32 = vsel %vm3422_vm3, %v3421_v60, %v4279_v31  ;;  %v3423_v26 = vsel %vm3422_vm3, %v3420_v25, %v4278_v24  ;;  %v4293_v31 = vld [vmem:[%s7743_s8 + $0x38] sm:$0xff]   ;;  %v3537_v24 = vsub.s32 7, %v8311_v39 }
 0x70b   :  { %v3425_v22 = vpack.c.bf16 %v3424_v32, %v3423_v26 }
 0x70c   :  { %v3538_v60 = vrot.slane %v7624_v45, %v3537_v24 }
 0x70d   :  { %4190 = vmatmul.mubr.msk.bf16.vlgmr.msra.gmra.mrb[20].mxu0 %vm2803_vm0, %v3425_v22 }
 0x70e   :  { %4217 = vmatprep.mubr.msk.bf16.mxu0 %vm4390_vm2, %v8332_v35  ;;  %4202 = vmatpush3.bf16.msra.mxu0 %v4286_v18 }
 0x70f   :  { %4203 = vmatprep.subr.bf16.mxu0 %v8332_v35 }
 0x712   :  { %4204 = vmatpush3.bf16.msra.mxu0 %v4287_v51  ;;  %v4295_v51 = vld [vmem:[%s7744_s9 + $0x8] sm:$0xff]  }
 0x713   :  { %4205 = vmatprep.subr.bf16.mxu0 %v8332_v35 }
 0x716   :  { %4206 = vmatpush3.bf16.msra.mxu0 %v4288_v20 }
 0x717   :  { %4207 = vmatprep.subr.bf16.mxu0 %v8332_v35 }
 0x71a   :  { %4208 = vmatpush3.bf16.msra.mxu0 %v4289_v37 }
 0x71b   :  { %4209 = vmatprep.subr.bf16.mxu0 %v8332_v35 }
 0x71e   :  { %4210 = vmatpush3.bf16.msra.mxu0 %v4290_v13 }
 0x71f   :  { %4211 = vmatprep.subr.bf16.mxu0 %v8332_v35 }
 0x722   :  { %4212 = vmatpush3.bf16.msra.mxu0 %v4291_v9 }
 0x723   :  { %4213 = vmatprep.subr.bf16.mxu0 %v8332_v35 }
 0x726   :  { %4214 = vmatpush3.bf16.msra.mxu0 %v4292_v1 }
 0x727   :  { %4215 = vmatprep.subr.bf16.mxu0 %v8332_v35 }
 0x72a   :  { %4216 = vmatpush3.bf16.msra.mxu0 %v4293_v31 }
 0x7e0   :  { %v3483_v52 = vpop.f32.mrb[20].mxu0 }
 0x7e1   :  { %v3484_v6 = vadd.f32 %v3483_v52, %v3433_v15  ;;  %v4191_v5 = vpop.f32.mrb[21].mxu0 }
 0x7e2   :  { %v3486_v53 = vpop.f32.mrb[22].mxu0 }
 0x7e3   :  { %v3490_v27 = vadd.f32 %v3484_v6, %v8333_v34  ;;  %v3487_v49 = vadd.f32 %v3486_v53, %v3433_v15  ;;  %v4192_v8 = vpop.f32.mrb[23].mxu0 }
 0x7e5   :  { %v3491_v46 = vadd.f32 %v3487_v49, %v8334_v38  ;;  %v3492_v57 = vsel %vm2803_vm0, %v3490_v27, 0.0 }
 0x7e6   :  { %3493 = vadd.xlane.f32.xlu0 %v3492_v57 }
 0x7e7   :  { %v3495_v61 = vsel %vm2803_vm0, %v3491_v46, 0.0 }
 0x7e8   :  { %3496 = vadd.xlane.f32.xlu1 %v3495_v61 }
 0x873   :  { %v3494_v29 = vpop.xlane.xlu0 %3493 }
 0x874   :  { %v3498_v23 = vmul.f32 0.03125, %v3494_v29 }
 0x875   :  { %v3497_v54 = vpop.xlane.xlu1 %3496 }
 0x876   :  { %v3500_v0 = vsub.f32 %v3490_v27, %v3498_v23  ;;  %v3499_v12 = vmul.f32 0.03125, %v3497_v54 }
 0x878   :  { %v3501_v33 = vsub.f32 %v3491_v46, %v3499_v12  ;;  %v3502_v62 = vmul.f32 %v3500_v0, %v3500_v0 }
 0x87a   :  { %v3504_v30 = vsel %vm2803_vm0, %v3502_v62, 0.0  ;;  %v3503_v40 = vmul.f32 %v3501_v33, %v3501_v33 }
 0x87b   :  { %3505 = vadd.xlane.f32.xlu0 %v3504_v30 }
 0x87c   :  { %v3507_v16 = vsel %vm2803_vm0, %v3503_v40, 0.0  ;;  %v7674_v40 = vld [vmem:[%s7747_s12 + $0x8] sm:$0xff] }
 0x87f   :  { %3508 = vadd.xlane.f32.xlu0 %v3507_v16  ;;  %v2751_v16 = vsub.s32 0, %v8311_v39 }
 0x881   :  { %v3633_v63 = vrot.slane %v7674_v40, %v2751_v16 }
 0x908   :  { %v3506_v17 = vpop.xlane.xlu0 %3505 }
 0x909   :  { %v3510_v36 = vmul.f32 0.03125, %v3506_v17 }
 0x90b   :  { %v3512_v58 = vadd.f32 1e-12, %v3510_v36 }
 0x90c   :  { %v3509_v50 = vpop.xlane.xlu0 %3508 }
 0x90d   :  { %4336 = vrsqrt.f32 %v3512_v58  ;;  %v3511_v59 = vmul.f32 0.03125, %v3509_v50 }
 0x90f   :  { %v3513_v28 = vadd.f32 1e-12, %v3511_v59 }
 0x911   :  { %4338 = vrsqrt.f32 %v3513_v28 }
 0x917   :  { %v4337_v21 = vpop.eup %4336 }
 0x918   :  { %v3516_v11 = vmul.f32 %v4337_v21, %v3500_v0 }
 0x91a   :  { %v3522_v2 = vmul.f32 %v3521_v48, %v3516_v11 }
 0x91b   :  { %v4339_v3 = vpop.eup %4338 }
 0x91c   :  { %v3517_v47 = vmul.f32 %v4339_v3, %v3501_v33  ;;  %v7629_v44 = vadd.f32 %v3527_v56, %v3522_v2 }
 0x91e   :  { %v3523_v55 = vmul.f32 %v3521_v48, %v3517_v47 }
 0x920   :  { %v7631_v19 = vadd.f32 %v3527_v56, %v3523_v55 }
 0x922   :  { %v3530_v41 = vpack.c.bf16 %v7631_v19, %v7629_v44 }
 0x924   :  { %4198 = vmatmul.mubr.msk.bf16.vlgmr.msra.gmra.mrb[20].mxu1 %vm2803_vm0, %v3530_v41 }
 0x925   :  { %4225 = vmatprep.mubr.msk.bf16.mxu1 %vm4390_vm2, %v8332_v35 }
 0x9f7   :  { %v3588_v25 = vpop.f32.mrb[20].mxu1 }
 0x9f8   :  { %v3589_v32 = vadd.f32 %v3588_v25, %v3538_v60  ;;  %v4199_v26 = vpop.f32.mrb[21].mxu1 }
 0x9f9   :  { %v3591_v22 = vpop.f32.mrb[22].mxu1 }
 0x9fa   :  { %v3595_v15 = vmul.f32 %v3589_v32, %v3589_v32  ;;  %v3592_v52 = vadd.f32 %v3591_v22, %v3538_v60  ;;  %v4200_v6 = vpop.f32.mrb[23].mxu1  ;;  %v8335_v60 = vsub.s32 1, %v8311_v39 }
 0x9fc   :  { %v3597_v5 = vmul.f32 %v3595_v15, %v3589_v32  ;;  %v3596_v53 = vmul.f32 %v3592_v52, %v3592_v52  ;;  %v3754_v25 = vrot.slane %v7674_v40, %v8335_v60  ;;  %v8336_v15 = vsub.s32 2, %v8311_v39 }
 0x9fe   :  { %v3599_v34 = vmul.f32 0.044715, %v3597_v5  ;;  %v3598_v27 = vmul.f32 %v3596_v53, %v3592_v52 }
 0xa00   :  { %v3601_v49 = vadd.f32 %v3599_v34, %v3589_v32  ;;  %v3600_v8 = vmul.f32 0.044715, %v3598_v27 }
 0xa02   :  { %v3603_v38 = vmul.f32 0.7978846, %v3601_v49  ;;  %v3602_v46 = vadd.f32 %v3600_v8, %v3592_v52 }
 0xa04   :  { %4340 = vtanh.f32 %v3603_v38  ;;  %v3604_v57 = vmul.f32 0.7978846, %v3602_v46  ;;  %v4296_v38 = vld [vmem:[%s7746_s11] sm:$0xff]   ;;  %v4297_v46 = vld [vmem:[%s7746_s11 + $0x8] sm:$0xff]  }
 0xa06   :  { %4342 = vtanh.f32 %v3604_v57  ;;  %v3776_v57 = vrot.slane %v7674_v40, %v2850_v43  ;;  %v4299_v43 = vld [vmem:[%s7745_s10 + $0x8] sm:$0xff]  }
 0xa0e   :  { %v4341_v61 = vpop.eup %4340 }
 0xa0f   :  { %v3607_v29 = vadd.f32 1.0, %v4341_v61 }
 0xa10   :  { %v4343_v23 = vpop.eup %4342 }
 0xa11   :  { %v3609_v54 = vmul.f32 0.5, %v3607_v29  ;;  %v3608_v0 = vadd.f32 1.0, %v4343_v23 }
 0xa13   :  { %v3610_v12 = vmul.f32 0.5, %v3608_v0  ;;  %v3611_v33 = vmul.f32 %v3609_v54, %v3589_v32 }
 0xa15   :  { %v3612_v62 = vmul.f32 %v3610_v12, %v3592_v52  ;;  %v3760_v52 = vrot.slane %v7674_v40, %v8336_v15 }
 0xa17   :  { %v3613_v30 = vpack.c.bf16 %v3612_v62, %v3611_v33  ;;  %v4298_v33 = vld [vmem:[%s7745_s10] sm:$0xff]   ;;  %v2752_v62 = vrot.slane %v7624_v45, %v2751_v16 }
 0xa19   :  { %4218 = vmatmul.mubr.bf16.vlgmr.msra.gmra.mrb[24].mxu0 %v3613_v30 }
 0xaec   :  { %v3716_v7 = vpop.f32.mrb[24].mxu0 }
 0xaed   :  { %v3717_v17 = vadd.f32 %v3716_v7, %v3633_v63  ;;  %v4219_v36 = vpop.f32.mrb[25].mxu0 }
 0xaee   :  { %v3719_v58 = vpop.f32.mrb[26].mxu0 }
 0xaef   :  { %v3723_v50 = vadd.f32 %v3717_v17, %v7629_v44  ;;  %v3720_v59 = vadd.f32 %v3719_v58, %v3633_v63  ;;  %v4220_v28 = vpop.f32.mrb[27].mxu0  ;;  %v2796_v63 = vadd.f32 %v7542_v10, %v2752_v62  ;;  %v3956_v58 = vrot.slane %v7674_v40, %v3432_v4 }
 0xaf1   :  { %v3724_v14 = vadd.f32 %v3720_v59, %v7631_v19  ;;  %v3725_v21 = vsel %vm2803_vm0, %v3723_v50, 0.0  ;;  %v4294_v19 = vld [vmem:[%s7744_s9] sm:$0xff]   ;;  %v3833_v7 = vpack.c.bf16 %v2796_v63, %v2796_v63 }
 0xaf2   :  { %3726 = vadd.xlane.f32.xlu1 %v3725_v21  ;;  %4222 = vmatpush3.bf16.msra.mxu1 %v4294_v19 }
 0xaf3   :  { %v3728_v48 = vsel %vm2803_vm0, %v3724_v14, 0.0  ;;  %4223 = vmatprep.subr.bf16.mxu1 %v8332_v35 }
 0xaf4   :  { %3729 = vadd.xlane.f32.xlu0 %v3728_v48 }
 0xaf6   :  { %4224 = vmatpush3.bf16.msra.mxu1 %v4295_v51 }
 0xaf7   :  { %4229 = vmatprep.subr.bf16.mxu1 %v8332_v35 }
 0xb7f   :  { %v3727_v11 = vpop.xlane.xlu1 %3726 }
 0xb80   :  { %v3731_v42 = vmul.f32 0.03125, %v3727_v11 }
 0xb81   :  { %v3730_v3 = vpop.xlane.xlu0 %3729 }
 0xb82   :  { %v3733_v2 = vsub.f32 %v3723_v50, %v3731_v42  ;;  %v3732_v47 = vmul.f32 0.03125, %v3730_v3 }
 0xb84   :  { %v3734_v56 = vsub.f32 %v3724_v14, %v3732_v47  ;;  %v3735_v55 = vmul.f32 %v3733_v2, %v3733_v2 }
 0xb86   :  { %v3737_v41 = vsel %vm2803_vm0, %v3735_v55, 0.0  ;;  %v3736_v44 = vmul.f32 %v3734_v56, %v3734_v56 }
 0xb87   :  { %3738 = vadd.xlane.f32.xlu1 %v3737_v41 }
 0xb88   :  { %v3740_v18 = vsel %vm2803_vm0, %v3736_v44, 0.0 }
 0xb89   :  { %3741 = vadd.xlane.f32.xlu0 %v3740_v18 }
 0xc14   :  { %v3739_v20 = vpop.xlane.xlu1 %3738 }
 0xc15   :  { %v3743_v37 = vmul.f32 0.03125, %v3739_v20 }
 0xc16   :  { %v3742_v13 = vpop.xlane.xlu0 %3741 }
 0xc17   :  { %v3745_v9 = vadd.f32 1e-12, %v3743_v37  ;;  %v3744_v1 = vmul.f32 0.03125, %v3742_v13 }
 0xc19   :  { %4344 = vrsqrt.f32 %v3745_v9  ;;  %v3746_v31 = vadd.f32 1e-12, %v3744_v1 }
 0xc1b   :  { %4346 = vrsqrt.f32 %v3746_v31 }
 0xc23   :  { %v4345_v24 = vpop.eup %4344 }
 0xc24   :  { %v3749_v32 = vmul.f32 %v4345_v24, %v3733_v2 }
 0xc25   :  { %v4347_v26 = vpop.eup %4346 }
 0xc26   :  { %v3750_v22 = vmul.f32 %v4347_v26, %v3734_v56  ;;  %v3755_v6 = vmul.f32 %v3754_v25, %v3749_v32 }
 0xc28   :  { %v3756_v5 = vmul.f32 %v3754_v25, %v3750_v22  ;;  %v3761_v34 = vadd.f32 %v3760_v52, %v3755_v6 }
 0xc2a   :  { %v3762_v53 = vadd.f32 %v3760_v52, %v3756_v5 }
 0xc2c   :  { %v3764_v27 = vrot.slane %v3762_v53, 7 }
 0xc2e   :  { %v3767_v49 = vsel %vm3766_vm4, %v3761_v34, %v3764_v27 }
 0xc2f   :  { %v3768_v8 = vpack.c.bf16 %v3767_v49, %v3767_v49 }
 0xc31   :  { %4226 = vmatmul.mubr.msk.bf16.vlgmr.msra.gmra.mrb[24].mxu1 %vm2803_vm0, %v3768_v8 }
 0xc32   :  { %4233 = vmatprep.mubr.msk.bf16.mxu1 %vm4390_vm2, %v8332_v35  ;;  %4230 = vmatpush3.bf16.msra.mxu1 %v4296_v38 }
 0xc33   :  { %4231 = vmatprep.subr.bf16.mxu1 %v8332_v35 }
 0xc36   :  { %4232 = vmatpush3.bf16.msra.mxu1 %v4297_v46 }
 0xc37   :  { %4237 = vmatprep.subr.bf16.mxu1 %v8332_v35 }
 0xd04   :  { %v3826_v61 = vpop.f32.mrb[24].mxu1 }
 0xd05   :  { %v3827_v29 = vadd.f32 %v3826_v61, %v3776_v57  ;;  %v4227_v23 = vpop.f32.mrb[25].mxu1 }
 0xd06   :  { %v3829_v54 = vpop.f32.mrb[26].mxu1 }
 0xd07   :  { %4348 = vtanh.f32 %v3827_v29  ;;  %v4228_v0 = vpop.f32.mrb[27].mxu1 }
 0xd11   :  { %v4349_v12 = vpop.eup %4348 }
 0xd12   :  { %v3838_v30 = vpack.c.bf16 %v4349_v12, %v4349_v12 }
 0xd14   :  { %4234 = vmatmul.mubr.msk.bf16.vlgmr.msra.gmra.mrb[28].mxu1 %vm2803_vm0, %v3838_v30 }
 0xd15   :  { %4238 = vmatpush3.bf16.msra.mxu1 %v4298_v33  ;;  %4241 = vmatprep.mubr.msk.bf16.mxu1 %vm4390_vm2, %v8332_v35 }
 0xd16   :  { %4239 = vmatprep.subr.bf16.mxu1 %v8332_v35 }
 0xd19   :  { %4240 = vmatpush3.bf16.msra.mxu1 %v4299_v43 }
 0xd1c   :  { %4242 = vmatmul.mubr.msk.bf16.vlgmr.msra.gmra.mrb[32].mxu1 %vm2803_vm0, %v3833_v7 }
 0xde7   :  { %v3892_v45 = vpop.f32.mrb[28].mxu1 }
 0xde8   :  { %v4235_v16 = vpop.f32.mrb[29].mxu1 }
 0xde9   :  { %v3895_v17 = vpop.f32.mrb[30].mxu1 }
 0xdea   :  { %v4236_v36 = vpop.f32.mrb[31].mxu1 }
 0xdef   :  { %v3947_v50 = vpop.f32.mrb[32].mxu1 }
 0xdf0   :  { %v3948_v59 = vadd.f32 %v3947_v50, %v3892_v45  ;;  %v4243_v28 = vpop.f32.mrb[33].mxu1 }
 0xdf1   :  { %v3950_v14 = vpop.f32.mrb[34].mxu1 }
 0xdf2   :  { %v3957_v21 = vadd.f32 %v3956_v58, %v3948_v59  ;;  %v4244_v10 = vpop.f32.mrb[35].mxu1 }
 0xdf4   :  { %3958 = vst [vmem:[%s7748_s13] sm:$0x3] %v3957_v21 }
 0xdf5   :  { %3963 = vsyncpa [#allocation3], 1 }

</bundles_post_ra>
